<compile_context>
chip_gen: v7x
topology: tpu7x:2x2x1
jax: 0.10.0
libtpu: 0.0.40
codegen_flags: <defaults>
</compile_context>

<pallas_src>
import math

import jax
import jax.numpy as jnp
from jax import lax
from jax.experimental import pallas as pl
from jax.experimental.pallas import tpu as pltpu

# ----------------------------- tiny BERT config ------------------------------
B, S = 2, 8              # batch, sequence length
HIDDEN = 64              # hidden size (stands in for 768)
N_HEADS = 4
HEAD_DIM = HIDDEN // N_HEADS
FFN = 128                # intermediate size (4*hidden)
N_LAYERS = 2             # stands in for 12
BERT_VOCAB = 32          # wordpiece vocab (synthetic)
MAX_POS = 16
NUM_LABELS = 8           # `vocab_size` argument of BERTPunctuator (punct labels)
LN_EPS = 1e-12

M_TOK = B * S
PRED_LANES = 128         # lane-dense prediction output (unmasked stores)

VMEM = pltpu.MemorySpace.VMEM
SMEM = pltpu.MemorySpace.SMEM


# ------------------------------ fused kernel ---------------------------------
def _fused_forward_kernel(ids_ref, tgt_ref,
                          word_emb_ref, pos_emb_ref, type_emb_ref,
                          emb_ln_g_ref, emb_ln_b_ref,
                          wq_ref, bq_ref, wk_ref, bk_ref, wv_ref, bv_ref,
                          wo_ref, bo_ref,
                          ln1_g_ref, ln1_b_ref,
                          w1_ref, b1_ref, w2_ref, b2_ref,
                          ln2_g_ref, ln2_b_ref,
                          fc_w_ref, fc_b_ref,
                          loss_ref, pred_ref,
                          attn_acc_ref):
    """Entire BERTPunctuator forward on a (B*S, HIDDEN) activation slab."""

    def layernorm(x, g, b):
        mu = jnp.mean(x, axis=-1, keepdims=True)
        var = jnp.mean((x - mu) ** 2, axis=-1, keepdims=True)
        return (x - mu) * lax.rsqrt(var + LN_EPS) * g + b

    def gelu(x):
        # tanh-approx GELU   # TODO(synk): HF BERT uses exact erf-GELU
        return 0.5 * x * (1.0 + jnp.tanh(0.7978845608028654 * (x + 0.044715 * x * x * x)))

    # ---- embeddings: in-kernel one-hot gathers (tables live in VMEM) ----
    ids = ids_ref[...]                                              # (M, 1) int32
    word_oh = (lax.broadcasted_iota(jnp.int32, (M_TOK, BERT_VOCAB), 1)
               == ids).astype(jnp.float32)                          # (M, VOCAB)
    word = jnp.dot(word_oh, word_emb_ref[...],
                   preferred_element_type=jnp.float32)              # (M, H)

    row = lax.broadcasted_iota(jnp.int32, (M_TOK, MAX_POS), 0)
    col = lax.broadcasted_iota(jnp.int32, (M_TOK, MAX_POS), 1)
    pos_oh = (col == row % S).astype(jnp.float32)                   # (M, MAX_POS)
    pos = jnp.dot(pos_oh, pos_emb_ref[...],
                  preferred_element_type=jnp.float32)               # (M, H)

    typ = type_emb_ref[0:1, :]                                      # token_type_ids == 0
    h = layernorm(word + pos + typ, emb_ln_g_ref[...], emb_ln_b_ref[...])

    scale = 1.0 / math.sqrt(HEAD_DIM)

    for li in range(N_LAYERS):                    # static unroll (2 layers)
        # ---- attention: accumulate head_out @ wo_slice directly (no concats) ----
        attn_acc_ref[...] = jnp.broadcast_to(bo_ref[li], (M_TOK, HIDDEN))
        for hh in range(N_HEADS):                 # static
            # per-head projections of the full (M, H) slab: no lane slicing
            q_h = jnp.dot(h, wq_ref[li, hh], preferred_element_type=jnp.float32) + bq_ref[li, hh]
            k_h = jnp.dot(h, wk_ref[li, hh], preferred_element_type=jnp.float32) + bk_ref[li, hh]
            v_h = jnp.dot(h, wv_ref[li, hh], preferred_element_type=jnp.float32) + bv_ref[li, hh]
            for b in range(B):                    # static; 8-sublane-aligned row slices
                r0 = b * S
                qb = q_h[r0:r0 + S, :]            # (S, Dh)
                kb = k_h[r0:r0 + S, :]
                vb = v_h[r0:r0 + S, :]
                # QK^T without an explicit transpose
                s = lax.dot_general(qb, kb, (((1,), (1,)), ((), ())),
                                    preferred_element_type=jnp.float32) * scale
                m = jnp.max(s, axis=-1, keepdims=True)
                p = jnp.exp(s - m)
                p = p / jnp.sum(p, axis=-1, keepdims=True)          # exact softmax
                ho = jnp.dot(p, vb, preferred_element_type=jnp.float32)      # (S, Dh)
                attn_acc_ref[r0:r0 + S, :] += jnp.dot(
                    ho, wo_ref[li, hh], preferred_element_type=jnp.float32)  # (S, H)

        # ---- residual + LN ----
        h = layernorm(h + attn_acc_ref[...], ln1_g_ref[li], ln1_b_ref[li])

        # ---- FFN + residual + LN ----
        f = gelu(jnp.dot(h, w1_ref[li], preferred_element_type=jnp.float32) + b1_ref[li])
        f = jnp.dot(f, w2_ref[li], preferred_element_type=jnp.float32) + b2_ref[li]
        h = layernorm(h + f, ln2_g_ref[li], ln2_b_ref[li])

    # ---- classification head (logits never leave VMEM) ----
    logits = jnp.dot(h, fc_w_ref[...], preferred_element_type=jnp.float32) + fc_b_ref[...]
    tgt = tgt_ref[...]                                              # (M, 1) int32
    idx = lax.broadcasted_iota(jnp.int32, (M_TOK, NUM_LABELS), 1)

    # argmax over labels (first index of max, like torch.argmax on ties);
    # stored lane-dense as (M, 128) — wrapper slices column 0.
    mx = jnp.max(logits, axis=-1, keepdims=True)
    cand = jnp.where(logits == mx, idx, NUM_LABELS)
    pred_col = jnp.min(cand, axis=-1, keepdims=True)                # (M, 1) int32
    pred_ref[...] = jnp.broadcast_to(pred_col, (M_TOK, PRED_LANES))

    # CrossEntropyLoss(ignore_index=0), mean over non-ignored tokens
    # (NaN if every target == 0, matching torch semantics)
    lse = mx + jnp.log(jnp.sum(jnp.exp(logits - mx), axis=-1, keepdims=True))
    onehot_t = (idx == tgt).astype(jnp.float32)
    correct = jnp.sum(logits * onehot_t, axis=-1, keepdims=True)
    per_tok = lse - correct                                         # (M, 1)
    mask = (tgt != 0).astype(jnp.float32)
    loss_ref[0, 0] = jnp.sum(per_tok * mask) / jnp.sum(mask)        # SMEM scalar


def fused_forward_call(fused, ids2d, tgt2d):
    m = ids2d.shape[0]
    cost = pl.CostEstimate(flops=2_600_000, transcendentals=6_000,
                           bytes_accessed=1_700_000)
    return pl.pallas_call(
        _fused_forward_kernel,
        out_shape=(jax.ShapeDtypeStruct((1, 1), jnp.float32),
                   jax.ShapeDtypeStruct((m, PRED_LANES), jnp.int32)),
        in_specs=[pl.BlockSpec(memory_space=VMEM)] * 25,
        out_specs=(pl.BlockSpec(memory_space=SMEM),
                   pl.BlockSpec(memory_space=VMEM)),
        scratch_shapes=[pltpu.VMEM((m, HIDDEN), jnp.float32)],
        compiler_params=pltpu.CompilerParams(vmem_limit_bytes=8 * 1024 * 1024),
        cost_estimate=cost,
    )(ids2d, tgt2d,
      fused["word_emb"], fused["pos_emb"], fused["type_emb"],
      fused["emb_ln_g"], fused["emb_ln_b"],
      fused["wq"], fused["bq"], fused["wk"], fused["bk"], fused["wv"], fused["bv"],
      fused["wo"], fused["bo"],
      fused["ln1_g"], fused["ln1_b"],
      fused["w1"], fused["b1"], fused["w2"], fused["b2"],
      fused["ln2_g"], fused["ln2_b"],
      fused["fc_w"], fused["fc_b"])


# ----------------------------- parameters (synthetic) ------------------------
def init_params(key):
    def nrm(k, shape, scale=0.02):
        return scale * jax.random.normal(k, shape, dtype=jnp.float32)

    keys = jax.random.split(key, 8 + N_LAYERS)
    p = {
        "word_emb": nrm(keys[0], (BERT_VOCAB, HIDDEN)),
        "pos_emb": nrm(keys[1], (MAX_POS, HIDDEN)),
        "type_emb": nrm(keys[2], (2, HIDDEN)),
        "emb_ln_g": jnp.ones((1, HIDDEN), jnp.float32),
        "emb_ln_b": jnp.zeros((1, HIDDEN), jnp.float32),
        "fc_w": nrm(keys[3], (HIDDEN, NUM_LABELS)),
        "fc_b": jnp.zeros((1, NUM_LABELS), jnp.float32),
        "layers": [],
    }
    for li in range(N_LAYERS):
        lk = jax.random.split(keys[8 + li], 6)
        p["layers"].append({
            "wq": nrm(lk[0], (HIDDEN, HIDDEN)), "bq": jnp.zeros((1, HIDDEN), jnp.float32),
            "wk": nrm(lk[1], (HIDDEN, HIDDEN)), "bk": jnp.zeros((1, HIDDEN), jnp.float32),
            "wv": nrm(lk[2], (HIDDEN, HIDDEN)), "bv": jnp.zeros((1, HIDDEN), jnp.float32),
            "wo": nrm(lk[3], (HIDDEN, HIDDEN)), "bo": jnp.zeros((1, HIDDEN), jnp.float32),
            "ln1_g": jnp.ones((1, HIDDEN), jnp.float32), "ln1_b": jnp.zeros((1, HIDDEN), jnp.float32),
            "w1": nrm(lk[4], (HIDDEN, FFN)), "b1": jnp.zeros((1, FFN), jnp.float32),
            "w2": nrm(lk[5], (FFN, HIDDEN)), "b2": jnp.zeros((1, HIDDEN), jnp.float32),
            "ln2_g": jnp.ones((1, HIDDEN), jnp.float32), "ln2_b": jnp.zeros((1, HIDDEN), jnp.float32),
        })
    return p


def prepare_fused_params(p):
    """One-time per-head weight splitting / stacking (outside the hot path)."""
    ls = p["layers"]

    def split_cols(m):   # (R, H) -> (NH, R, Dh): columns of head hh
        return jnp.stack([m[:, hh * HEAD_DIM:(hh + 1) * HEAD_DIM] for hh in range(N_HEADS)])

    def split_rows(m):   # (H, C) -> (NH, Dh, C): rows of head hh
        return jnp.stack([m[hh * HEAD_DIM:(hh + 1) * HEAD_DIM, :] for hh in range(N_HEADS)])

    return {
        "word_emb": p["word_emb"], "pos_emb": p["pos_emb"], "type_emb": p["type_emb"],
        "emb_ln_g": p["emb_ln_g"], "emb_ln_b": p["emb_ln_b"],
        "fc_w": p["fc_w"], "fc_b": p["fc_b"],
        "wq": jnp.stack([split_cols(l["wq"]) for l in ls]),   # (L, NH, H, Dh)
        "bq": jnp.stack([split_cols(l["bq"]) for l in ls]),   # (L, NH, 1, Dh)
        "wk": jnp.stack([split_cols(l["wk"]) for l in ls]),
        "bk": jnp.stack([split_cols(l["bk"]) for l in ls]),
        "wv": jnp.stack([split_cols(l["wv"]) for l in ls]),
        "bv": jnp.stack([split_cols(l["bv"]) for l in ls]),
        "wo": jnp.stack([split_rows(l["wo"]) for l in ls]),   # (L, NH, Dh, H)
        "bo": jnp.stack([l["bo"] for l in ls]),               # (L, 1, H)
        "ln1_g": jnp.stack([l["ln1_g"] for l in ls]), "ln1_b": jnp.stack([l["ln1_b"] for l in ls]),
        "w1": jnp.stack([l["w1"] for l in ls]), "b1": jnp.stack([l["b1"] for l in ls]),
        "w2": jnp.stack([l["w2"] for l in ls]), "b2": jnp.stack([l["b2"] for l in ls]),
        "ln2_g": jnp.stack([l["ln2_g"] for l in ls]), "ln2_b": jnp.stack([l["ln2_b"] for l in ls]),
    }


# --------------------------------- forward -----------------------------------
@jax.jit
def bert_punctuator_forward(fused, input_ids, targets):
    """Returns (loss, pred_labels) like BERTPunctuator.forward."""
    Bc, Sc = input_ids.shape
    ids2d = input_ids.reshape(Bc * Sc, 1).astype(jnp.int32)
    tgt2d = targets.reshape(Bc * Sc, 1).astype(jnp.int32)
    loss, pred = fused_forward_call(fused, ids2d, tgt2d)
    return loss[0, 0], pred[:, 0].reshape(Bc, Sc)   # int32 preds (torch: int64)


# ----------------------------------- main -------------------------------------
if __name__ == "__main__":
    key = jax.random.PRNGKey(0)
    k_ids, k_tgt, k_par = jax.random.split(key, 3)

    input_ids = jax.random.randint(k_ids, (B, S), 0, BERT_VOCAB, dtype=jnp.int32)
    targets = jax.random.randint(k_tgt, (B, S), 0, NUM_LABELS, dtype=jnp.int32)
    params = init_params(k_par)
    fused = prepare_fused_params(params)

    loss, pred_labels = bert_punctuator_forward(fused, input_ids, targets)
    loss = jax.block_until_ready(loss)
    pred_labels = jax.block_until_ready(pred_labels)

    assert pred_labels.shape == (B, S)
    assert jnp.isfinite(loss)
    print("KERNEL_OK")
</pallas_src>

<mosaic_0001>
module attributes {stable_mosaic.version = 11 : i64} {
  func.func @_fused_forward_kernel(%arg0: memref<16x1xi32, #tpu.memory_space<vmem>>, %arg1: memref<16x1xi32, #tpu.memory_space<vmem>>, %arg2: memref<32x64xf32, #tpu.memory_space<vmem>>, %arg3: memref<16x64xf32, #tpu.memory_space<vmem>>, %arg4: memref<2x64xf32, #tpu.memory_space<vmem>>, %arg5: memref<1x64xf32, #tpu.memory_space<vmem>>, %arg6: memref<1x64xf32, #tpu.memory_space<vmem>>, %arg7: memref<2x4x64x16xf32, #tpu.memory_space<vmem>>, %arg8: memref<2x4x1x16xf32, #tpu.memory_space<vmem>>, %arg9: memref<2x4x64x16xf32, #tpu.memory_space<vmem>>, %arg10: memref<2x4x1x16xf32, #tpu.memory_space<vmem>>, %arg11: memref<2x4x64x16xf32, #tpu.memory_space<vmem>>, %arg12: memref<2x4x1x16xf32, #tpu.memory_space<vmem>>, %arg13: memref<2x4x16x64xf32, #tpu.memory_space<vmem>>, %arg14: memref<2x1x64xf32, #tpu.memory_space<vmem>>, %arg15: memref<2x1x64xf32, #tpu.memory_space<vmem>>, %arg16: memref<2x1x64xf32, #tpu.memory_space<vmem>>, %arg17: memref<2x64x128xf32, #tpu.memory_space<vmem>>, %arg18: memref<2x1x128xf32, #tpu.memory_space<vmem>>, %arg19: memref<2x128x64xf32, #tpu.memory_space<vmem>>, %arg20: memref<2x1x64xf32, #tpu.memory_space<vmem>>, %arg21: memref<2x1x64xf32, #tpu.memory_space<vmem>>, %arg22: memref<2x1x64xf32, #tpu.memory_space<vmem>>, %arg23: memref<64x8xf32, #tpu.memory_space<vmem>>, %arg24: memref<1x8xf32, #tpu.memory_space<vmem>>, %arg25: memref<1x1xf32, #tpu.memory_space<smem>>, %arg26: memref<16x128xi32, #tpu.memory_space<vmem>>, %arg27: memref<16x64xf32, #tpu.memory_space<vmem>>) attributes {dimension_semantics = [], scalar_prefetch = 0 : i64, scratch_operands = 1 : i64, tpu.core_type = #tpu.core_type<tc>} {
    %c0 = arith.constant 0 : index
    %c0_0 = arith.constant 0 : index
    %0 = vector.load %arg0[%c0, %c0_0] : memref<16x1xi32, #tpu.memory_space<vmem>>, vector<16x1xi32>
    %1 = tpu.iota {dimensions = array<i32: 1>} : vector<16x32xi32>
    %2 = vector.broadcast %0 : vector<16x1xi32> to vector<16x32xi32>
    %3 = arith.cmpi eq, %1, %2 : vector<16x32xi32>
    %4 = arith.extui %3 : vector<16x32xi1> to vector<16x32xi32>
    %5 = arith.sitofp %4 : vector<16x32xi32> to vector<16x32xf32>
    %c0_1 = arith.constant 0 : index
    %c0_2 = arith.constant 0 : index
    %6 = vector.load %arg2[%c0_1, %c0_2] : memref<32x64xf32, #tpu.memory_space<vmem>>, vector<32x64xf32>
    %cst = arith.constant dense<0.000000e+00> : vector<16x64xf32>
    %7 = tpu.matmul %5, %6, %cst {dimension_numbers = #tpu.dot_dimension_numbers<[1], [0], [0], [1], [0, 0, 1, 1], [], []>} : vector<16x32xf32>, vector<32x64xf32>, vector<16x64xf32> -> vector<16x64xf32>
    %8 = tpu.iota {dimensions = array<i32: 0>} : vector<16x16xi32>
    %9 = tpu.iota {dimensions = array<i32: 1>} : vector<16x16xi32>
    %c8_i32 = arith.constant 8 : i32
    %c0_i32 = arith.constant 0 : i32
    %10 = arith.cmpi eq, %c8_i32, %c0_i32 : i32
    %c1_i32 = arith.constant 1 : i32
    %11 = arith.select %10, %c1_i32, %c8_i32 : i32
    %12 = vector.broadcast %11 : i32 to vector<16x16xi32>
    %13 = arith.remsi %8, %12 : vector<16x16xi32>
    %c0_i32_3 = arith.constant 0 : i32
    %14 = vector.broadcast %c0_i32_3 : i32 to vector<16x16xi32>
    %15 = arith.cmpi ne, %13, %14 : vector<16x16xi32>
    %c0_i32_4 = arith.constant 0 : i32
    %16 = vector.broadcast %c0_i32_4 : i32 to vector<16x16xi32>
    %17 = arith.cmpi slt, %13, %16 : vector<16x16xi32>
    %c0_i32_5 = arith.constant 0 : i32
    %18 = arith.cmpi slt, %11, %c0_i32_5 : i32
    %19 = vector.broadcast %18 : i1 to vector<16x16xi1>
    %20 = vector.broadcast %19 : vector<16x16xi1> to vector<16x16xi1>
    %21 = arith.xori %17, %20 : vector<16x16xi1>
    %22 = arith.andi %21, %15 : vector<16x16xi1>
    %23 = vector.broadcast %11 : i32 to vector<16x16xi32>
    %24 = arith.addi %13, %23 : vector<16x16xi32>
    %25 = arith.select %22, %24, %13 : vector<16x16xi1>, vector<16x16xi32>
    %26 = arith.cmpi eq, %9, %25 : vector<16x16xi32>
    %27 = arith.extui %26 : vector<16x16xi1> to vector<16x16xi32>
    %28 = arith.sitofp %27 : vector<16x16xi32> to vector<16x16xf32>
    %c0_6 = arith.constant 0 : index
    %c0_7 = arith.constant 0 : index
    %29 = vector.load %arg3[%c0_6, %c0_7] : memref<16x64xf32, #tpu.memory_space<vmem>>, vector<16x64xf32>
    %cst_8 = arith.constant dense<0.000000e+00> : vector<16x64xf32>
    %30 = tpu.matmul %28, %29, %cst_8 {dimension_numbers = #tpu.dot_dimension_numbers<[1], [0], [0], [1], [0, 0, 1, 1], [], []>} : vector<16x16xf32>, vector<16x64xf32>, vector<16x64xf32> -> vector<16x64xf32>
    %c0_9 = arith.constant 0 : index
    %c0_10 = arith.constant 0 : index
    %31 = vector.load %arg4[%c0_9, %c0_10] : memref<2x64xf32, #tpu.memory_space<vmem>>, vector<1x64xf32>
    %32 = arith.addf %7, %30 : vector<16x64xf32>
    %33 = vector.broadcast %31 : vector<1x64xf32> to vector<16x64xf32>
    %34 = arith.addf %32, %33 : vector<16x64xf32>
    %c0_11 = arith.constant 0 : index
    %c0_12 = arith.constant 0 : index
    %35 = vector.load %arg5[%c0_11, %c0_12] : memref<1x64xf32, #tpu.memory_space<vmem>>, vector<1x64xf32>
    %c0_13 = arith.constant 0 : index
    %c0_14 = arith.constant 0 : index
    %36 = vector.load %arg6[%c0_13, %c0_14] : memref<1x64xf32, #tpu.memory_space<vmem>>, vector<1x64xf32>
    %cst_15 = arith.constant dense<0.000000e+00> : vector<16xf32>
    %37 = vector.multi_reduction <add>, %34, %cst_15 [1] : vector<16x64xf32> to vector<16xf32>
    %38 = vector.shape_cast %37 : vector<16xf32> to vector<16x1xf32>
    %cst_16 = arith.constant 6.400000e+01 : f32
    %39 = vector.broadcast %cst_16 : f32 to vector<16x1xf32>
    %40 = arith.divf %38, %39 : vector<16x1xf32>
    %41 = vector.broadcast %40 : vector<16x1xf32> to vector<16x64xf32>
    %42 = arith.subf %34, %41 : vector<16x64xf32>
    %43 = arith.mulf %42, %42 : vector<16x64xf32>
    %cst_17 = arith.constant dense<0.000000e+00> : vector<16xf32>
    %44 = vector.multi_reduction <add>, %43, %cst_17 [1] : vector<16x64xf32> to vector<16xf32>
    %45 = vector.shape_cast %44 : vector<16xf32> to vector<16x1xf32>
    %cst_18 = arith.constant 6.400000e+01 : f32
    %46 = vector.broadcast %cst_18 : f32 to vector<16x1xf32>
    %47 = arith.divf %45, %46 : vector<16x1xf32>
    %48 = vector.broadcast %40 : vector<16x1xf32> to vector<16x64xf32>
    %49 = arith.subf %34, %48 : vector<16x64xf32>
    %cst_19 = arith.constant 9.99999996E-13 : f32
    %50 = vector.broadcast %cst_19 : f32 to vector<16x1xf32>
    %51 = arith.addf %47, %50 : vector<16x1xf32>
    %52 = math.rsqrt %51 : vector<16x1xf32>
    %53 = vector.broadcast %52 : vector<16x1xf32> to vector<16x64xf32>
    %54 = arith.mulf %49, %53 : vector<16x64xf32>
    %55 = vector.broadcast %35 : vector<1x64xf32> to vector<16x64xf32>
    %56 = arith.mulf %54, %55 : vector<16x64xf32>
    %57 = vector.broadcast %36 : vector<1x64xf32> to vector<16x64xf32>
    %58 = arith.addf %56, %57 : vector<16x64xf32>
    %c0_20 = arith.constant 0 : index
    %c0_21 = arith.constant 0 : index
    %c0_22 = arith.constant 0 : index
    %59 = vector.load %arg14[%c0_20, %c0_21, %c0_22] : memref<2x1x64xf32, #tpu.memory_space<vmem>>, vector<1x1x64xf32>
    %60 = vector.shape_cast %59 : vector<1x1x64xf32> to vector<1x64xf32>
    %61 = vector.shape_cast %60 : vector<1x64xf32> to vector<1x64xf32>
    %62 = vector.broadcast %61 : vector<1x64xf32> to vector<16x64xf32>
    %c0_23 = arith.constant 0 : index
    %c0_24 = arith.constant 0 : index
    %63 = vector.load %arg27[%c0_23, %c0_24] : memref<16x64xf32, #tpu.memory_space<vmem>>, vector<16x64xf32>
    tpu.vector_store %arg27[%c0_23, %c0_24], %62 {strides = array<i32>} : memref<16x64xf32, #tpu.memory_space<vmem>>, vector<16x64xf32>,
    %c0_25 = arith.constant 0 : index
    %c0_26 = arith.constant 0 : index
    %c0_27 = arith.constant 0 : index
    %c0_28 = arith.constant 0 : index
    %64 = vector.load %arg7[%c0_25, %c0_26, %c0_27, %c0_28] : memref<2x4x64x16xf32, #tpu.memory_space<vmem>>, vector<1x1x64x16xf32>
    %65 = vector.shape_cast %64 : vector<1x1x64x16xf32> to vector<64x16xf32>
    %cst_29 = arith.constant dense<0.000000e+00> : vector<16x16xf32>
    %66 = tpu.matmul %58, %65, %cst_29 {dimension_numbers = #tpu.dot_dimension_numbers<[1], [0], [0], [1], [0, 0, 1, 1], [], []>} : vector<16x64xf32>, vector<64x16xf32>, vector<16x16xf32> -> vector<16x16xf32>
    %c0_30 = arith.constant 0 : index
    %c0_31 = arith.constant 0 : index
    %c0_32 = arith.constant 0 : index
    %c0_33 = arith.constant 0 : index
    %67 = vector.load %arg8[%c0_30, %c0_31, %c0_32, %c0_33] : memref<2x4x1x16xf32, #tpu.memory_space<vmem>>, vector<1x1x1x16xf32>
    %68 = vector.shape_cast %67 : vector<1x1x1x16xf32> to vector<1x16xf32>
    %69 = vector.broadcast %68 : vector<1x16xf32> to vector<16x16xf32>
    %70 = arith.addf %66, %69 : vector<16x16xf32>
    %c0_34 = arith.constant 0 : index
    %c0_35 = arith.constant 0 : index
    %c0_36 = arith.constant 0 : index
    %c0_37 = arith.constant 0 : index
    %71 = vector.load %arg9[%c0_34, %c0_35, %c0_36, %c0_37] : memref<2x4x64x16xf32, #tpu.memory_space<vmem>>, vector<1x1x64x16xf32>
    %72 = vector.shape_cast %71 : vector<1x1x64x16xf32> to vector<64x16xf32>
    %cst_38 = arith.constant dense<0.000000e+00> : vector<16x16xf32>
    %73 = tpu.matmul %58, %72, %cst_38 {dimension_numbers = #tpu.dot_dimension_numbers<[1], [0], [0], [1], [0, 0, 1, 1], [], []>} : vector<16x64xf32>, vector<64x16xf32>, vector<16x16xf32> -> vector<16x16xf32>
    %c0_39 = arith.constant 0 : index
    %c0_40 = arith.constant 0 : index
    %c0_41 = arith.constant 0 : index
    %c0_42 = arith.constant 0 : index
    %74 = vector.load %arg10[%c0_39, %c0_40, %c0_41, %c0_42] : memref<2x4x1x16xf32, #tpu.memory_space<vmem>>, vector<1x1x1x16xf32>
    %75 = vector.shape_cast %74 : vector<1x1x1x16xf32> to vector<1x16xf32>
    %76 = vector.broadcast %75 : vector<1x16xf32> to vector<16x16xf32>
    %77 = arith.addf %73, %76 : vector<16x16xf32>
    %c0_43 = arith.constant 0 : index
    %c0_44 = arith.constant 0 : index
    %c0_45 = arith.constant 0 : index
    %c0_46 = arith.constant 0 : index
    %78 = vector.load %arg11[%c0_43, %c0_44, %c0_45, %c0_46] : memref<2x4x64x16xf32, #tpu.memory_space<vmem>>, vector<1x1x64x16xf32>
    %79 = vector.shape_cast %78 : vector<1x1x64x16xf32> to vector<64x16xf32>
    %cst_47 = arith.constant dense<0.000000e+00> : vector<16x16xf32>
    %80 = tpu.matmul %58, %79, %cst_47 {dimension_numbers = #tpu.dot_dimension_numbers<[1], [0], [0], [1], [0, 0, 1, 1], [], []>} : vector<16x64xf32>, vector<64x16xf32>, vector<16x16xf32> -> vector<16x16xf32>
    %c0_48 = arith.constant 0 : index
    %c0_49 = arith.constant 0 : index
    %c0_50 = arith.constant 0 : index
    %c0_51 = arith.constant 0 : index
    %81 = vector.load %arg12[%c0_48, %c0_49, %c0_50, %c0_51] : memref<2x4x1x16xf32, #tpu.memory_space<vmem>>, vector<1x1x1x16xf32>
    %82 = vector.shape_cast %81 : vector<1x1x1x16xf32> to vector<1x16xf32>
    %83 = vector.broadcast %82 : vector<1x16xf32> to vector<16x16xf32>
    %84 = arith.addf %80, %83 : vector<16x16xf32>
    %85 = vector.extract_strided_slice %70 {offsets = [0, 0], sizes = [8, 16], strides = [1, 1]} : vector<16x16xf32> to vector<8x16xf32>
    %86 = vector.extract_strided_slice %77 {offsets = [0, 0], sizes = [8, 16], strides = [1, 1]} : vector<16x16xf32> to vector<8x16xf32>
    %87 = vector.extract_strided_slice %84 {offsets = [0, 0], sizes = [8, 16], strides = [1, 1]} : vector<16x16xf32> to vector<8x16xf32>
    %cst_52 = arith.constant dense<0.000000e+00> : vector<8x8xf32>
    %88 = tpu.matmul %85, %86, %cst_52 {dimension_numbers = #tpu.dot_dimension_numbers<[1], [1], [0], [0], [0, 0, 1, 0], [], []>} : vector<8x16xf32>, vector<8x16xf32>, vector<8x8xf32> -> vector<8x8xf32>
    %cst_53 = arith.constant 2.500000e-01 : f32
    %89 = vector.broadcast %cst_53 : f32 to vector<8x8xf32>
    %90 = arith.mulf %88, %89 : vector<8x8xf32>
    %cst_54 = arith.constant dense<0xFF800000> : vector<8xf32>
    %91 = vector.multi_reduction <maximumf>, %90, %cst_54 [1] : vector<8x8xf32> to vector<8xf32>
    %92 = vector.shape_cast %91 : vector<8xf32> to vector<8x1xf32>
    %93 = vector.broadcast %92 : vector<8x1xf32> to vector<8x8xf32>
    %94 = arith.subf %90, %93 : vector<8x8xf32>
    %95 = math.exp %94 : vector<8x8xf32>
    %cst_55 = arith.constant dense<0.000000e+00> : vector<8xf32>
    %96 = vector.multi_reduction <add>, %95, %cst_55 [1] : vector<8x8xf32> to vector<8xf32>
    %97 = vector.shape_cast %96 : vector<8xf32> to vector<8x1xf32>
    %98 = vector.broadcast %97 : vector<8x1xf32> to vector<8x8xf32>
    %99 = arith.divf %95, %98 : vector<8x8xf32>
    %cst_56 = arith.constant dense<0.000000e+00> : vector<8x16xf32>
    %100 = tpu.matmul %99, %87, %cst_56 {dimension_numbers = #tpu.dot_dimension_numbers<[1], [0], [0], [1], [0, 0, 1, 1], [], []>} : vector<8x8xf32>, vector<8x16xf32>, vector<8x16xf32> -> vector<8x16xf32>
    %c0_57 = arith.constant 0 : index
    %c0_58 = arith.constant 0 : index
    %101 = vector.load %arg27[%c0_57, %c0_58] : memref<16x64xf32, #tpu.memory_space<vmem>>, vector<8x64xf32>
    %c0_59 = arith.constant 0 : index
    %c0_60 = arith.constant 0 : index
    %c0_61 = arith.constant 0 : index
    %c0_62 = arith.constant 0 : index
    %102 = vector.load %arg13[%c0_59, %c0_60, %c0_61, %c0_62] : memref<2x4x16x64xf32, #tpu.memory_space<vmem>>, vector<1x1x16x64xf32>
    %103 = vector.shape_cast %102 : vector<1x1x16x64xf32> to vector<16x64xf32>
    %cst_63 = arith.constant dense<0.000000e+00> : vector<8x64xf32>
    %104 = tpu.matmul %100, %103, %cst_63 {dimension_numbers = #tpu.dot_dimension_numbers<[1], [0], [0], [1], [0, 0, 1, 1], [], []>} : vector<8x16xf32>, vector<16x64xf32>, vector<8x64xf32> -> vector<8x64xf32>
    %105 = arith.addf %101, %104 : vector<8x64xf32>
    %c0_64 = arith.constant 0 : index
    %c0_65 = arith.constant 0 : index
    %106 = vector.load %arg27[%c0_64, %c0_65] : memref<16x64xf32, #tpu.memory_space<vmem>>, vector<8x64xf32>
    tpu.vector_store %arg27[%c0_64, %c0_65], %105 {strides = array<i32>} : memref<16x64xf32, #tpu.memory_space<vmem>>, vector<8x64xf32>,
    %107 = vector.extract_strided_slice %70 {offsets = [8, 0], sizes = [8, 16], strides = [1, 1]} : vector<16x16xf32> to vector<8x16xf32>
    %108 = vector.extract_strided_slice %77 {offsets = [8, 0], sizes = [8, 16], strides = [1, 1]} : vector<16x16xf32> to vector<8x16xf32>
    %109 = vector.extract_strided_slice %84 {offsets = [8, 0], sizes = [8, 16], strides = [1, 1]} : vector<16x16xf32> to vector<8x16xf32>
    %cst_66 = arith.constant dense<0.000000e+00> : vector<8x8xf32>
    %110 = tpu.matmul %107, %108, %cst_66 {dimension_numbers = #tpu.dot_dimension_numbers<[1], [1], [0], [0], [0, 0, 1, 0], [], []>} : vector<8x16xf32>, vector<8x16xf32>, vector<8x8xf32> -> vector<8x8xf32>
    %cst_67 = arith.constant 2.500000e-01 : f32
    %111 = vector.broadcast %cst_67 : f32 to vector<8x8xf32>
    %112 = arith.mulf %110, %111 : vector<8x8xf32>
    %cst_68 = arith.constant dense<0xFF800000> : vector<8xf32>
    %113 = vector.multi_reduction <maximumf>, %112, %cst_68 [1] : vector<8x8xf32> to vector<8xf32>
    %114 = vector.shape_cast %113 : vector<8xf32> to vector<8x1xf32>
    %115 = vector.broadcast %114 : vector<8x1xf32> to vector<8x8xf32>
    %116 = arith.subf %112, %115 : vector<8x8xf32>
    %117 = math.exp %116 : vector<8x8xf32>
    %cst_69 = arith.constant dense<0.000000e+00> : vector<8xf32>
    %118 = vector.multi_reduction <add>, %117, %cst_69 [1] : vector<8x8xf32> to vector<8xf32>
    %119 = vector.shape_cast %118 : vector<8xf32> to vector<8x1xf32>
    %120 = vector.broadcast %119 : vector<8x1xf32> to vector<8x8xf32>
    %121 = arith.divf %117, %120 : vector<8x8xf32>
    %cst_70 = arith.constant dense<0.000000e+00> : vector<8x16xf32>
    %122 = tpu.matmul %121, %109, %cst_70 {dimension_numbers = #tpu.dot_dimension_numbers<[1], [0], [0], [1], [0, 0, 1, 1], [], []>} : vector<8x8xf32>, vector<8x16xf32>, vector<8x16xf32> -> vector<8x16xf32>
    %c8 = arith.constant 8 : index
    %c0_71 = arith.constant 0 : index
    %123 = vector.load %arg27[%c8, %c0_71] : memref<16x64xf32, #tpu.memory_space<vmem>>, vector<8x64xf32>
    %c0_72 = arith.constant 0 : index
    %c0_73 = arith.constant 0 : index
    %c0_74 = arith.constant 0 : index
    %c0_75 = arith.constant 0 : index
    %124 = vector.load %arg13[%c0_72, %c0_73, %c0_74, %c0_75] : memref<2x4x16x64xf32, #tpu.memory_space<vmem>>, vector<1x1x16x64xf32>
    %125 = vector.shape_cast %124 : vector<1x1x16x64xf32> to vector<16x64xf32>
    %cst_76 = arith.constant dense<0.000000e+00> : vector<8x64xf32>
    %126 = tpu.matmul %122, %125, %cst_76 {dimension_numbers = #tpu.dot_dimension_numbers<[1], [0], [0], [1], [0, 0, 1, 1], [], []>} : vector<8x16xf32>, vector<16x64xf32>, vector<8x64xf32> -> vector<8x64xf32>
    %127 = arith.addf %123, %126 : vector<8x64xf32>
    %c8_77 = arith.constant 8 : index
    %c0_78 = arith.constant 0 : index
    %128 = vector.load %arg27[%c8_77, %c0_78] : memref<16x64xf32, #tpu.memory_space<vmem>>, vector<8x64xf32>
    tpu.vector_store %arg27[%c8_77, %c0_78], %127 {strides = array<i32>} : memref<16x64xf32, #tpu.memory_space<vmem>>, vector<8x64xf32>,
    %c0_79 = arith.constant 0 : index
    %c1 = arith.constant 1 : index
    %c0_80 = arith.constant 0 : index
    %c0_81 = arith.constant 0 : index
    %129 = vector.load %arg7[%c0_79, %c1, %c0_80, %c0_81] : memref<2x4x64x16xf32, #tpu.memory_space<vmem>>, vector<1x1x64x16xf32>
    %130 = vector.shape_cast %129 : vector<1x1x64x16xf32> to vector<64x16xf32>
    %cst_82 = arith.constant dense<0.000000e+00> : vector<16x16xf32>
    %131 = tpu.matmul %58, %130, %cst_82 {dimension_numbers = #tpu.dot_dimension_numbers<[1], [0], [0], [1], [0, 0, 1, 1], [], []>} : vector<16x64xf32>, vector<64x16xf32>, vector<16x16xf32> -> vector<16x16xf32>
    %c0_83 = arith.constant 0 : index
    %c1_84 = arith.constant 1 : index
    %c0_85 = arith.constant 0 : index
    %c0_86 = arith.constant 0 : index
    %132 = vector.load %arg8[%c0_83, %c1_84, %c0_85, %c0_86] : memref<2x4x1x16xf32, #tpu.memory_space<vmem>>, vector<1x1x1x16xf32>
    %133 = vector.shape_cast %132 : vector<1x1x1x16xf32> to vector<1x16xf32>
    %134 = vector.broadcast %133 : vector<1x16xf32> to vector<16x16xf32>
    %135 = arith.addf %131, %134 : vector<16x16xf32>
    %c0_87 = arith.constant 0 : index
    %c1_88 = arith.constant 1 : index
    %c0_89 = arith.constant 0 : index
    %c0_90 = arith.constant 0 : index
    %136 = vector.load %arg9[%c0_87, %c1_88, %c0_89, %c0_90] : memref<2x4x64x16xf32, #tpu.memory_space<vmem>>, vector<1x1x64x16xf32>
    %137 = vector.shape_cast %136 : vector<1x1x64x16xf32> to vector<64x16xf32>
    %cst_91 = arith.constant dense<0.000000e+00> : vector<16x16xf32>
    %138 = tpu.matmul %58, %137, %cst_91 {dimension_numbers = #tpu.dot_dimension_numbers<[1], [0], [0], [1], [0, 0, 1, 1], [], []>} : vector<16x64xf32>, vector<64x16xf32>, vector<16x16xf32> -> vector<16x16xf32>
    %c0_92 = arith.constant 0 : index
    %c1_93 = arith.constant 1 : index
    %c0_94 = arith.constant 0 : index
    %c0_95 = arith.constant 0 : index
    %139 = vector.load %arg10[%c0_92, %c1_93, %c0_94, %c0_95] : memref<2x4x1x16xf32, #tpu.memory_space<vmem>>, vector<1x1x1x16xf32>
    %140 = vector.shape_cast %139 : vector<1x1x1x16xf32> to vector<1x16xf32>
    %141 = vector.broadcast %140 : vector<1x16xf32> to vector<16x16xf32>
    %142 = arith.addf %138, %141 : vector<16x16xf32>
    %c0_96 = arith.constant 0 : index
    %c1_97 = arith.constant 1 : index
    %c0_98 = arith.constant 0 : index
    %c0_99 = arith.constant 0 : index
    %143 = vector.load %arg11[%c0_96, %c1_97, %c0_98, %c0_99] : memref<2x4x64x16xf32, #tpu.memory_space<vmem>>, vector<1x1x64x16xf32>
    %144 = vector.shape_cast %143 : vector<1x1x64x16xf32> to vector<64x16xf32>
    %cst_100 = arith.constant dense<0.000000e+00> : vector<16x16xf32>
    %145 = tpu.matmul %58, %144, %cst_100 {dimension_numbers = #tpu.dot_dimension_numbers<[1], [0], [0], [1], [0, 0, 1, 1], [], []>} : vector<16x64xf32>, vector<64x16xf32>, vector<16x16xf32> -> vector<16x16xf32>
    %c0_101 = arith.constant 0 : index
    %c1_102 = arith.constant 1 : index
    %c0_103 = arith.constant 0 : index
    %c0_104 = arith.constant 0 : index
    %146 = vector.load %arg12[%c0_101, %c1_102, %c0_103, %c0_104] : memref<2x4x1x16xf32, #tpu.memory_space<vmem>>, vector<1x1x1x16xf32>
    %147 = vector.shape_cast %146 : vector<1x1x1x16xf32> to vector<1x16xf32>
    %148 = vector.broadcast %147 : vector<1x16xf32> to vector<16x16xf32>
    %149 = arith.addf %145, %148 : vector<16x16xf32>
    %150 = vector.extract_strided_slice %135 {offsets = [0, 0], sizes = [8, 16], strides = [1, 1]} : vector<16x16xf32> to vector<8x16xf32>
    %151 = vector.extract_strided_slice %142 {offsets = [0, 0], sizes = [8, 16], strides = [1, 1]} : vector<16x16xf32> to vector<8x16xf32>
    %152 = vector.extract_strided_slice %149 {offsets = [0, 0], sizes = [8, 16], strides = [1, 1]} : vector<16x16xf32> to vector<8x16xf32>
    %cst_105 = arith.constant dense<0.000000e+00> : vector<8x8xf32>
    %153 = tpu.matmul %150, %151, %cst_105 {dimension_numbers = #tpu.dot_dimension_numbers<[1], [1], [0], [0], [0, 0, 1, 0], [], []>} : vector<8x16xf32>, vector<8x16xf32>, vector<8x8xf32> -> vector<8x8xf32>
    %cst_106 = arith.constant 2.500000e-01 : f32
    %154 = vector.broadcast %cst_106 : f32 to vector<8x8xf32>
    %155 = arith.mulf %153, %154 : vector<8x8xf32>
    %cst_107 = arith.constant dense<0xFF800000> : vector<8xf32>
    %156 = vector.multi_reduction <maximumf>, %155, %cst_107 [1] : vector<8x8xf32> to vector<8xf32>
    %157 = vector.shape_cast %156 : vector<8xf32> to vector<8x1xf32>
    %158 = vector.broadcast %157 : vector<8x1xf32> to vector<8x8xf32>
    %159 = arith.subf %155, %158 : vector<8x8xf32>
    %160 = math.exp %159 : vector<8x8xf32>
    %cst_108 = arith.constant dense<0.000000e+00> : vector<8xf32>
    %161 = vector.multi_reduction <add>, %160, %cst_108 [1] : vector<8x8xf32> to vector<8xf32>
    %162 = vector.shape_cast %161 : vector<8xf32> to vector<8x1xf32>
    %163 = vector.broadcast %162 : vector<8x1xf32> to vector<8x8xf32>
    %164 = arith.divf %160, %163 : vector<8x8xf32>
    %cst_109 = arith.constant dense<0.000000e+00> : vector<8x16xf32>
    %165 = tpu.matmul %164, %152, %cst_109 {dimension_numbers = #tpu.dot_dimension_numbers<[1], [0], [0], [1], [0, 0, 1, 1], [], []>} : vector<8x8xf32>, vector<8x16xf32>, vector<8x16xf32> -> vector<8x16xf32>
    %c0_110 = arith.constant 0 : index
    %c0_111 = arith.constant 0 : index
    %166 = vector.load %arg27[%c0_110, %c0_111] : memref<16x64xf32, #tpu.memory_space<vmem>>, vector<8x64xf32>
    %c0_112 = arith.constant 0 : index
    %c1_113 = arith.constant 1 : index
    %c0_114 = arith.constant 0 : index
    %c0_115 = arith.constant 0 : index
    %167 = vector.load %arg13[%c0_112, %c1_113, %c0_114, %c0_115] : memref<2x4x16x64xf32, #tpu.memory_space<vmem>>, vector<1x1x16x64xf32>
    %168 = vector.shape_cast %167 : vector<1x1x16x64xf32> to vector<16x64xf32>
    %cst_116 = arith.constant dense<0.000000e+00> : vector<8x64xf32>
    %169 = tpu.matmul %165, %168, %cst_116 {dimension_numbers = #tpu.dot_dimension_numbers<[1], [0], [0], [1], [0, 0, 1, 1], [], []>} : vector<8x16xf32>, vector<16x64xf32>, vector<8x64xf32> -> vector<8x64xf32>
    %170 = arith.addf %166, %169 : vector<8x64xf32>
    %c0_117 = arith.constant 0 : index
    %c0_118 = arith.constant 0 : index
    %171 = vector.load %arg27[%c0_117, %c0_118] : memref<16x64xf32, #tpu.memory_space<vmem>>, vector<8x64xf32>
    tpu.vector_store %arg27[%c0_117, %c0_118], %170 {strides = array<i32>} : memref<16x64xf32, #tpu.memory_space<vmem>>, vector<8x64xf32>,
    %172 = vector.extract_strided_slice %135 {offsets = [8, 0], sizes = [8, 16], strides = [1, 1]} : vector<16x16xf32> to vector<8x16xf32>
    %173 = vector.extract_strided_slice %142 {offsets = [8, 0], sizes = [8, 16], strides = [1, 1]} : vector<16x16xf32> to vector<8x16xf32>
    %174 = vector.extract_strided_slice %149 {offsets = [8, 0], sizes = [8, 16], strides = [1, 1]} : vector<16x16xf32> to vector<8x16xf32>
    %cst_119 = arith.constant dense<0.000000e+00> : vector<8x8xf32>
    %175 = tpu.matmul %172, %173, %cst_119 {dimension_numbers = #tpu.dot_dimension_numbers<[1], [1], [0], [0], [0, 0, 1, 0], [], []>} : vector<8x16xf32>, vector<8x16xf32>, vector<8x8xf32> -> vector<8x8xf32>
    %cst_120 = arith.constant 2.500000e-01 : f32
    %176 = vector.broadcast %cst_120 : f32 to vector<8x8xf32>
    %177 = arith.mulf %175, %176 : vector<8x8xf32>
    %cst_121 = arith.constant dense<0xFF800000> : vector<8xf32>
    %178 = vector.multi_reduction <maximumf>, %177, %cst_121 [1] : vector<8x8xf32> to vector<8xf32>
    %179 = vector.shape_cast %178 : vector<8xf32> to vector<8x1xf32>
    %180 = vector.broadcast %179 : vector<8x1xf32> to vector<8x8xf32>
    %181 = arith.subf %177, %180 : vector<8x8xf32>
    %182 = math.exp %181 : vector<8x8xf32>
    %cst_122 = arith.constant dense<0.000000e+00> : vector<8xf32>
    %183 = vector.multi_reduction <add>, %182, %cst_122 [1] : vector<8x8xf32> to vector<8xf32>
    %184 = vector.shape_cast %183 : vector<8xf32> to vector<8x1xf32>
    %185 = vector.broadcast %184 : vector<8x1xf32> to vector<8x8xf32>
    %186 = arith.divf %182, %185 : vector<8x8xf32>
    %cst_123 = arith.constant dense<0.000000e+00> : vector<8x16xf32>
    %187 = tpu.matmul %186, %174, %cst_123 {dimension_numbers = #tpu.dot_dimension_numbers<[1], [0], [0], [1], [0, 0, 1, 1], [], []>} : vector<8x8xf32>, vector<8x16xf32>, vector<8x16xf32> -> vector<8x16xf32>
    %c8_124 = arith.constant 8 : index
    %c0_125 = arith.constant 0 : index
    %188 = vector.load %arg27[%c8_124, %c0_125] : memref<16x64xf32, #tpu.memory_space<vmem>>, vector<8x64xf32>
    %c0_126 = arith.constant 0 : index
    %c1_127 = arith.constant 1 : index
    %c0_128 = arith.constant 0 : index
    %c0_129 = arith.constant 0 : index
    %189 = vector.load %arg13[%c0_126, %c1_127, %c0_128, %c0_129] : memref<2x4x16x64xf32, #tpu.memory_space<vmem>>, vector<1x1x16x64xf32>
    %190 = vector.shape_cast %189 : vector<1x1x16x64xf32> to vector<16x64xf32>
    %cst_130 = arith.constant dense<0.000000e+00> : vector<8x64xf32>
    %191 = tpu.matmul %187, %190, %cst_130 {dimension_numbers = #tpu.dot_dimension_numbers<[1], [0], [0], [1], [0, 0, 1, 1], [], []>} : vector<8x16xf32>, vector<16x64xf32>, vector<8x64xf32> -> vector<8x64xf32>
    %192 = arith.addf %188, %191 : vector<8x64xf32>
    %c8_131 = arith.constant 8 : index
    %c0_132 = arith.constant 0 : index
    %193 = vector.load %arg27[%c8_131, %c0_132] : memref<16x64xf32, #tpu.memory_space<vmem>>, vector<8x64xf32>
    tpu.vector_store %arg27[%c8_131, %c0_132], %192 {strides = array<i32>} : memref<16x64xf32, #tpu.memory_space<vmem>>, vector<8x64xf32>,
    %c0_133 = arith.constant 0 : index
    %c2 = arith.constant 2 : index
    %c0_134 = arith.constant 0 : index
    %c0_135 = arith.constant 0 : index
    %194 = vector.load %arg7[%c0_133, %c2, %c0_134, %c0_135] : memref<2x4x64x16xf32, #tpu.memory_space<vmem>>, vector<1x1x64x16xf32>
    %195 = vector.shape_cast %194 : vector<1x1x64x16xf32> to vector<64x16xf32>
    %cst_136 = arith.constant dense<0.000000e+00> : vector<16x16xf32>
    %196 = tpu.matmul %58, %195, %cst_136 {dimension_numbers = #tpu.dot_dimension_numbers<[1], [0], [0], [1], [0, 0, 1, 1], [], []>} : vector<16x64xf32>, vector<64x16xf32>, vector<16x16xf32> -> vector<16x16xf32>
    %c0_137 = arith.constant 0 : index
    %c2_138 = arith.constant 2 : index
    %c0_139 = arith.constant 0 : index
    %c0_140 = arith.constant 0 : index
    %197 = vector.load %arg8[%c0_137, %c2_138, %c0_139, %c0_140] : memref<2x4x1x16xf32, #tpu.memory_space<vmem>>, vector<1x1x1x16xf32>
    %198 = vector.shape_cast %197 : vector<1x1x1x16xf32> to vector<1x16xf32>
    %199 = vector.broadcast %198 : vector<1x16xf32> to vector<16x16xf32>
    %200 = arith.addf %196, %199 : vector<16x16xf32>
    %c0_141 = arith.constant 0 : index
    %c2_142 = arith.constant 2 : index
    %c0_143 = arith.constant 0 : index
    %c0_144 = arith.constant 0 : index
    %201 = vector.load %arg9[%c0_141, %c2_142, %c0_143, %c0_144] : memref<2x4x64x16xf32, #tpu.memory_space<vmem>>, vector<1x1x64x16xf32>
    %202 = vector.shape_cast %201 : vector<1x1x64x16xf32> to vector<64x16xf32>
    %cst_145 = arith.constant dense<0.000000e+00> : vector<16x16xf32>
    %203 = tpu.matmul %58, %202, %cst_145 {dimension_numbers = #tpu.dot_dimension_numbers<[1], [0], [0], [1], [0, 0, 1, 1], [], []>} : vector<16x64xf32>, vector<64x16xf32>, vector<16x16xf32> -> vector<16x16xf32>
    %c0_146 = arith.constant 0 : index
    %c2_147 = arith.constant 2 : index
    %c0_148 = arith.constant 0 : index
    %c0_149 = arith.constant 0 : index
    %204 = vector.load %arg10[%c0_146, %c2_147, %c0_148, %c0_149] : memref<2x4x1x16xf32, #tpu.memory_space<vmem>>, vector<1x1x1x16xf32>
    %205 = vector.shape_cast %204 : vector<1x1x1x16xf32> to vector<1x16xf32>
    %206 = vector.broadcast %205 : vector<1x16xf32> to vector<16x16xf32>
    %207 = arith.addf %203, %206 : vector<16x16xf32>
    %c0_150 = arith.constant 0 : index
    %c2_151 = arith.constant 2 : index
    %c0_152 = arith.constant 0 : index
    %c0_153 = arith.constant 0 : index
    %208 = vector.load %arg11[%c0_150, %c2_151, %c0_152, %c0_153] : memref<2x4x64x16xf32, #tpu.memory_space<vmem>>, vector<1x1x64x16xf32>
    %209 = vector.shape_cast %208 : vector<1x1x64x16xf32> to vector<64x16xf32>
    %cst_154 = arith.constant dense<0.000000e+00> : vector<16x16xf32>
    %210 = tpu.matmul %58, %209, %cst_154 {dimension_numbers = #tpu.dot_dimension_numbers<[1], [0], [0], [1], [0, 0, 1, 1], [], []>} : vector<16x64xf32>, vector<64x16xf32>, vector<16x16xf32> -> vector<16x16xf32>
    %c0_155 = arith.constant 0 : index
    %c2_156 = arith.constant 2 : index
    %c0_157 = arith.constant 0 : index
    %c0_158 = arith.constant 0 : index
    %211 = vector.load %arg12[%c0_155, %c2_156, %c0_157, %c0_158] : memref<2x4x1x16xf32, #tpu.memory_space<vmem>>, vector<1x1x1x16xf32>
    %212 = vector.shape_cast %211 : vector<1x1x1x16xf32> to vector<1x16xf32>
    %213 = vector.broadcast %212 : vector<1x16xf32> to vector<16x16xf32>
    %214 = arith.addf %210, %213 : vector<16x16xf32>
    %215 = vector.extract_strided_slice %200 {offsets = [0, 0], sizes = [8, 16], strides = [1, 1]} : vector<16x16xf32> to vector<8x16xf32>
    %216 = vector.extract_strided_slice %207 {offsets = [0, 0], sizes = [8, 16], strides = [1, 1]} : vector<16x16xf32> to vector<8x16xf32>
    %217 = vector.extract_strided_slice %214 {offsets = [0, 0], sizes = [8, 16], strides = [1, 1]} : vector<16x16xf32> to vector<8x16xf32>
    %cst_159 = arith.constant dense<0.000000e+00> : vector<8x8xf32>
    %218 = tpu.matmul %215, %216, %cst_159 {dimension_numbers = #tpu.dot_dimension_numbers<[1], [1], [0], [0], [0, 0, 1, 0], [], []>} : vector<8x16xf32>, vector<8x16xf32>, vector<8x8xf32> -> vector<8x8xf32>
    %cst_160 = arith.constant 2.500000e-01 : f32
    %219 = vector.broadcast %cst_160 : f32 to vector<8x8xf32>
    %220 = arith.mulf %218, %219 : vector<8x8xf32>
    %cst_161 = arith.constant dense<0xFF800000> : vector<8xf32>
    %221 = vector.multi_reduction <maximumf>, %220, %cst_161 [1] : vector<8x8xf32> to vector<8xf32>
    %222 = vector.shape_cast %221 : vector<8xf32> to vector<8x1xf32>
    %223 = vector.broadcast %222 : vector<8x1xf32> to vector<8x8xf32>
    %224 = arith.subf %220, %223 : vector<8x8xf32>
    %225 = math.exp %224 : vector<8x8xf32>
    %cst_162 = arith.constant dense<0.000000e+00> : vector<8xf32>
    %226 = vector.multi_reduction <add>, %225, %cst_162 [1] : vector<8x8xf32> to vector<8xf32>
    %227 = vector.shape_cast %226 : vector<8xf32> to vector<8x1xf32>
    %228 = vector.broadcast %227 : vector<8x1xf32> to vector<8x8xf32>
    %229 = arith.divf %225, %228 : vector<8x8xf32>
    %cst_163 = arith.constant dense<0.000000e+00> : vector<8x16xf32>
    %230 = tpu.matmul %229, %217, %cst_163 {dimension_numbers = #tpu.dot_dimension_numbers<[1], [0], [0], [1], [0, 0, 1, 1], [], []>} : vector<8x8xf32>, vector<8x16xf32>, vector<8x16xf32> -> vector<8x16xf32>
    %c0_164 = arith.constant 0 : index
    %c0_165 = arith.constant 0 : index
    %231 = vector.load %arg27[%c0_164, %c0_165] : memref<16x64xf32, #tpu.memory_space<vmem>>, vector<8x64xf32>
    %c0_166 = arith.constant 0 : index
    %c2_167 = arith.constant 2 : index
    %c0_168 = arith.constant 0 : index
    %c0_169 = arith.constant 0 : index
    %232 = vector.load %arg13[%c0_166, %c2_167, %c0_168, %c0_169] : memref<2x4x16x64xf32, #tpu.memory_space<vmem>>, vector<1x1x16x64xf32>
    %233 = vector.shape_cast %232 : vector<1x1x16x64xf32> to vector<16x64xf32>
    %cst_170 = arith.constant dense<0.000000e+00> : vector<8x64xf32>
    %234 = tpu.matmul %230, %233, %cst_170 {dimension_numbers = #tpu.dot_dimension_numbers<[1], [0], [0], [1], [0, 0, 1, 1], [], []>} : vector<8x16xf32>, vector<16x64xf32>, vector<8x64xf32> -> vector<8x64xf32>
    %235 = arith.addf %231, %234 : vector<8x64xf32>
    %c0_171 = arith.constant 0 : index
    %c0_172 = arith.constant 0 : index
    %236 = vector.load %arg27[%c0_171, %c0_172] : memref<16x64xf32, #tpu.memory_space<vmem>>, vector<8x64xf32>
    tpu.vector_store %arg27[%c0_171, %c0_172], %235 {strides = array<i32>} : memref<16x64xf32, #tpu.memory_space<vmem>>, vector<8x64xf32>,
    %237 = vector.extract_strided_slice %200 {offsets = [8, 0], sizes = [8, 16], strides = [1, 1]} : vector<16x16xf32> to vector<8x16xf32>
    %238 = vector.extract_strided_slice %207 {offsets = [8, 0], sizes = [8, 16], strides = [1, 1]} : vector<16x16xf32> to vector<8x16xf32>
    %239 = vector.extract_strided_slice %214 {offsets = [8, 0], sizes = [8, 16], strides = [1, 1]} : vector<16x16xf32> to vector<8x16xf32>
    %cst_173 = arith.constant dense<0.000000e+00> : vector<8x8xf32>
    %240 = tpu.matmul %237, %238, %cst_173 {dimension_numbers = #tpu.dot_dimension_numbers<[1], [1], [0], [0], [0, 0, 1, 0], [], []>} : vector<8x16xf32>, vector<8x16xf32>, vector<8x8xf32> -> vector<8x8xf32>
    %cst_174 = arith.constant 2.500000e-01 : f32
    %241 = vector.broadcast %cst_174 : f32 to vector<8x8xf32>
    %242 = arith.mulf %240, %241 : vector<8x8xf32>
    %cst_175 = arith.constant dense<0xFF800000> : vector<8xf32>
    %243 = vector.multi_reduction <maximumf>, %242, %cst_175 [1] : vector<8x8xf32> to vector<8xf32>
    %244 = vector.shape_cast %243 : vector<8xf32> to vector<8x1xf32>
    %245 = vector.broadcast %244 : vector<8x1xf32> to vector<8x8xf32>
    %246 = arith.subf %242, %245 : vector<8x8xf32>
    %247 = math.exp %246 : vector<8x8xf32>
    %cst_176 = arith.constant dense<0.000000e+00> : vector<8xf32>
    %248 = vector.multi_reduction <add>, %247, %cst_176 [1] : vector<8x8xf32> to vector<8xf32>
    %249 = vector.shape_cast %248 : vector<8xf32> to vector<8x1xf32>
    %250 = vector.broadcast %249 : vector<8x1xf32> to vector<8x8xf32>
    %251 = arith.divf %247, %250 : vector<8x8xf32>
    %cst_177 = arith.constant dense<0.000000e+00> : vector<8x16xf32>
    %252 = tpu.matmul %251, %239, %cst_177 {dimension_numbers = #tpu.dot_dimension_numbers<[1], [0], [0], [1], [0, 0, 1, 1], [], []>} : vector<8x8xf32>, vector<8x16xf32>, vector<8x16xf32> -> vector<8x16xf32>
    %c8_178 = arith.constant 8 : index
    %c0_179 = arith.constant 0 : index
    %253 = vector.load %arg27[%c8_178, %c0_179] : memref<16x64xf32, #tpu.memory_space<vmem>>, vector<8x64xf32>
    %c0_180 = arith.constant 0 : index
    %c2_181 = arith.constant 2 : index
    %c0_182 = arith.constant 0 : index
    %c0_183 = arith.constant 0 : index
    %254 = vector.load %arg13[%c0_180, %c2_181, %c0_182, %c0_183] : memref<2x4x16x64xf32, #tpu.memory_space<vmem>>, vector<1x1x16x64xf32>
    %255 = vector.shape_cast %254 : vector<1x1x16x64xf32> to vector<16x64xf32>
    %cst_184 = arith.constant dense<0.000000e+00> : vector<8x64xf32>
    %256 = tpu.matmul %252, %255, %cst_184 {dimension_numbers = #tpu.dot_dimension_numbers<[1], [0], [0], [1], [0, 0, 1, 1], [], []>} : vector<8x16xf32>, vector<16x64xf32>, vector<8x64xf32> -> vector<8x64xf32>
    %257 = arith.addf %253, %256 : vector<8x64xf32>
    %c8_185 = arith.constant 8 : index
    %c0_186 = arith.constant 0 : index
    %258 = vector.load %arg27[%c8_185, %c0_186] : memref<16x64xf32, #tpu.memory_space<vmem>>, vector<8x64xf32>
    tpu.vector_store %arg27[%c8_185, %c0_186], %257 {strides = array<i32>} : memref<16x64xf32, #tpu.memory_space<vmem>>, vector<8x64xf32>,
    %c0_187 = arith.constant 0 : index
    %c3 = arith.constant 3 : index
    %c0_188 = arith.constant 0 : index
    %c0_189 = arith.constant 0 : index
    %259 = vector.load %arg7[%c0_187, %c3, %c0_188, %c0_189] : memref<2x4x64x16xf32, #tpu.memory_space<vmem>>, vector<1x1x64x16xf32>
    %260 = vector.shape_cast %259 : vector<1x1x64x16xf32> to vector<64x16xf32>
    %cst_190 = arith.constant dense<0.000000e+00> : vector<16x16xf32>
    %261 = tpu.matmul %58, %260, %cst_190 {dimension_numbers = #tpu.dot_dimension_numbers<[1], [0], [0], [1], [0, 0, 1, 1], [], []>} : vector<16x64xf32>, vector<64x16xf32>, vector<16x16xf32> -> vector<16x16xf32>
    %c0_191 = arith.constant 0 : index
    %c3_192 = arith.constant 3 : index
    %c0_193 = arith.constant 0 : index
    %c0_194 = arith.constant 0 : index
    %262 = vector.load %arg8[%c0_191, %c3_192, %c0_193, %c0_194] : memref<2x4x1x16xf32, #tpu.memory_space<vmem>>, vector<1x1x1x16xf32>
    %263 = vector.shape_cast %262 : vector<1x1x1x16xf32> to vector<1x16xf32>
    %264 = vector.broadcast %263 : vector<1x16xf32> to vector<16x16xf32>
    %265 = arith.addf %261, %264 : vector<16x16xf32>
    %c0_195 = arith.constant 0 : index
    %c3_196 = arith.constant 3 : index
    %c0_197 = arith.constant 0 : index
    %c0_198 = arith.constant 0 : index
    %266 = vector.load %arg9[%c0_195, %c3_196, %c0_197, %c0_198] : memref<2x4x64x16xf32, #tpu.memory_space<vmem>>, vector<1x1x64x16xf32>
    %267 = vector.shape_cast %266 : vector<1x1x64x16xf32> to vector<64x16xf32>
    %cst_199 = arith.constant dense<0.000000e+00> : vector<16x16xf32>
    %268 = tpu.matmul %58, %267, %cst_199 {dimension_numbers = #tpu.dot_dimension_numbers<[1], [0], [0], [1], [0, 0, 1, 1], [], []>} : vector<16x64xf32>, vector<64x16xf32>, vector<16x16xf32> -> vector<16x16xf32>
    %c0_200 = arith.constant 0 : index
    %c3_201 = arith.constant 3 : index
    %c0_202 = arith.constant 0 : index
    %c0_203 = arith.constant 0 : index
    %269 = vector.load %arg10[%c0_200, %c3_201, %c0_202, %c0_203] : memref<2x4x1x16xf32, #tpu.memory_space<vmem>>, vector<1x1x1x16xf32>
    %270 = vector.shape_cast %269 : vector<1x1x1x16xf32> to vector<1x16xf32>
    %271 = vector.broadcast %270 : vector<1x16xf32> to vector<16x16xf32>
    %272 = arith.addf %268, %271 : vector<16x16xf32>
    %c0_204 = arith.constant 0 : index
    %c3_205 = arith.constant 3 : index
    %c0_206 = arith.constant 0 : index
    %c0_207 = arith.constant 0 : index
    %273 = vector.load %arg11[%c0_204, %c3_205, %c0_206, %c0_207] : memref<2x4x64x16xf32, #tpu.memory_space<vmem>>, vector<1x1x64x16xf32>
    %274 = vector.shape_cast %273 : vector<1x1x64x16xf32> to vector<64x16xf32>
    %cst_208 = arith.constant dense<0.000000e+00> : vector<16x16xf32>
    %275 = tpu.matmul %58, %274, %cst_208 {dimension_numbers = #tpu.dot_dimension_numbers<[1], [0], [0], [1], [0, 0, 1, 1], [], []>} : vector<16x64xf32>, vector<64x16xf32>, vector<16x16xf32> -> vector<16x16xf32>
    %c0_209 = arith.constant 0 : index
    %c3_210 = arith.constant 3 : index
    %c0_211 = arith.constant 0 : index
    %c0_212 = arith.constant 0 : index
    %276 = vector.load %arg12[%c0_209, %c3_210, %c0_211, %c0_212] : memref<2x4x1x16xf32, #tpu.memory_space<vmem>>, vector<1x1x1x16xf32>
    %277 = vector.shape_cast %276 : vector<1x1x1x16xf32> to vector<1x16xf32>
    %278 = vector.broadcast %277 : vector<1x16xf32> to vector<16x16xf32>
    %279 = arith.addf %275, %278 : vector<16x16xf32>
    %280 = vector.extract_strided_slice %265 {offsets = [0, 0], sizes = [8, 16], strides = [1, 1]} : vector<16x16xf32> to vector<8x16xf32>
    %281 = vector.extract_strided_slice %272 {offsets = [0, 0], sizes = [8, 16], strides = [1, 1]} : vector<16x16xf32> to vector<8x16xf32>
    %282 = vector.extract_strided_slice %279 {offsets = [0, 0], sizes = [8, 16], strides = [1, 1]} : vector<16x16xf32> to vector<8x16xf32>
    %cst_213 = arith.constant dense<0.000000e+00> : vector<8x8xf32>
    %283 = tpu.matmul %280, %281, %cst_213 {dimension_numbers = #tpu.dot_dimension_numbers<[1], [1], [0], [0], [0, 0, 1, 0], [], []>} : vector<8x16xf32>, vector<8x16xf32>, vector<8x8xf32> -> vector<8x8xf32>
    %cst_214 = arith.constant 2.500000e-01 : f32
    %284 = vector.broadcast %cst_214 : f32 to vector<8x8xf32>
    %285 = arith.mulf %283, %284 : vector<8x8xf32>
    %cst_215 = arith.constant dense<0xFF800000> : vector<8xf32>
    %286 = vector.multi_reduction <maximumf>, %285, %cst_215 [1] : vector<8x8xf32> to vector<8xf32>
    %287 = vector.shape_cast %286 : vector<8xf32> to vector<8x1xf32>
    %288 = vector.broadcast %287 : vector<8x1xf32> to vector<8x8xf32>
    %289 = arith.subf %285, %288 : vector<8x8xf32>
    %290 = math.exp %289 : vector<8x8xf32>
    %cst_216 = arith.constant dense<0.000000e+00> : vector<8xf32>
    %291 = vector.multi_reduction <add>, %290, %cst_216 [1] : vector<8x8xf32> to vector<8xf32>
    %292 = vector.shape_cast %291 : vector<8xf32> to vector<8x1xf32>
    %293 = vector.broadcast %292 : vector<8x1xf32> to vector<8x8xf32>
    %294 = arith.divf %290, %293 : vector<8x8xf32>
    %cst_217 = arith.constant dense<0.000000e+00> : vector<8x16xf32>
    %295 = tpu.matmul %294, %282, %cst_217 {dimension_numbers = #tpu.dot_dimension_numbers<[1], [0], [0], [1], [0, 0, 1, 1], [], []>} : vector<8x8xf32>, vector<8x16xf32>, vector<8x16xf32> -> vector<8x16xf32>
    %c0_218 = arith.constant 0 : index
    %c0_219 = arith.constant 0 : index
    %296 = vector.load %arg27[%c0_218, %c0_219] : memref<16x64xf32, #tpu.memory_space<vmem>>, vector<8x64xf32>
    %c0_220 = arith.constant 0 : index
    %c3_221 = arith.constant 3 : index
    %c0_222 = arith.constant 0 : index
    %c0_223 = arith.constant 0 : index
    %297 = vector.load %arg13[%c0_220, %c3_221, %c0_222, %c0_223] : memref<2x4x16x64xf32, #tpu.memory_space<vmem>>, vector<1x1x16x64xf32>
    %298 = vector.shape_cast %297 : vector<1x1x16x64xf32> to vector<16x64xf32>
    %cst_224 = arith.constant dense<0.000000e+00> : vector<8x64xf32>
    %299 = tpu.matmul %295, %298, %cst_224 {dimension_numbers = #tpu.dot_dimension_numbers<[1], [0], [0], [1], [0, 0, 1, 1], [], []>} : vector<8x16xf32>, vector<16x64xf32>, vector<8x64xf32> -> vector<8x64xf32>
    %300 = arith.addf %296, %299 : vector<8x64xf32>
    %c0_225 = arith.constant 0 : index
    %c0_226 = arith.constant 0 : index
    %301 = vector.load %arg27[%c0_225, %c0_226] : memref<16x64xf32, #tpu.memory_space<vmem>>, vector<8x64xf32>
    tpu.vector_store %arg27[%c0_225, %c0_226], %300 {strides = array<i32>} : memref<16x64xf32, #tpu.memory_space<vmem>>, vector<8x64xf32>,
    %302 = vector.extract_strided_slice %265 {offsets = [8, 0], sizes = [8, 16], strides = [1, 1]} : vector<16x16xf32> to vector<8x16xf32>
    %303 = vector.extract_strided_slice %272 {offsets = [8, 0], sizes = [8, 16], strides = [1, 1]} : vector<16x16xf32> to vector<8x16xf32>
    %304 = vector.extract_strided_slice %279 {offsets = [8, 0], sizes = [8, 16], strides = [1, 1]} : vector<16x16xf32> to vector<8x16xf32>
    %cst_227 = arith.constant dense<0.000000e+00> : vector<8x8xf32>
    %305 = tpu.matmul %302, %303, %cst_227 {dimension_numbers = #tpu.dot_dimension_numbers<[1], [1], [0], [0], [0, 0, 1, 0], [], []>} : vector<8x16xf32>, vector<8x16xf32>, vector<8x8xf32> -> vector<8x8xf32>
    %cst_228 = arith.constant 2.500000e-01 : f32
    %306 = vector.broadcast %cst_228 : f32 to vector<8x8xf32>
    %307 = arith.mulf %305, %306 : vector<8x8xf32>
    %cst_229 = arith.constant dense<0xFF800000> : vector<8xf32>
    %308 = vector.multi_reduction <maximumf>, %307, %cst_229 [1] : vector<8x8xf32> to vector<8xf32>
    %309 = vector.shape_cast %308 : vector<8xf32> to vector<8x1xf32>
    %310 = vector.broadcast %309 : vector<8x1xf32> to vector<8x8xf32>
    %311 = arith.subf %307, %310 : vector<8x8xf32>
    %312 = math.exp %311 : vector<8x8xf32>
    %cst_230 = arith.constant dense<0.000000e+00> : vector<8xf32>
    %313 = vector.multi_reduction <add>, %312, %cst_230 [1] : vector<8x8xf32> to vector<8xf32>
    %314 = vector.shape_cast %313 : vector<8xf32> to vector<8x1xf32>
    %315 = vector.broadcast %314 : vector<8x1xf32> to vector<8x8xf32>
    %316 = arith.divf %312, %315 : vector<8x8xf32>
    %cst_231 = arith.constant dense<0.000000e+00> : vector<8x16xf32>
    %317 = tpu.matmul %316, %304, %cst_231 {dimension_numbers = #tpu.dot_dimension_numbers<[1], [0], [0], [1], [0, 0, 1, 1], [], []>} : vector<8x8xf32>, vector<8x16xf32>, vector<8x16xf32> -> vector<8x16xf32>
    %c8_232 = arith.constant 8 : index
    %c0_233 = arith.constant 0 : index
    %318 = vector.load %arg27[%c8_232, %c0_233] : memref<16x64xf32, #tpu.memory_space<vmem>>, vector<8x64xf32>
    %c0_234 = arith.constant 0 : index
    %c3_235 = arith.constant 3 : index
    %c0_236 = arith.constant 0 : index
    %c0_237 = arith.constant 0 : index
    %319 = vector.load %arg13[%c0_234, %c3_235, %c0_236, %c0_237] : memref<2x4x16x64xf32, #tpu.memory_space<vmem>>, vector<1x1x16x64xf32>
    %320 = vector.shape_cast %319 : vector<1x1x16x64xf32> to vector<16x64xf32>
    %cst_238 = arith.constant dense<0.000000e+00> : vector<8x64xf32>
    %321 = tpu.matmul %317, %320, %cst_238 {dimension_numbers = #tpu.dot_dimension_numbers<[1], [0], [0], [1], [0, 0, 1, 1], [], []>} : vector<8x16xf32>, vector<16x64xf32>, vector<8x64xf32> -> vector<8x64xf32>
    %322 = arith.addf %318, %321 : vector<8x64xf32>
    %c8_239 = arith.constant 8 : index
    %c0_240 = arith.constant 0 : index
    %323 = vector.load %arg27[%c8_239, %c0_240] : memref<16x64xf32, #tpu.memory_space<vmem>>, vector<8x64xf32>
    tpu.vector_store %arg27[%c8_239, %c0_240], %322 {strides = array<i32>} : memref<16x64xf32, #tpu.memory_space<vmem>>, vector<8x64xf32>,
    %c0_241 = arith.constant 0 : index
    %c0_242 = arith.constant 0 : index
    %324 = vector.load %arg27[%c0_241, %c0_242] : memref<16x64xf32, #tpu.memory_space<vmem>>, vector<16x64xf32>
    %325 = arith.addf %58, %324 : vector<16x64xf32>
    %c0_243 = arith.constant 0 : index
    %c0_244 = arith.constant 0 : index
    %c0_245 = arith.constant 0 : index
    %326 = vector.load %arg15[%c0_243, %c0_244, %c0_245] : memref<2x1x64xf32, #tpu.memory_space<vmem>>, vector<1x1x64xf32>
    %327 = vector.shape_cast %326 : vector<1x1x64xf32> to vector<1x64xf32>
    %c0_246 = arith.constant 0 : index
    %c0_247 = arith.constant 0 : index
    %c0_248 = arith.constant 0 : index
    %328 = vector.load %arg16[%c0_246, %c0_247, %c0_248] : memref<2x1x64xf32, #tpu.memory_space<vmem>>, vector<1x1x64xf32>
    %329 = vector.shape_cast %328 : vector<1x1x64xf32> to vector<1x64xf32>
    %cst_249 = arith.constant dense<0.000000e+00> : vector<16xf32>
    %330 = vector.multi_reduction <add>, %325, %cst_249 [1] : vector<16x64xf32> to vector<16xf32>
    %331 = vector.shape_cast %330 : vector<16xf32> to vector<16x1xf32>
    %cst_250 = arith.constant 6.400000e+01 : f32
    %332 = vector.broadcast %cst_250 : f32 to vector<16x1xf32>
    %333 = arith.divf %331, %332 : vector<16x1xf32>
    %334 = vector.broadcast %333 : vector<16x1xf32> to vector<16x64xf32>
    %335 = arith.subf %325, %334 : vector<16x64xf32>
    %336 = arith.mulf %335, %335 : vector<16x64xf32>
    %cst_251 = arith.constant dense<0.000000e+00> : vector<16xf32>
    %337 = vector.multi_reduction <add>, %336, %cst_251 [1] : vector<16x64xf32> to vector<16xf32>
    %338 = vector.shape_cast %337 : vector<16xf32> to vector<16x1xf32>
    %cst_252 = arith.constant 6.400000e+01 : f32
    %339 = vector.broadcast %cst_252 : f32 to vector<16x1xf32>
    %340 = arith.divf %338, %339 : vector<16x1xf32>
    %341 = vector.broadcast %333 : vector<16x1xf32> to vector<16x64xf32>
    %342 = arith.subf %325, %341 : vector<16x64xf32>
    %cst_253 = arith.constant 9.99999996E-13 : f32
    %343 = vector.broadcast %cst_253 : f32 to vector<16x1xf32>
    %344 = arith.addf %340, %343 : vector<16x1xf32>
    %345 = math.rsqrt %344 : vector<16x1xf32>
    %346 = vector.broadcast %345 : vector<16x1xf32> to vector<16x64xf32>
    %347 = arith.mulf %342, %346 : vector<16x64xf32>
    %348 = vector.broadcast %327 : vector<1x64xf32> to vector<16x64xf32>
    %349 = arith.mulf %347, %348 : vector<16x64xf32>
    %350 = vector.broadcast %329 : vector<1x64xf32> to vector<16x64xf32>
    %351 = arith.addf %349, %350 : vector<16x64xf32>
    %c0_254 = arith.constant 0 : index
    %c0_255 = arith.constant 0 : index
    %c0_256 = arith.constant 0 : index
    %352 = vector.load %arg17[%c0_254, %c0_255, %c0_256] : memref<2x64x128xf32, #tpu.memory_space<vmem>>, vector<1x64x128xf32>
    %353 = vector.shape_cast %352 : vector<1x64x128xf32> to vector<64x128xf32>
    %cst_257 = arith.constant dense<0.000000e+00> : vector<16x128xf32>
    %354 = tpu.matmul %351, %353, %cst_257 {dimension_numbers = #tpu.dot_dimension_numbers<[1], [0], [0], [1], [0, 0, 1, 1], [], []>} : vector<16x64xf32>, vector<64x128xf32>, vector<16x128xf32> -> vector<16x128xf32>
    %c0_258 = arith.constant 0 : index
    %c0_259 = arith.constant 0 : index
    %c0_260 = arith.constant 0 : index
    %355 = vector.load %arg18[%c0_258, %c0_259, %c0_260] : memref<2x1x128xf32, #tpu.memory_space<vmem>>, vector<1x1x128xf32>
    %356 = vector.shape_cast %355 : vector<1x1x128xf32> to vector<1x128xf32>
    %357 = vector.broadcast %356 : vector<1x128xf32> to vector<16x128xf32>
    %358 = arith.addf %354, %357 : vector<16x128xf32>
    %cst_261 = arith.constant 5.000000e-01 : f32
    %359 = vector.broadcast %cst_261 : f32 to vector<16x128xf32>
    %360 = arith.mulf %359, %358 : vector<16x128xf32>
    %cst_262 = arith.constant 4.471500e-02 : f32
    %361 = vector.broadcast %cst_262 : f32 to vector<16x128xf32>
    %362 = arith.mulf %361, %358 : vector<16x128xf32>
    %363 = arith.mulf %362, %358 : vector<16x128xf32>
    %364 = arith.mulf %363, %358 : vector<16x128xf32>
    %365 = arith.addf %358, %364 : vector<16x128xf32>
    %cst_263 = arith.constant 0.797884583 : f32
    %366 = vector.broadcast %cst_263 : f32 to vector<16x128xf32>
    %367 = arith.mulf %366, %365 : vector<16x128xf32>
    %368 = math.tanh %367 : vector<16x128xf32>
    %cst_264 = arith.constant 1.000000e+00 : f32
    %369 = vector.broadcast %cst_264 : f32 to vector<16x128xf32>
    %370 = arith.addf %369, %368 : vector<16x128xf32>
    %371 = arith.mulf %360, %370 : vector<16x128xf32>
    %c0_265 = arith.constant 0 : index
    %c0_266 = arith.constant 0 : index
    %c0_267 = arith.constant 0 : index
    %372 = vector.load %arg19[%c0_265, %c0_266, %c0_267] : memref<2x128x64xf32, #tpu.memory_space<vmem>>, vector<1x128x64xf32>
    %373 = vector.shape_cast %372 : vector<1x128x64xf32> to vector<128x64xf32>
    %cst_268 = arith.constant dense<0.000000e+00> : vector<16x64xf32>
    %374 = tpu.matmul %371, %373, %cst_268 {dimension_numbers = #tpu.dot_dimension_numbers<[1], [0], [0], [1], [0, 0, 1, 1], [], []>} : vector<16x128xf32>, vector<128x64xf32>, vector<16x64xf32> -> vector<16x64xf32>
    %c0_269 = arith.constant 0 : index
    %c0_270 = arith.constant 0 : index
    %c0_271 = arith.constant 0 : index
    %375 = vector.load %arg20[%c0_269, %c0_270, %c0_271] : memref<2x1x64xf32, #tpu.memory_space<vmem>>, vector<1x1x64xf32>
    %376 = vector.shape_cast %375 : vector<1x1x64xf32> to vector<1x64xf32>
    %377 = vector.broadcast %376 : vector<1x64xf32> to vector<16x64xf32>
    %378 = arith.addf %374, %377 : vector<16x64xf32>
    %379 = arith.addf %351, %378 : vector<16x64xf32>
    %c0_272 = arith.constant 0 : index
    %c0_273 = arith.constant 0 : index
    %c0_274 = arith.constant 0 : index
    %380 = vector.load %arg21[%c0_272, %c0_273, %c0_274] : memref<2x1x64xf32, #tpu.memory_space<vmem>>, vector<1x1x64xf32>
    %381 = vector.shape_cast %380 : vector<1x1x64xf32> to vector<1x64xf32>
    %c0_275 = arith.constant 0 : index
    %c0_276 = arith.constant 0 : index
    %c0_277 = arith.constant 0 : index
    %382 = vector.load %arg22[%c0_275, %c0_276, %c0_277] : memref<2x1x64xf32, #tpu.memory_space<vmem>>, vector<1x1x64xf32>
    %383 = vector.shape_cast %382 : vector<1x1x64xf32> to vector<1x64xf32>
    %cst_278 = arith.constant dense<0.000000e+00> : vector<16xf32>
    %384 = vector.multi_reduction <add>, %379, %cst_278 [1] : vector<16x64xf32> to vector<16xf32>
    %385 = vector.shape_cast %384 : vector<16xf32> to vector<16x1xf32>
    %cst_279 = arith.constant 6.400000e+01 : f32
    %386 = vector.broadcast %cst_279 : f32 to vector<16x1xf32>
    %387 = arith.divf %385, %386 : vector<16x1xf32>
    %388 = vector.broadcast %387 : vector<16x1xf32> to vector<16x64xf32>
    %389 = arith.subf %379, %388 : vector<16x64xf32>
    %390 = arith.mulf %389, %389 : vector<16x64xf32>
    %cst_280 = arith.constant dense<0.000000e+00> : vector<16xf32>
    %391 = vector.multi_reduction <add>, %390, %cst_280 [1] : vector<16x64xf32> to vector<16xf32>
    %392 = vector.shape_cast %391 : vector<16xf32> to vector<16x1xf32>
    %cst_281 = arith.constant 6.400000e+01 : f32
    %393 = vector.broadcast %cst_281 : f32 to vector<16x1xf32>
    %394 = arith.divf %392, %393 : vector<16x1xf32>
    %395 = vector.broadcast %387 : vector<16x1xf32> to vector<16x64xf32>
    %396 = arith.subf %379, %395 : vector<16x64xf32>
    %cst_282 = arith.constant 9.99999996E-13 : f32
    %397 = vector.broadcast %cst_282 : f32 to vector<16x1xf32>
    %398 = arith.addf %394, %397 : vector<16x1xf32>
    %399 = math.rsqrt %398 : vector<16x1xf32>
    %400 = vector.broadcast %399 : vector<16x1xf32> to vector<16x64xf32>
    %401 = arith.mulf %396, %400 : vector<16x64xf32>
    %402 = vector.broadcast %381 : vector<1x64xf32> to vector<16x64xf32>
    %403 = arith.mulf %401, %402 : vector<16x64xf32>
    %404 = vector.broadcast %383 : vector<1x64xf32> to vector<16x64xf32>
    %405 = arith.addf %403, %404 : vector<16x64xf32>
    %c1_283 = arith.constant 1 : index
    %c0_284 = arith.constant 0 : index
    %c0_285 = arith.constant 0 : index
    %406 = vector.load %arg14[%c1_283, %c0_284, %c0_285] : memref<2x1x64xf32, #tpu.memory_space<vmem>>, vector<1x1x64xf32>
    %407 = vector.shape_cast %406 : vector<1x1x64xf32> to vector<1x64xf32>
    %408 = vector.shape_cast %407 : vector<1x64xf32> to vector<1x64xf32>
    %409 = vector.broadcast %408 : vector<1x64xf32> to vector<16x64xf32>
    %c0_286 = arith.constant 0 : index
    %c0_287 = arith.constant 0 : index
    %410 = vector.load %arg27[%c0_286, %c0_287] : memref<16x64xf32, #tpu.memory_space<vmem>>, vector<16x64xf32>
    tpu.vector_store %arg27[%c0_286, %c0_287], %409 {strides = array<i32>} : memref<16x64xf32, #tpu.memory_space<vmem>>, vector<16x64xf32>,
    %c1_288 = arith.constant 1 : index
    %c0_289 = arith.constant 0 : index
    %c0_290 = arith.constant 0 : index
    %c0_291 = arith.constant 0 : index
    %411 = vector.load %arg7[%c1_288, %c0_289, %c0_290, %c0_291] : memref<2x4x64x16xf32, #tpu.memory_space<vmem>>, vector<1x1x64x16xf32>
    %412 = vector.shape_cast %411 : vector<1x1x64x16xf32> to vector<64x16xf32>
    %cst_292 = arith.constant dense<0.000000e+00> : vector<16x16xf32>
    %413 = tpu.matmul %405, %412, %cst_292 {dimension_numbers = #tpu.dot_dimension_numbers<[1], [0], [0], [1], [0, 0, 1, 1], [], []>} : vector<16x64xf32>, vector<64x16xf32>, vector<16x16xf32> -> vector<16x16xf32>
    %c1_293 = arith.constant 1 : index
    %c0_294 = arith.constant 0 : index
    %c0_295 = arith.constant 0 : index
    %c0_296 = arith.constant 0 : index
    %414 = vector.load %arg8[%c1_293, %c0_294, %c0_295, %c0_296] : memref<2x4x1x16xf32, #tpu.memory_space<vmem>>, vector<1x1x1x16xf32>
    %415 = vector.shape_cast %414 : vector<1x1x1x16xf32> to vector<1x16xf32>
    %416 = vector.broadcast %415 : vector<1x16xf32> to vector<16x16xf32>
    %417 = arith.addf %413, %416 : vector<16x16xf32>
    %c1_297 = arith.constant 1 : index
    %c0_298 = arith.constant 0 : index
    %c0_299 = arith.constant 0 : index
    %c0_300 = arith.constant 0 : index
    %418 = vector.load %arg9[%c1_297, %c0_298, %c0_299, %c0_300] : memref<2x4x64x16xf32, #tpu.memory_space<vmem>>, vector<1x1x64x16xf32>
    %419 = vector.shape_cast %418 : vector<1x1x64x16xf32> to vector<64x16xf32>
    %cst_301 = arith.constant dense<0.000000e+00> : vector<16x16xf32>
    %420 = tpu.matmul %405, %419, %cst_301 {dimension_numbers = #tpu.dot_dimension_numbers<[1], [0], [0], [1], [0, 0, 1, 1], [], []>} : vector<16x64xf32>, vector<64x16xf32>, vector<16x16xf32> -> vector<16x16xf32>
    %c1_302 = arith.constant 1 : index
    %c0_303 = arith.constant 0 : index
    %c0_304 = arith.constant 0 : index
    %c0_305 = arith.constant 0 : index
    %421 = vector.load %arg10[%c1_302, %c0_303, %c0_304, %c0_305] : memref<2x4x1x16xf32, #tpu.memory_space<vmem>>, vector<1x1x1x16xf32>
    %422 = vector.shape_cast %421 : vector<1x1x1x16xf32> to vector<1x16xf32>
    %423 = vector.broadcast %422 : vector<1x16xf32> to vector<16x16xf32>
    %424 = arith.addf %420, %423 : vector<16x16xf32>
    %c1_306 = arith.constant 1 : index
    %c0_307 = arith.constant 0 : index
    %c0_308 = arith.constant 0 : index
    %c0_309 = arith.constant 0 : index
    %425 = vector.load %arg11[%c1_306, %c0_307, %c0_308, %c0_309] : memref<2x4x64x16xf32, #tpu.memory_space<vmem>>, vector<1x1x64x16xf32>
    %426 = vector.shape_cast %425 : vector<1x1x64x16xf32> to vector<64x16xf32>
    %cst_310 = arith.constant dense<0.000000e+00> : vector<16x16xf32>
    %427 = tpu.matmul %405, %426, %cst_310 {dimension_numbers = #tpu.dot_dimension_numbers<[1], [0], [0], [1], [0, 0, 1, 1], [], []>} : vector<16x64xf32>, vector<64x16xf32>, vector<16x16xf32> -> vector<16x16xf32>
    %c1_311 = arith.constant 1 : index
    %c0_312 = arith.constant 0 : index
    %c0_313 = arith.constant 0 : index
    %c0_314 = arith.constant 0 : index
    %428 = vector.load %arg12[%c1_311, %c0_312, %c0_313, %c0_314] : memref<2x4x1x16xf32, #tpu.memory_space<vmem>>, vector<1x1x1x16xf32>
    %429 = vector.shape_cast %428 : vector<1x1x1x16xf32> to vector<1x16xf32>
    %430 = vector.broadcast %429 : vector<1x16xf32> to vector<16x16xf32>
    %431 = arith.addf %427, %430 : vector<16x16xf32>
    %432 = vector.extract_strided_slice %417 {offsets = [0, 0], sizes = [8, 16], strides = [1, 1]} : vector<16x16xf32> to vector<8x16xf32>
    %433 = vector.extract_strided_slice %424 {offsets = [0, 0], sizes = [8, 16], strides = [1, 1]} : vector<16x16xf32> to vector<8x16xf32>
    %434 = vector.extract_strided_slice %431 {offsets = [0, 0], sizes = [8, 16], strides = [1, 1]} : vector<16x16xf32> to vector<8x16xf32>
    %cst_315 = arith.constant dense<0.000000e+00> : vector<8x8xf32>
    %435 = tpu.matmul %432, %433, %cst_315 {dimension_numbers = #tpu.dot_dimension_numbers<[1], [1], [0], [0], [0, 0, 1, 0], [], []>} : vector<8x16xf32>, vector<8x16xf32>, vector<8x8xf32> -> vector<8x8xf32>
    %cst_316 = arith.constant 2.500000e-01 : f32
    %436 = vector.broadcast %cst_316 : f32 to vector<8x8xf32>
    %437 = arith.mulf %435, %436 : vector<8x8xf32>
    %cst_317 = arith.constant dense<0xFF800000> : vector<8xf32>
    %438 = vector.multi_reduction <maximumf>, %437, %cst_317 [1] : vector<8x8xf32> to vector<8xf32>
    %439 = vector.shape_cast %438 : vector<8xf32> to vector<8x1xf32>
    %440 = vector.broadcast %439 : vector<8x1xf32> to vector<8x8xf32>
    %441 = arith.subf %437, %440 : vector<8x8xf32>
    %442 = math.exp %441 : vector<8x8xf32>
    %cst_318 = arith.constant dense<0.000000e+00> : vector<8xf32>
    %443 = vector.multi_reduction <add>, %442, %cst_318 [1] : vector<8x8xf32> to vector<8xf32>
    %444 = vector.shape_cast %443 : vector<8xf32> to vector<8x1xf32>
    %445 = vector.broadcast %444 : vector<8x1xf32> to vector<8x8xf32>
    %446 = arith.divf %442, %445 : vector<8x8xf32>
    %cst_319 = arith.constant dense<0.000000e+00> : vector<8x16xf32>
    %447 = tpu.matmul %446, %434, %cst_319 {dimension_numbers = #tpu.dot_dimension_numbers<[1], [0], [0], [1], [0, 0, 1, 1], [], []>} : vector<8x8xf32>, vector<8x16xf32>, vector<8x16xf32> -> vector<8x16xf32>
    %c0_320 = arith.constant 0 : index
    %c0_321 = arith.constant 0 : index
    %448 = vector.load %arg27[%c0_320, %c0_321] : memref<16x64xf32, #tpu.memory_space<vmem>>, vector<8x64xf32>
    %c1_322 = arith.constant 1 : index
    %c0_323 = arith.constant 0 : index
    %c0_324 = arith.constant 0 : index
    %c0_325 = arith.constant 0 : index
    %449 = vector.load %arg13[%c1_322, %c0_323, %c0_324, %c0_325] : memref<2x4x16x64xf32, #tpu.memory_space<vmem>>, vector<1x1x16x64xf32>
    %450 = vector.shape_cast %449 : vector<1x1x16x64xf32> to vector<16x64xf32>
    %cst_326 = arith.constant dense<0.000000e+00> : vector<8x64xf32>
    %451 = tpu.matmul %447, %450, %cst_326 {dimension_numbers = #tpu.dot_dimension_numbers<[1], [0], [0], [1], [0, 0, 1, 1], [], []>} : vector<8x16xf32>, vector<16x64xf32>, vector<8x64xf32> -> vector<8x64xf32>
    %452 = arith.addf %448, %451 : vector<8x64xf32>
    %c0_327 = arith.constant 0 : index
    %c0_328 = arith.constant 0 : index
    %453 = vector.load %arg27[%c0_327, %c0_328] : memref<16x64xf32, #tpu.memory_space<vmem>>, vector<8x64xf32>
    tpu.vector_store %arg27[%c0_327, %c0_328], %452 {strides = array<i32>} : memref<16x64xf32, #tpu.memory_space<vmem>>, vector<8x64xf32>,
    %454 = vector.extract_strided_slice %417 {offsets = [8, 0], sizes = [8, 16], strides = [1, 1]} : vector<16x16xf32> to vector<8x16xf32>
    %455 = vector.extract_strided_slice %424 {offsets = [8, 0], sizes = [8, 16], strides = [1, 1]} : vector<16x16xf32> to vector<8x16xf32>
    %456 = vector.extract_strided_slice %431 {offsets = [8, 0], sizes = [8, 16], strides = [1, 1]} : vector<16x16xf32> to vector<8x16xf32>
    %cst_329 = arith.constant dense<0.000000e+00> : vector<8x8xf32>
    %457 = tpu.matmul %454, %455, %cst_329 {dimension_numbers = #tpu.dot_dimension_numbers<[1], [1], [0], [0], [0, 0, 1, 0], [], []>} : vector<8x16xf32>, vector<8x16xf32>, vector<8x8xf32> -> vector<8x8xf32>
    %cst_330 = arith.constant 2.500000e-01 : f32
    %458 = vector.broadcast %cst_330 : f32 to vector<8x8xf32>
    %459 = arith.mulf %457, %458 : vector<8x8xf32>
    %cst_331 = arith.constant dense<0xFF800000> : vector<8xf32>
    %460 = vector.multi_reduction <maximumf>, %459, %cst_331 [1] : vector<8x8xf32> to vector<8xf32>
    %461 = vector.shape_cast %460 : vector<8xf32> to vector<8x1xf32>
    %462 = vector.broadcast %461 : vector<8x1xf32> to vector<8x8xf32>
    %463 = arith.subf %459, %462 : vector<8x8xf32>
    %464 = math.exp %463 : vector<8x8xf32>
    %cst_332 = arith.constant dense<0.000000e+00> : vector<8xf32>
    %465 = vector.multi_reduction <add>, %464, %cst_332 [1] : vector<8x8xf32> to vector<8xf32>
    %466 = vector.shape_cast %465 : vector<8xf32> to vector<8x1xf32>
    %467 = vector.broadcast %466 : vector<8x1xf32> to vector<8x8xf32>
    %468 = arith.divf %464, %467 : vector<8x8xf32>
    %cst_333 = arith.constant dense<0.000000e+00> : vector<8x16xf32>
    %469 = tpu.matmul %468, %456, %cst_333 {dimension_numbers = #tpu.dot_dimension_numbers<[1], [0], [0], [1], [0, 0, 1, 1], [], []>} : vector<8x8xf32>, vector<8x16xf32>, vector<8x16xf32> -> vector<8x16xf32>
    %c8_334 = arith.constant 8 : index
    %c0_335 = arith.constant 0 : index
    %470 = vector.load %arg27[%c8_334, %c0_335] : memref<16x64xf32, #tpu.memory_space<vmem>>, vector<8x64xf32>
    %c1_336 = arith.constant 1 : index
    %c0_337 = arith.constant 0 : index
    %c0_338 = arith.constant 0 : index
    %c0_339 = arith.constant 0 : index
    %471 = vector.load %arg13[%c1_336, %c0_337, %c0_338, %c0_339] : memref<2x4x16x64xf32, #tpu.memory_space<vmem>>, vector<1x1x16x64xf32>
    %472 = vector.shape_cast %471 : vector<1x1x16x64xf32> to vector<16x64xf32>
    %cst_340 = arith.constant dense<0.000000e+00> : vector<8x64xf32>
    %473 = tpu.matmul %469, %472, %cst_340 {dimension_numbers = #tpu.dot_dimension_numbers<[1], [0], [0], [1], [0, 0, 1, 1], [], []>} : vector<8x16xf32>, vector<16x64xf32>, vector<8x64xf32> -> vector<8x64xf32>
    %474 = arith.addf %470, %473 : vector<8x64xf32>
    %c8_341 = arith.constant 8 : index
    %c0_342 = arith.constant 0 : index
    %475 = vector.load %arg27[%c8_341, %c0_342] : memref<16x64xf32, #tpu.memory_space<vmem>>, vector<8x64xf32>
    tpu.vector_store %arg27[%c8_341, %c0_342], %474 {strides = array<i32>} : memref<16x64xf32, #tpu.memory_space<vmem>>, vector<8x64xf32>,
    %c1_343 = arith.constant 1 : index
    %c1_344 = arith.constant 1 : index
    %c0_345 = arith.constant 0 : index
    %c0_346 = arith.constant 0 : index
    %476 = vector.load %arg7[%c1_343, %c1_344, %c0_345, %c0_346] : memref<2x4x64x16xf32, #tpu.memory_space<vmem>>, vector<1x1x64x16xf32>
    %477 = vector.shape_cast %476 : vector<1x1x64x16xf32> to vector<64x16xf32>
    %cst_347 = arith.constant dense<0.000000e+00> : vector<16x16xf32>
    %478 = tpu.matmul %405, %477, %cst_347 {dimension_numbers = #tpu.dot_dimension_numbers<[1], [0], [0], [1], [0, 0, 1, 1], [], []>} : vector<16x64xf32>, vector<64x16xf32>, vector<16x16xf32> -> vector<16x16xf32>
    %c1_348 = arith.constant 1 : index
    %c1_349 = arith.constant 1 : index
    %c0_350 = arith.constant 0 : index
    %c0_351 = arith.constant 0 : index
    %479 = vector.load %arg8[%c1_348, %c1_349, %c0_350, %c0_351] : memref<2x4x1x16xf32, #tpu.memory_space<vmem>>, vector<1x1x1x16xf32>
    %480 = vector.shape_cast %479 : vector<1x1x1x16xf32> to vector<1x16xf32>
    %481 = vector.broadcast %480 : vector<1x16xf32> to vector<16x16xf32>
    %482 = arith.addf %478, %481 : vector<16x16xf32>
    %c1_352 = arith.constant 1 : index
    %c1_353 = arith.constant 1 : index
    %c0_354 = arith.constant 0 : index
    %c0_355 = arith.constant 0 : index
    %483 = vector.load %arg9[%c1_352, %c1_353, %c0_354, %c0_355] : memref<2x4x64x16xf32, #tpu.memory_space<vmem>>, vector<1x1x64x16xf32>
    %484 = vector.shape_cast %483 : vector<1x1x64x16xf32> to vector<64x16xf32>
    %cst_356 = arith.constant dense<0.000000e+00> : vector<16x16xf32>
    %485 = tpu.matmul %405, %484, %cst_356 {dimension_numbers = #tpu.dot_dimension_numbers<[1], [0], [0], [1], [0, 0, 1, 1], [], []>} : vector<16x64xf32>, vector<64x16xf32>, vector<16x16xf32> -> vector<16x16xf32>
    %c1_357 = arith.constant 1 : index
    %c1_358 = arith.constant 1 : index
    %c0_359 = arith.constant 0 : index
    %c0_360 = arith.constant 0 : index
    %486 = vector.load %arg10[%c1_357, %c1_358, %c0_359, %c0_360] : memref<2x4x1x16xf32, #tpu.memory_space<vmem>>, vector<1x1x1x16xf32>
    %487 = vector.shape_cast %486 : vector<1x1x1x16xf32> to vector<1x16xf32>
    %488 = vector.broadcast %487 : vector<1x16xf32> to vector<16x16xf32>
    %489 = arith.addf %485, %488 : vector<16x16xf32>
    %c1_361 = arith.constant 1 : index
    %c1_362 = arith.constant 1 : index
    %c0_363 = arith.constant 0 : index
    %c0_364 = arith.constant 0 : index
    %490 = vector.load %arg11[%c1_361, %c1_362, %c0_363, %c0_364] : memref<2x4x64x16xf32, #tpu.memory_space<vmem>>, vector<1x1x64x16xf32>
    %491 = vector.shape_cast %490 : vector<1x1x64x16xf32> to vector<64x16xf32>
    %cst_365 = arith.constant dense<0.000000e+00> : vector<16x16xf32>
    %492 = tpu.matmul %405, %491, %cst_365 {dimension_numbers = #tpu.dot_dimension_numbers<[1], [0], [0], [1], [0, 0, 1, 1], [], []>} : vector<16x64xf32>, vector<64x16xf32>, vector<16x16xf32> -> vector<16x16xf32>
    %c1_366 = arith.constant 1 : index
    %c1_367 = arith.constant 1 : index
    %c0_368 = arith.constant 0 : index
    %c0_369 = arith.constant 0 : index
    %493 = vector.load %arg12[%c1_366, %c1_367, %c0_368, %c0_369] : memref<2x4x1x16xf32, #tpu.memory_space<vmem>>, vector<1x1x1x16xf32>
    %494 = vector.shape_cast %493 : vector<1x1x1x16xf32> to vector<1x16xf32>
    %495 = vector.broadcast %494 : vector<1x16xf32> to vector<16x16xf32>
    %496 = arith.addf %492, %495 : vector<16x16xf32>
    %497 = vector.extract_strided_slice %482 {offsets = [0, 0], sizes = [8, 16], strides = [1, 1]} : vector<16x16xf32> to vector<8x16xf32>
    %498 = vector.extract_strided_slice %489 {offsets = [0, 0], sizes = [8, 16], strides = [1, 1]} : vector<16x16xf32> to vector<8x16xf32>
    %499 = vector.extract_strided_slice %496 {offsets = [0, 0], sizes = [8, 16], strides = [1, 1]} : vector<16x16xf32> to vector<8x16xf32>
    %cst_370 = arith.constant dense<0.000000e+00> : vector<8x8xf32>
    %500 = tpu.matmul %497, %498, %cst_370 {dimension_numbers = #tpu.dot_dimension_numbers<[1], [1], [0], [0], [0, 0, 1, 0], [], []>} : vector<8x16xf32>, vector<8x16xf32>, vector<8x8xf32> -> vector<8x8xf32>
    %cst_371 = arith.constant 2.500000e-01 : f32
    %501 = vector.broadcast %cst_371 : f32 to vector<8x8xf32>
    %502 = arith.mulf %500, %501 : vector<8x8xf32>
    %cst_372 = arith.constant dense<0xFF800000> : vector<8xf32>
    %503 = vector.multi_reduction <maximumf>, %502, %cst_372 [1] : vector<8x8xf32> to vector<8xf32>
    %504 = vector.shape_cast %503 : vector<8xf32> to vector<8x1xf32>
    %505 = vector.broadcast %504 : vector<8x1xf32> to vector<8x8xf32>
    %506 = arith.subf %502, %505 : vector<8x8xf32>
    %507 = math.exp %506 : vector<8x8xf32>
    %cst_373 = arith.constant dense<0.000000e+00> : vector<8xf32>
    %508 = vector.multi_reduction <add>, %507, %cst_373 [1] : vector<8x8xf32> to vector<8xf32>
    %509 = vector.shape_cast %508 : vector<8xf32> to vector<8x1xf32>
    %510 = vector.broadcast %509 : vector<8x1xf32> to vector<8x8xf32>
    %511 = arith.divf %507, %510 : vector<8x8xf32>
    %cst_374 = arith.constant dense<0.000000e+00> : vector<8x16xf32>
    %512 = tpu.matmul %511, %499, %cst_374 {dimension_numbers = #tpu.dot_dimension_numbers<[1], [0], [0], [1], [0, 0, 1, 1], [], []>} : vector<8x8xf32>, vector<8x16xf32>, vector<8x16xf32> -> vector<8x16xf32>
    %c0_375 = arith.constant 0 : index
    %c0_376 = arith.constant 0 : index
    %513 = vector.load %arg27[%c0_375, %c0_376] : memref<16x64xf32, #tpu.memory_space<vmem>>, vector<8x64xf32>
    %c1_377 = arith.constant 1 : index
    %c1_378 = arith.constant 1 : index
    %c0_379 = arith.constant 0 : index
    %c0_380 = arith.constant 0 : index
    %514 = vector.load %arg13[%c1_377, %c1_378, %c0_379, %c0_380] : memref<2x4x16x64xf32, #tpu.memory_space<vmem>>, vector<1x1x16x64xf32>
    %515 = vector.shape_cast %514 : vector<1x1x16x64xf32> to vector<16x64xf32>
    %cst_381 = arith.constant dense<0.000000e+00> : vector<8x64xf32>
    %516 = tpu.matmul %512, %515, %cst_381 {dimension_numbers = #tpu.dot_dimension_numbers<[1], [0], [0], [1], [0, 0, 1, 1], [], []>} : vector<8x16xf32>, vector<16x64xf32>, vector<8x64xf32> -> vector<8x64xf32>
    %517 = arith.addf %513, %516 : vector<8x64xf32>
    %c0_382 = arith.constant 0 : index
    %c0_383 = arith.constant 0 : index
    %518 = vector.load %arg27[%c0_382, %c0_383] : memref<16x64xf32, #tpu.memory_space<vmem>>, vector<8x64xf32>
    tpu.vector_store %arg27[%c0_382, %c0_383], %517 {strides = array<i32>} : memref<16x64xf32, #tpu.memory_space<vmem>>, vector<8x64xf32>,
    %519 = vector.extract_strided_slice %482 {offsets = [8, 0], sizes = [8, 16], strides = [1, 1]} : vector<16x16xf32> to vector<8x16xf32>
    %520 = vector.extract_strided_slice %489 {offsets = [8, 0], sizes = [8, 16], strides = [1, 1]} : vector<16x16xf32> to vector<8x16xf32>
    %521 = vector.extract_strided_slice %496 {offsets = [8, 0], sizes = [8, 16], strides = [1, 1]} : vector<16x16xf32> to vector<8x16xf32>
    %cst_384 = arith.constant dense<0.000000e+00> : vector<8x8xf32>
    %522 = tpu.matmul %519, %520, %cst_384 {dimension_numbers = #tpu.dot_dimension_numbers<[1], [1], [0], [0], [0, 0, 1, 0], [], []>} : vector<8x16xf32>, vector<8x16xf32>, vector<8x8xf32> -> vector<8x8xf32>
    %cst_385 = arith.constant 2.500000e-01 : f32
    %523 = vector.broadcast %cst_385 : f32 to vector<8x8xf32>
    %524 = arith.mulf %522, %523 : vector<8x8xf32>
    %cst_386 = arith.constant dense<0xFF800000> : vector<8xf32>
    %525 = vector.multi_reduction <maximumf>, %524, %cst_386 [1] : vector<8x8xf32> to vector<8xf32>
    %526 = vector.shape_cast %525 : vector<8xf32> to vector<8x1xf32>
    %527 = vector.broadcast %526 : vector<8x1xf32> to vector<8x8xf32>
    %528 = arith.subf %524, %527 : vector<8x8xf32>
    %529 = math.exp %528 : vector<8x8xf32>
    %cst_387 = arith.constant dense<0.000000e+00> : vector<8xf32>
    %530 = vector.multi_reduction <add>, %529, %cst_387 [1] : vector<8x8xf32> to vector<8xf32>
    %531 = vector.shape_cast %530 : vector<8xf32> to vector<8x1xf32>
    %532 = vector.broadcast %531 : vector<8x1xf32> to vector<8x8xf32>
    %533 = arith.divf %529, %532 : vector<8x8xf32>
    %cst_388 = arith.constant dense<0.000000e+00> : vector<8x16xf32>
    %534 = tpu.matmul %533, %521, %cst_388 {dimension_numbers = #tpu.dot_dimension_numbers<[1], [0], [0], [1], [0, 0, 1, 1], [], []>} : vector<8x8xf32>, vector<8x16xf32>, vector<8x16xf32> -> vector<8x16xf32>
    %c8_389 = arith.constant 8 : index
    %c0_390 = arith.constant 0 : index
    %535 = vector.load %arg27[%c8_389, %c0_390] : memref<16x64xf32, #tpu.memory_space<vmem>>, vector<8x64xf32>
    %c1_391 = arith.constant 1 : index
    %c1_392 = arith.constant 1 : index
    %c0_393 = arith.constant 0 : index
    %c0_394 = arith.constant 0 : index
    %536 = vector.load %arg13[%c1_391, %c1_392, %c0_393, %c0_394] : memref<2x4x16x64xf32, #tpu.memory_space<vmem>>, vector<1x1x16x64xf32>
    %537 = vector.shape_cast %536 : vector<1x1x16x64xf32> to vector<16x64xf32>
    %cst_395 = arith.constant dense<0.000000e+00> : vector<8x64xf32>
    %538 = tpu.matmul %534, %537, %cst_395 {dimension_numbers = #tpu.dot_dimension_numbers<[1], [0], [0], [1], [0, 0, 1, 1], [], []>} : vector<8x16xf32>, vector<16x64xf32>, vector<8x64xf32> -> vector<8x64xf32>
    %539 = arith.addf %535, %538 : vector<8x64xf32>
    %c8_396 = arith.constant 8 : index
    %c0_397 = arith.constant 0 : index
    %540 = vector.load %arg27[%c8_396, %c0_397] : memref<16x64xf32, #tpu.memory_space<vmem>>, vector<8x64xf32>
    tpu.vector_store %arg27[%c8_396, %c0_397], %539 {strides = array<i32>} : memref<16x64xf32, #tpu.memory_space<vmem>>, vector<8x64xf32>,
    %c1_398 = arith.constant 1 : index
    %c2_399 = arith.constant 2 : index
    %c0_400 = arith.constant 0 : index
    %c0_401 = arith.constant 0 : index
    %541 = vector.load %arg7[%c1_398, %c2_399, %c0_400, %c0_401] : memref<2x4x64x16xf32, #tpu.memory_space<vmem>>, vector<1x1x64x16xf32>
    %542 = vector.shape_cast %541 : vector<1x1x64x16xf32> to vector<64x16xf32>
    %cst_402 = arith.constant dense<0.000000e+00> : vector<16x16xf32>
    %543 = tpu.matmul %405, %542, %cst_402 {dimension_numbers = #tpu.dot_dimension_numbers<[1], [0], [0], [1], [0, 0, 1, 1], [], []>} : vector<16x64xf32>, vector<64x16xf32>, vector<16x16xf32> -> vector<16x16xf32>
    %c1_403 = arith.constant 1 : index
    %c2_404 = arith.constant 2 : index
    %c0_405 = arith.constant 0 : index
    %c0_406 = arith.constant 0 : index
    %544 = vector.load %arg8[%c1_403, %c2_404, %c0_405, %c0_406] : memref<2x4x1x16xf32, #tpu.memory_space<vmem>>, vector<1x1x1x16xf32>
    %545 = vector.shape_cast %544 : vector<1x1x1x16xf32> to vector<1x16xf32>
    %546 = vector.broadcast %545 : vector<1x16xf32> to vector<16x16xf32>
    %547 = arith.addf %543, %546 : vector<16x16xf32>
    %c1_407 = arith.constant 1 : index
    %c2_408 = arith.constant 2 : index
    %c0_409 = arith.constant 0 : index
    %c0_410 = arith.constant 0 : index
    %548 = vector.load %arg9[%c1_407, %c2_408, %c0_409, %c0_410] : memref<2x4x64x16xf32, #tpu.memory_space<vmem>>, vector<1x1x64x16xf32>
    %549 = vector.shape_cast %548 : vector<1x1x64x16xf32> to vector<64x16xf32>
    %cst_411 = arith.constant dense<0.000000e+00> : vector<16x16xf32>
    %550 = tpu.matmul %405, %549, %cst_411 {dimension_numbers = #tpu.dot_dimension_numbers<[1], [0], [0], [1], [0, 0, 1, 1], [], []>} : vector<16x64xf32>, vector<64x16xf32>, vector<16x16xf32> -> vector<16x16xf32>
    %c1_412 = arith.constant 1 : index
    %c2_413 = arith.constant 2 : index
    %c0_414 = arith.constant 0 : index
    %c0_415 = arith.constant 0 : index
    %551 = vector.load %arg10[%c1_412, %c2_413, %c0_414, %c0_415] : memref<2x4x1x16xf32, #tpu.memory_space<vmem>>, vector<1x1x1x16xf32>
    %552 = vector.shape_cast %551 : vector<1x1x1x16xf32> to vector<1x16xf32>
    %553 = vector.broadcast %552 : vector<1x16xf32> to vector<16x16xf32>
    %554 = arith.addf %550, %553 : vector<16x16xf32>
    %c1_416 = arith.constant 1 : index
    %c2_417 = arith.constant 2 : index
    %c0_418 = arith.constant 0 : index
    %c0_419 = arith.constant 0 : index
    %555 = vector.load %arg11[%c1_416, %c2_417, %c0_418, %c0_419] : memref<2x4x64x16xf32, #tpu.memory_space<vmem>>, vector<1x1x64x16xf32>
    %556 = vector.shape_cast %555 : vector<1x1x64x16xf32> to vector<64x16xf32>
    %cst_420 = arith.constant dense<0.000000e+00> : vector<16x16xf32>
    %557 = tpu.matmul %405, %556, %cst_420 {dimension_numbers = #tpu.dot_dimension_numbers<[1], [0], [0], [1], [0, 0, 1, 1], [], []>} : vector<16x64xf32>, vector<64x16xf32>, vector<16x16xf32> -> vector<16x16xf32>
    %c1_421 = arith.constant 1 : index
    %c2_422 = arith.constant 2 : index
    %c0_423 = arith.constant 0 : index
    %c0_424 = arith.constant 0 : index
    %558 = vector.load %arg12[%c1_421, %c2_422, %c0_423, %c0_424] : memref<2x4x1x16xf32, #tpu.memory_space<vmem>>, vector<1x1x1x16xf32>
    %559 = vector.shape_cast %558 : vector<1x1x1x16xf32> to vector<1x16xf32>
    %560 = vector.broadcast %559 : vector<1x16xf32> to vector<16x16xf32>
    %561 = arith.addf %557, %560 : vector<16x16xf32>
    %562 = vector.extract_strided_slice %547 {offsets = [0, 0], sizes = [8, 16], strides = [1, 1]} : vector<16x16xf32> to vector<8x16xf32>
    %563 = vector.extract_strided_slice %554 {offsets = [0, 0], sizes = [8, 16], strides = [1, 1]} : vector<16x16xf32> to vector<8x16xf32>
    %564 = vector.extract_strided_slice %561 {offsets = [0, 0], sizes = [8, 16], strides = [1, 1]} : vector<16x16xf32> to vector<8x16xf32>
    %cst_425 = arith.constant dense<0.000000e+00> : vector<8x8xf32>
    %565 = tpu.matmul %562, %563, %cst_425 {dimension_numbers = #tpu.dot_dimension_numbers<[1], [1], [0], [0], [0, 0, 1, 0], [], []>} : vector<8x16xf32>, vector<8x16xf32>, vector<8x8xf32> -> vector<8x8xf32>
    %cst_426 = arith.constant 2.500000e-01 : f32
    %566 = vector.broadcast %cst_426 : f32 to vector<8x8xf32>
    %567 = arith.mulf %565, %566 : vector<8x8xf32>
    %cst_427 = arith.constant dense<0xFF800000> : vector<8xf32>
    %568 = vector.multi_reduction <maximumf>, %567, %cst_427 [1] : vector<8x8xf32> to vector<8xf32>
    %569 = vector.shape_cast %568 : vector<8xf32> to vector<8x1xf32>
    %570 = vector.broadcast %569 : vector<8x1xf32> to vector<8x8xf32>
    %571 = arith.subf %567, %570 : vector<8x8xf32>
    %572 = math.exp %571 : vector<8x8xf32>
    %cst_428 = arith.constant dense<0.000000e+00> : vector<8xf32>
    %573 = vector.multi_reduction <add>, %572, %cst_428 [1] : vector<8x8xf32> to vector<8xf32>
    %574 = vector.shape_cast %573 : vector<8xf32> to vector<8x1xf32>
    %575 = vector.broadcast %574 : vector<8x1xf32> to vector<8x8xf32>
    %576 = arith.divf %572, %575 : vector<8x8xf32>
    %cst_429 = arith.constant dense<0.000000e+00> : vector<8x16xf32>
    %577 = tpu.matmul %576, %564, %cst_429 {dimension_numbers = #tpu.dot_dimension_numbers<[1], [0], [0], [1], [0, 0, 1, 1], [], []>} : vector<8x8xf32>, vector<8x16xf32>, vector<8x16xf32> -> vector<8x16xf32>
    %c0_430 = arith.constant 0 : index
    %c0_431 = arith.constant 0 : index
    %578 = vector.load %arg27[%c0_430, %c0_431] : memref<16x64xf32, #tpu.memory_space<vmem>>, vector<8x64xf32>
    %c1_432 = arith.constant 1 : index
    %c2_433 = arith.constant 2 : index
    %c0_434 = arith.constant 0 : index
    %c0_435 = arith.constant 0 : index
    %579 = vector.load %arg13[%c1_432, %c2_433, %c0_434, %c0_435] : memref<2x4x16x64xf32, #tpu.memory_space<vmem>>, vector<1x1x16x64xf32>
    %580 = vector.shape_cast %579 : vector<1x1x16x64xf32> to vector<16x64xf32>
    %cst_436 = arith.constant dense<0.000000e+00> : vector<8x64xf32>
    %581 = tpu.matmul %577, %580, %cst_436 {dimension_numbers = #tpu.dot_dimension_numbers<[1], [0], [0], [1], [0, 0, 1, 1], [], []>} : vector<8x16xf32>, vector<16x64xf32>, vector<8x64xf32> -> vector<8x64xf32>
    %582 = arith.addf %578, %581 : vector<8x64xf32>
    %c0_437 = arith.constant 0 : index
    %c0_438 = arith.constant 0 : index
    %583 = vector.load %arg27[%c0_437, %c0_438] : memref<16x64xf32, #tpu.memory_space<vmem>>, vector<8x64xf32>
    tpu.vector_store %arg27[%c0_437, %c0_438], %582 {strides = array<i32>} : memref<16x64xf32, #tpu.memory_space<vmem>>, vector<8x64xf32>,
    %584 = vector.extract_strided_slice %547 {offsets = [8, 0], sizes = [8, 16], strides = [1, 1]} : vector<16x16xf32> to vector<8x16xf32>
    %585 = vector.extract_strided_slice %554 {offsets = [8, 0], sizes = [8, 16], strides = [1, 1]} : vector<16x16xf32> to vector<8x16xf32>
    %586 = vector.extract_strided_slice %561 {offsets = [8, 0], sizes = [8, 16], strides = [1, 1]} : vector<16x16xf32> to vector<8x16xf32>
    %cst_439 = arith.constant dense<0.000000e+00> : vector<8x8xf32>
    %587 = tpu.matmul %584, %585, %cst_439 {dimension_numbers = #tpu.dot_dimension_numbers<[1], [1], [0], [0], [0, 0, 1, 0], [], []>} : vector<8x16xf32>, vector<8x16xf32>, vector<8x8xf32> -> vector<8x8xf32>
    %cst_440 = arith.constant 2.500000e-01 : f32
    %588 = vector.broadcast %cst_440 : f32 to vector<8x8xf32>
    %589 = arith.mulf %587, %588 : vector<8x8xf32>
    %cst_441 = arith.constant dense<0xFF800000> : vector<8xf32>
    %590 = vector.multi_reduction <maximumf>, %589, %cst_441 [1] : vector<8x8xf32> to vector<8xf32>
    %591 = vector.shape_cast %590 : vector<8xf32> to vector<8x1xf32>
    %592 = vector.broadcast %591 : vector<8x1xf32> to vector<8x8xf32>
    %593 = arith.subf %589, %592 : vector<8x8xf32>
    %594 = math.exp %593 : vector<8x8xf32>
    %cst_442 = arith.constant dense<0.000000e+00> : vector<8xf32>
    %595 = vector.multi_reduction <add>, %594, %cst_442 [1] : vector<8x8xf32> to vector<8xf32>
    %596 = vector.shape_cast %595 : vector<8xf32> to vector<8x1xf32>
    %597 = vector.broadcast %596 : vector<8x1xf32> to vector<8x8xf32>
    %598 = arith.divf %594, %597 : vector<8x8xf32>
    %cst_443 = arith.constant dense<0.000000e+00> : vector<8x16xf32>
    %599 = tpu.matmul %598, %586, %cst_443 {dimension_numbers = #tpu.dot_dimension_numbers<[1], [0], [0], [1], [0, 0, 1, 1], [], []>} : vector<8x8xf32>, vector<8x16xf32>, vector<8x16xf32> -> vector<8x16xf32>
    %c8_444 = arith.constant 8 : index
    %c0_445 = arith.constant 0 : index
    %600 = vector.load %arg27[%c8_444, %c0_445] : memref<16x64xf32, #tpu.memory_space<vmem>>, vector<8x64xf32>
    %c1_446 = arith.constant 1 : index
    %c2_447 = arith.constant 2 : index
    %c0_448 = arith.constant 0 : index
    %c0_449 = arith.constant 0 : index
    %601 = vector.load %arg13[%c1_446, %c2_447, %c0_448, %c0_449] : memref<2x4x16x64xf32, #tpu.memory_space<vmem>>, vector<1x1x16x64xf32>
    %602 = vector.shape_cast %601 : vector<1x1x16x64xf32> to vector<16x64xf32>
    %cst_450 = arith.constant dense<0.000000e+00> : vector<8x64xf32>
    %603 = tpu.matmul %599, %602, %cst_450 {dimension_numbers = #tpu.dot_dimension_numbers<[1], [0], [0], [1], [0, 0, 1, 1], [], []>} : vector<8x16xf32>, vector<16x64xf32>, vector<8x64xf32> -> vector<8x64xf32>
    %604 = arith.addf %600, %603 : vector<8x64xf32>
    %c8_451 = arith.constant 8 : index
    %c0_452 = arith.constant 0 : index
    %605 = vector.load %arg27[%c8_451, %c0_452] : memref<16x64xf32, #tpu.memory_space<vmem>>, vector<8x64xf32>
    tpu.vector_store %arg27[%c8_451, %c0_452], %604 {strides = array<i32>} : memref<16x64xf32, #tpu.memory_space<vmem>>, vector<8x64xf32>,
    %c1_453 = arith.constant 1 : index
    %c3_454 = arith.constant 3 : index
    %c0_455 = arith.constant 0 : index
    %c0_456 = arith.constant 0 : index
    %606 = vector.load %arg7[%c1_453, %c3_454, %c0_455, %c0_456] : memref<2x4x64x16xf32, #tpu.memory_space<vmem>>, vector<1x1x64x16xf32>
    %607 = vector.shape_cast %606 : vector<1x1x64x16xf32> to vector<64x16xf32>
    %cst_457 = arith.constant dense<0.000000e+00> : vector<16x16xf32>
    %608 = tpu.matmul %405, %607, %cst_457 {dimension_numbers = #tpu.dot_dimension_numbers<[1], [0], [0], [1], [0, 0, 1, 1], [], []>} : vector<16x64xf32>, vector<64x16xf32>, vector<16x16xf32> -> vector<16x16xf32>
    %c1_458 = arith.constant 1 : index
    %c3_459 = arith.constant 3 : index
    %c0_460 = arith.constant 0 : index
    %c0_461 = arith.constant 0 : index
    %609 = vector.load %arg8[%c1_458, %c3_459, %c0_460, %c0_461] : memref<2x4x1x16xf32, #tpu.memory_space<vmem>>, vector<1x1x1x16xf32>
    %610 = vector.shape_cast %609 : vector<1x1x1x16xf32> to vector<1x16xf32>
    %611 = vector.broadcast %610 : vector<1x16xf32> to vector<16x16xf32>
    %612 = arith.addf %608, %611 : vector<16x16xf32>
    %c1_462 = arith.constant 1 : index
    %c3_463 = arith.constant 3 : index
    %c0_464 = arith.constant 0 : index
    %c0_465 = arith.constant 0 : index
    %613 = vector.load %arg9[%c1_462, %c3_463, %c0_464, %c0_465] : memref<2x4x64x16xf32, #tpu.memory_space<vmem>>, vector<1x1x64x16xf32>
    %614 = vector.shape_cast %613 : vector<1x1x64x16xf32> to vector<64x16xf32>
    %cst_466 = arith.constant dense<0.000000e+00> : vector<16x16xf32>
    %615 = tpu.matmul %405, %614, %cst_466 {dimension_numbers = #tpu.dot_dimension_numbers<[1], [0], [0], [1], [0, 0, 1, 1], [], []>} : vector<16x64xf32>, vector<64x16xf32>, vector<16x16xf32> -> vector<16x16xf32>
    %c1_467 = arith.constant 1 : index
    %c3_468 = arith.constant 3 : index
    %c0_469 = arith.constant 0 : index
    %c0_470 = arith.constant 0 : index
    %616 = vector.load %arg10[%c1_467, %c3_468, %c0_469, %c0_470] : memref<2x4x1x16xf32, #tpu.memory_space<vmem>>, vector<1x1x1x16xf32>
    %617 = vector.shape_cast %616 : vector<1x1x1x16xf32> to vector<1x16xf32>
    %618 = vector.broadcast %617 : vector<1x16xf32> to vector<16x16xf32>
    %619 = arith.addf %615, %618 : vector<16x16xf32>
    %c1_471 = arith.constant 1 : index
    %c3_472 = arith.constant 3 : index
    %c0_473 = arith.constant 0 : index
    %c0_474 = arith.constant 0 : index
    %620 = vector.load %arg11[%c1_471, %c3_472, %c0_473, %c0_474] : memref<2x4x64x16xf32, #tpu.memory_space<vmem>>, vector<1x1x64x16xf32>
    %621 = vector.shape_cast %620 : vector<1x1x64x16xf32> to vector<64x16xf32>
    %cst_475 = arith.constant dense<0.000000e+00> : vector<16x16xf32>
    %622 = tpu.matmul %405, %621, %cst_475 {dimension_numbers = #tpu.dot_dimension_numbers<[1], [0], [0], [1], [0, 0, 1, 1], [], []>} : vector<16x64xf32>, vector<64x16xf32>, vector<16x16xf32> -> vector<16x16xf32>
    %c1_476 = arith.constant 1 : index
    %c3_477 = arith.constant 3 : index
    %c0_478 = arith.constant 0 : index
    %c0_479 = arith.constant 0 : index
    %623 = vector.load %arg12[%c1_476, %c3_477, %c0_478, %c0_479] : memref<2x4x1x16xf32, #tpu.memory_space<vmem>>, vector<1x1x1x16xf32>
    %624 = vector.shape_cast %623 : vector<1x1x1x16xf32> to vector<1x16xf32>
    %625 = vector.broadcast %624 : vector<1x16xf32> to vector<16x16xf32>
    %626 = arith.addf %622, %625 : vector<16x16xf32>
    %627 = vector.extract_strided_slice %612 {offsets = [0, 0], sizes = [8, 16], strides = [1, 1]} : vector<16x16xf32> to vector<8x16xf32>
    %628 = vector.extract_strided_slice %619 {offsets = [0, 0], sizes = [8, 16], strides = [1, 1]} : vector<16x16xf32> to vector<8x16xf32>
    %629 = vector.extract_strided_slice %626 {offsets = [0, 0], sizes = [8, 16], strides = [1, 1]} : vector<16x16xf32> to vector<8x16xf32>
    %cst_480 = arith.constant dense<0.000000e+00> : vector<8x8xf32>
    %630 = tpu.matmul %627, %628, %cst_480 {dimension_numbers = #tpu.dot_dimension_numbers<[1], [1], [0], [0], [0, 0, 1, 0], [], []>} : vector<8x16xf32>, vector<8x16xf32>, vector<8x8xf32> -> vector<8x8xf32>
    %cst_481 = arith.constant 2.500000e-01 : f32
    %631 = vector.broadcast %cst_481 : f32 to vector<8x8xf32>
    %632 = arith.mulf %630, %631 : vector<8x8xf32>
    %cst_482 = arith.constant dense<0xFF800000> : vector<8xf32>
    %633 = vector.multi_reduction <maximumf>, %632, %cst_482 [1] : vector<8x8xf32> to vector<8xf32>
    %634 = vector.shape_cast %633 : vector<8xf32> to vector<8x1xf32>
    %635 = vector.broadcast %634 : vector<8x1xf32> to vector<8x8xf32>
    %636 = arith.subf %632, %635 : vector<8x8xf32>
    %637 = math.exp %636 : vector<8x8xf32>
    %cst_483 = arith.constant dense<0.000000e+00> : vector<8xf32>
    %638 = vector.multi_reduction <add>, %637, %cst_483 [1] : vector<8x8xf32> to vector<8xf32>
    %639 = vector.shape_cast %638 : vector<8xf32> to vector<8x1xf32>
    %640 = vector.broadcast %639 : vector<8x1xf32> to vector<8x8xf32>
    %641 = arith.divf %637, %640 : vector<8x8xf32>
    %cst_484 = arith.constant dense<0.000000e+00> : vector<8x16xf32>
    %642 = tpu.matmul %641, %629, %cst_484 {dimension_numbers = #tpu.dot_dimension_numbers<[1], [0], [0], [1], [0, 0, 1, 1], [], []>} : vector<8x8xf32>, vector<8x16xf32>, vector<8x16xf32> -> vector<8x16xf32>
    %c0_485 = arith.constant 0 : index
    %c0_486 = arith.constant 0 : index
    %643 = vector.load %arg27[%c0_485, %c0_486] : memref<16x64xf32, #tpu.memory_space<vmem>>, vector<8x64xf32>
    %c1_487 = arith.constant 1 : index
    %c3_488 = arith.constant 3 : index
    %c0_489 = arith.constant 0 : index
    %c0_490 = arith.constant 0 : index
    %644 = vector.load %arg13[%c1_487, %c3_488, %c0_489, %c0_490] : memref<2x4x16x64xf32, #tpu.memory_space<vmem>>, vector<1x1x16x64xf32>
    %645 = vector.shape_cast %644 : vector<1x1x16x64xf32> to vector<16x64xf32>
    %cst_491 = arith.constant dense<0.000000e+00> : vector<8x64xf32>
    %646 = tpu.matmul %642, %645, %cst_491 {dimension_numbers = #tpu.dot_dimension_numbers<[1], [0], [0], [1], [0, 0, 1, 1], [], []>} : vector<8x16xf32>, vector<16x64xf32>, vector<8x64xf32> -> vector<8x64xf32>
    %647 = arith.addf %643, %646 : vector<8x64xf32>
    %c0_492 = arith.constant 0 : index
    %c0_493 = arith.constant 0 : index
    %648 = vector.load %arg27[%c0_492, %c0_493] : memref<16x64xf32, #tpu.memory_space<vmem>>, vector<8x64xf32>
    tpu.vector_store %arg27[%c0_492, %c0_493], %647 {strides = array<i32>} : memref<16x64xf32, #tpu.memory_space<vmem>>, vector<8x64xf32>,
    %649 = vector.extract_strided_slice %612 {offsets = [8, 0], sizes = [8, 16], strides = [1, 1]} : vector<16x16xf32> to vector<8x16xf32>
    %650 = vector.extract_strided_slice %619 {offsets = [8, 0], sizes = [8, 16], strides = [1, 1]} : vector<16x16xf32> to vector<8x16xf32>
    %651 = vector.extract_strided_slice %626 {offsets = [8, 0], sizes = [8, 16], strides = [1, 1]} : vector<16x16xf32> to vector<8x16xf32>
    %cst_494 = arith.constant dense<0.000000e+00> : vector<8x8xf32>
    %652 = tpu.matmul %649, %650, %cst_494 {dimension_numbers = #tpu.dot_dimension_numbers<[1], [1], [0], [0], [0, 0, 1, 0], [], []>} : vector<8x16xf32>, vector<8x16xf32>, vector<8x8xf32> -> vector<8x8xf32>
    %cst_495 = arith.constant 2.500000e-01 : f32
    %653 = vector.broadcast %cst_495 : f32 to vector<8x8xf32>
    %654 = arith.mulf %652, %653 : vector<8x8xf32>
    %cst_496 = arith.constant dense<0xFF800000> : vector<8xf32>
    %655 = vector.multi_reduction <maximumf>, %654, %cst_496 [1] : vector<8x8xf32> to vector<8xf32>
    %656 = vector.shape_cast %655 : vector<8xf32> to vector<8x1xf32>
    %657 = vector.broadcast %656 : vector<8x1xf32> to vector<8x8xf32>
    %658 = arith.subf %654, %657 : vector<8x8xf32>
    %659 = math.exp %658 : vector<8x8xf32>
    %cst_497 = arith.constant dense<0.000000e+00> : vector<8xf32>
    %660 = vector.multi_reduction <add>, %659, %cst_497 [1] : vector<8x8xf32> to vector<8xf32>
    %661 = vector.shape_cast %660 : vector<8xf32> to vector<8x1xf32>
    %662 = vector.broadcast %661 : vector<8x1xf32> to vector<8x8xf32>
    %663 = arith.divf %659, %662 : vector<8x8xf32>
    %cst_498 = arith.constant dense<0.000000e+00> : vector<8x16xf32>
    %664 = tpu.matmul %663, %651, %cst_498 {dimension_numbers = #tpu.dot_dimension_numbers<[1], [0], [0], [1], [0, 0, 1, 1], [], []>} : vector<8x8xf32>, vector<8x16xf32>, vector<8x16xf32> -> vector<8x16xf32>
    %c8_499 = arith.constant 8 : index
    %c0_500 = arith.constant 0 : index
    %665 = vector.load %arg27[%c8_499, %c0_500] : memref<16x64xf32, #tpu.memory_space<vmem>>, vector<8x64xf32>
    %c1_501 = arith.constant 1 : index
    %c3_502 = arith.constant 3 : index
    %c0_503 = arith.constant 0 : index
    %c0_504 = arith.constant 0 : index
    %666 = vector.load %arg13[%c1_501, %c3_502, %c0_503, %c0_504] : memref<2x4x16x64xf32, #tpu.memory_space<vmem>>, vector<1x1x16x64xf32>
    %667 = vector.shape_cast %666 : vector<1x1x16x64xf32> to vector<16x64xf32>
    %cst_505 = arith.constant dense<0.000000e+00> : vector<8x64xf32>
    %668 = tpu.matmul %664, %667, %cst_505 {dimension_numbers = #tpu.dot_dimension_numbers<[1], [0], [0], [1], [0, 0, 1, 1], [], []>} : vector<8x16xf32>, vector<16x64xf32>, vector<8x64xf32> -> vector<8x64xf32>
    %669 = arith.addf %665, %668 : vector<8x64xf32>
    %c8_506 = arith.constant 8 : index
    %c0_507 = arith.constant 0 : index
    %670 = vector.load %arg27[%c8_506, %c0_507] : memref<16x64xf32, #tpu.memory_space<vmem>>, vector<8x64xf32>
    tpu.vector_store %arg27[%c8_506, %c0_507], %669 {strides = array<i32>} : memref<16x64xf32, #tpu.memory_space<vmem>>, vector<8x64xf32>,
    %c0_508 = arith.constant 0 : index
    %c0_509 = arith.constant 0 : index
    %671 = vector.load %arg27[%c0_508, %c0_509] : memref<16x64xf32, #tpu.memory_space<vmem>>, vector<16x64xf32>
    %672 = arith.addf %405, %671 : vector<16x64xf32>
    %c1_510 = arith.constant 1 : index
    %c0_511 = arith.constant 0 : index
    %c0_512 = arith.constant 0 : index
    %673 = vector.load %arg15[%c1_510, %c0_511, %c0_512] : memref<2x1x64xf32, #tpu.memory_space<vmem>>, vector<1x1x64xf32>
    %674 = vector.shape_cast %673 : vector<1x1x64xf32> to vector<1x64xf32>
    %c1_513 = arith.constant 1 : index
    %c0_514 = arith.constant 0 : index
    %c0_515 = arith.constant 0 : index
    %675 = vector.load %arg16[%c1_513, %c0_514, %c0_515] : memref<2x1x64xf32, #tpu.memory_space<vmem>>, vector<1x1x64xf32>
    %676 = vector.shape_cast %675 : vector<1x1x64xf32> to vector<1x64xf32>
    %cst_516 = arith.constant dense<0.000000e+00> : vector<16xf32>
    %677 = vector.multi_reduction <add>, %672, %cst_516 [1] : vector<16x64xf32> to vector<16xf32>
    %678 = vector.shape_cast %677 : vector<16xf32> to vector<16x1xf32>
    %cst_517 = arith.constant 6.400000e+01 : f32
    %679 = vector.broadcast %cst_517 : f32 to vector<16x1xf32>
    %680 = arith.divf %678, %679 : vector<16x1xf32>
    %681 = vector.broadcast %680 : vector<16x1xf32> to vector<16x64xf32>
    %682 = arith.subf %672, %681 : vector<16x64xf32>
    %683 = arith.mulf %682, %682 : vector<16x64xf32>
    %cst_518 = arith.constant dense<0.000000e+00> : vector<16xf32>
    %684 = vector.multi_reduction <add>, %683, %cst_518 [1] : vector<16x64xf32> to vector<16xf32>
    %685 = vector.shape_cast %684 : vector<16xf32> to vector<16x1xf32>
    %cst_519 = arith.constant 6.400000e+01 : f32
    %686 = vector.broadcast %cst_519 : f32 to vector<16x1xf32>
    %687 = arith.divf %685, %686 : vector<16x1xf32>
    %688 = vector.broadcast %680 : vector<16x1xf32> to vector<16x64xf32>
    %689 = arith.subf %672, %688 : vector<16x64xf32>
    %cst_520 = arith.constant 9.99999996E-13 : f32
    %690 = vector.broadcast %cst_520 : f32 to vector<16x1xf32>
    %691 = arith.addf %687, %690 : vector<16x1xf32>
    %692 = math.rsqrt %691 : vector<16x1xf32>
    %693 = vector.broadcast %692 : vector<16x1xf32> to vector<16x64xf32>
    %694 = arith.mulf %689, %693 : vector<16x64xf32>
    %695 = vector.broadcast %674 : vector<1x64xf32> to vector<16x64xf32>
    %696 = arith.mulf %694, %695 : vector<16x64xf32>
    %697 = vector.broadcast %676 : vector<1x64xf32> to vector<16x64xf32>
    %698 = arith.addf %696, %697 : vector<16x64xf32>
    %c1_521 = arith.constant 1 : index
    %c0_522 = arith.constant 0 : index
    %c0_523 = arith.constant 0 : index
    %699 = vector.load %arg17[%c1_521, %c0_522, %c0_523] : memref<2x64x128xf32, #tpu.memory_space<vmem>>, vector<1x64x128xf32>
    %700 = vector.shape_cast %699 : vector<1x64x128xf32> to vector<64x128xf32>
    %cst_524 = arith.constant dense<0.000000e+00> : vector<16x128xf32>
    %701 = tpu.matmul %698, %700, %cst_524 {dimension_numbers = #tpu.dot_dimension_numbers<[1], [0], [0], [1], [0, 0, 1, 1], [], []>} : vector<16x64xf32>, vector<64x128xf32>, vector<16x128xf32> -> vector<16x128xf32>
    %c1_525 = arith.constant 1 : index
    %c0_526 = arith.constant 0 : index
    %c0_527 = arith.constant 0 : index
    %702 = vector.load %arg18[%c1_525, %c0_526, %c0_527] : memref<2x1x128xf32, #tpu.memory_space<vmem>>, vector<1x1x128xf32>
    %703 = vector.shape_cast %702 : vector<1x1x128xf32> to vector<1x128xf32>
    %704 = vector.broadcast %703 : vector<1x128xf32> to vector<16x128xf32>
    %705 = arith.addf %701, %704 : vector<16x128xf32>
    %cst_528 = arith.constant 5.000000e-01 : f32
    %706 = vector.broadcast %cst_528 : f32 to vector<16x128xf32>
    %707 = arith.mulf %706, %705 : vector<16x128xf32>
    %cst_529 = arith.constant 4.471500e-02 : f32
    %708 = vector.broadcast %cst_529 : f32 to vector<16x128xf32>
    %709 = arith.mulf %708, %705 : vector<16x128xf32>
    %710 = arith.mulf %709, %705 : vector<16x128xf32>
    %711 = arith.mulf %710, %705 : vector<16x128xf32>
    %712 = arith.addf %705, %711 : vector<16x128xf32>
    %cst_530 = arith.constant 0.797884583 : f32
    %713 = vector.broadcast %cst_530 : f32 to vector<16x128xf32>
    %714 = arith.mulf %713, %712 : vector<16x128xf32>
    %715 = math.tanh %714 : vector<16x128xf32>
    %cst_531 = arith.constant 1.000000e+00 : f32
    %716 = vector.broadcast %cst_531 : f32 to vector<16x128xf32>
    %717 = arith.addf %716, %715 : vector<16x128xf32>
    %718 = arith.mulf %707, %717 : vector<16x128xf32>
    %c1_532 = arith.constant 1 : index
    %c0_533 = arith.constant 0 : index
    %c0_534 = arith.constant 0 : index
    %719 = vector.load %arg19[%c1_532, %c0_533, %c0_534] : memref<2x128x64xf32, #tpu.memory_space<vmem>>, vector<1x128x64xf32>
    %720 = vector.shape_cast %719 : vector<1x128x64xf32> to vector<128x64xf32>
    %cst_535 = arith.constant dense<0.000000e+00> : vector<16x64xf32>
    %721 = tpu.matmul %718, %720, %cst_535 {dimension_numbers = #tpu.dot_dimension_numbers<[1], [0], [0], [1], [0, 0, 1, 1], [], []>} : vector<16x128xf32>, vector<128x64xf32>, vector<16x64xf32> -> vector<16x64xf32>
    %c1_536 = arith.constant 1 : index
    %c0_537 = arith.constant 0 : index
    %c0_538 = arith.constant 0 : index
    %722 = vector.load %arg20[%c1_536, %c0_537, %c0_538] : memref<2x1x64xf32, #tpu.memory_space<vmem>>, vector<1x1x64xf32>
    %723 = vector.shape_cast %722 : vector<1x1x64xf32> to vector<1x64xf32>
    %724 = vector.broadcast %723 : vector<1x64xf32> to vector<16x64xf32>
    %725 = arith.addf %721, %724 : vector<16x64xf32>
    %726 = arith.addf %698, %725 : vector<16x64xf32>
    %c1_539 = arith.constant 1 : index
    %c0_540 = arith.constant 0 : index
    %c0_541 = arith.constant 0 : index
    %727 = vector.load %arg21[%c1_539, %c0_540, %c0_541] : memref<2x1x64xf32, #tpu.memory_space<vmem>>, vector<1x1x64xf32>
    %728 = vector.shape_cast %727 : vector<1x1x64xf32> to vector<1x64xf32>
    %c1_542 = arith.constant 1 : index
    %c0_543 = arith.constant 0 : index
    %c0_544 = arith.constant 0 : index
    %729 = vector.load %arg22[%c1_542, %c0_543, %c0_544] : memref<2x1x64xf32, #tpu.memory_space<vmem>>, vector<1x1x64xf32>
    %730 = vector.shape_cast %729 : vector<1x1x64xf32> to vector<1x64xf32>
    %cst_545 = arith.constant dense<0.000000e+00> : vector<16xf32>
    %731 = vector.multi_reduction <add>, %726, %cst_545 [1] : vector<16x64xf32> to vector<16xf32>
    %732 = vector.shape_cast %731 : vector<16xf32> to vector<16x1xf32>
    %cst_546 = arith.constant 6.400000e+01 : f32
    %733 = vector.broadcast %cst_546 : f32 to vector<16x1xf32>
    %734 = arith.divf %732, %733 : vector<16x1xf32>
    %735 = vector.broadcast %734 : vector<16x1xf32> to vector<16x64xf32>
    %736 = arith.subf %726, %735 : vector<16x64xf32>
    %737 = arith.mulf %736, %736 : vector<16x64xf32>
    %cst_547 = arith.constant dense<0.000000e+00> : vector<16xf32>
    %738 = vector.multi_reduction <add>, %737, %cst_547 [1] : vector<16x64xf32> to vector<16xf32>
    %739 = vector.shape_cast %738 : vector<16xf32> to vector<16x1xf32>
    %cst_548 = arith.constant 6.400000e+01 : f32
    %740 = vector.broadcast %cst_548 : f32 to vector<16x1xf32>
    %741 = arith.divf %739, %740 : vector<16x1xf32>
    %742 = vector.broadcast %734 : vector<16x1xf32> to vector<16x64xf32>
    %743 = arith.subf %726, %742 : vector<16x64xf32>
    %cst_549 = arith.constant 9.99999996E-13 : f32
    %744 = vector.broadcast %cst_549 : f32 to vector<16x1xf32>
    %745 = arith.addf %741, %744 : vector<16x1xf32>
    %746 = math.rsqrt %745 : vector<16x1xf32>
    %747 = vector.broadcast %746 : vector<16x1xf32> to vector<16x64xf32>
    %748 = arith.mulf %743, %747 : vector<16x64xf32>
    %749 = vector.broadcast %728 : vector<1x64xf32> to vector<16x64xf32>
    %750 = arith.mulf %748, %749 : vector<16x64xf32>
    %751 = vector.broadcast %730 : vector<1x64xf32> to vector<16x64xf32>
    %752 = arith.addf %750, %751 : vector<16x64xf32>
    %c0_550 = arith.constant 0 : index
    %c0_551 = arith.constant 0 : index
    %753 = vector.load %arg23[%c0_550, %c0_551] : memref<64x8xf32, #tpu.memory_space<vmem>>, vector<64x8xf32>
    %cst_552 = arith.constant dense<0.000000e+00> : vector<16x8xf32>
    %754 = tpu.matmul %752, %753, %cst_552 {dimension_numbers = #tpu.dot_dimension_numbers<[1], [0], [0], [1], [0, 0, 1, 1], [], []>} : vector<16x64xf32>, vector<64x8xf32>, vector<16x8xf32> -> vector<16x8xf32>
    %c0_553 = arith.constant 0 : index
    %c0_554 = arith.constant 0 : index
    %755 = vector.load %arg24[%c0_553, %c0_554] : memref<1x8xf32, #tpu.memory_space<vmem>>, vector<1x8xf32>
    %756 = vector.broadcast %755 : vector<1x8xf32> to vector<16x8xf32>
    %757 = arith.addf %754, %756 : vector<16x8xf32>
    %c0_555 = arith.constant 0 : index
    %c0_556 = arith.constant 0 : index
    %758 = vector.load %arg1[%c0_555, %c0_556] : memref<16x1xi32, #tpu.memory_space<vmem>>, vector<16x1xi32>
    %759 = tpu.iota {dimensions = array<i32: 1>} : vector<16x8xi32>
    %cst_557 = arith.constant dense<0xFF800000> : vector<16xf32>
    %760 = vector.multi_reduction <maximumf>, %757, %cst_557 [1] : vector<16x8xf32> to vector<16xf32>
    %761 = vector.shape_cast %760 : vector<16xf32> to vector<16x1xf32>
    %762 = vector.broadcast %761 : vector<16x1xf32> to vector<16x8xf32>
    %763 = arith.cmpf oeq, %757, %762 : vector<16x8xf32>
    %c8_i32_558 = arith.constant 8 : i32
    %764 = vector.broadcast %c8_i32_558 : i32 to vector<16x8xi32>
    %765 = arith.select %763, %759, %764 : vector<16x8xi1>, vector<16x8xi32>
    %cst_559 = arith.constant dense<2147483647> : vector<16xi32>
    %766 = vector.multi_reduction <minsi>, %765, %cst_559 [1] : vector<16x8xi32> to vector<16xi32>
    %767 = vector.shape_cast %766 : vector<16xi32> to vector<16x1xi32>
    %768 = vector.shape_cast %767 : vector<16x1xi32> to vector<16x1xi32>
    %769 = vector.broadcast %768 : vector<16x1xi32> to vector<16x128xi32>
    %c0_560 = arith.constant 0 : index
    %c0_561 = arith.constant 0 : index
    %770 = vector.load %arg26[%c0_560, %c0_561] : memref<16x128xi32, #tpu.memory_space<vmem>>, vector<16x128xi32>
    tpu.vector_store %arg26[%c0_560, %c0_561], %769 {strides = array<i32>} : memref<16x128xi32, #tpu.memory_space<vmem>>, vector<16x128xi32>,
    %771 = vector.broadcast %761 : vector<16x1xf32> to vector<16x8xf32>
    %772 = arith.subf %757, %771 : vector<16x8xf32>
    %773 = math.exp %772 : vector<16x8xf32>
    %cst_562 = arith.constant dense<0.000000e+00> : vector<16xf32>
    %774 = vector.multi_reduction <add>, %773, %cst_562 [1] : vector<16x8xf32> to vector<16xf32>
    %775 = vector.shape_cast %774 : vector<16xf32> to vector<16x1xf32>
    %776 = math.log %775 : vector<16x1xf32>
    %777 = arith.addf %761, %776 : vector<16x1xf32>
    %778 = vector.broadcast %758 : vector<16x1xi32> to vector<16x8xi32>
    %779 = arith.cmpi eq, %759, %778 : vector<16x8xi32>
    %780 = arith.extui %779 : vector<16x8xi1> to vector<16x8xi32>
    %781 = arith.sitofp %780 : vector<16x8xi32> to vector<16x8xf32>
    %782 = arith.mulf %757, %781 : vector<16x8xf32>
    %cst_563 = arith.constant dense<0.000000e+00> : vector<16xf32>
    %783 = vector.multi_reduction <add>, %782, %cst_563 [1] : vector<16x8xf32> to vector<16xf32>
    %784 = vector.shape_cast %783 : vector<16xf32> to vector<16x1xf32>
    %785 = arith.subf %777, %784 : vector<16x1xf32>
    %c0_i32_564 = arith.constant 0 : i32
    %786 = vector.broadcast %c0_i32_564 : i32 to vector<16x1xi32>
    %787 = arith.cmpi ne, %758, %786 : vector<16x1xi32>
    %788 = arith.extui %787 : vector<16x1xi1> to vector<16x1xi32>
    %789 = arith.sitofp %788 : vector<16x1xi32> to vector<16x1xf32>
    %790 = arith.mulf %785, %789 : vector<16x1xf32>
    %791 = vector.shape_cast %790 : vector<16x1xf32> to vector<1x16x1xf32>
    %cst_565 = arith.constant dense<0.000000e+00> : vector<1xf32>
    %792 = vector.multi_reduction <add>, %791, %cst_565 [1, 2] : vector<1x16x1xf32> to vector<1xf32>
    %793 = vector.shape_cast %792 : vector<1xf32> to vector<1x1x1xf32>
    %794 = vector.extract %793[0, 0, 0] : f32 from vector<1x1x1xf32>
    %795 = vector.shape_cast %789 : vector<16x1xf32> to vector<1x16x1xf32>
    %cst_566 = arith.constant dense<0.000000e+00> : vector<1xf32>
    %796 = vector.multi_reduction <add>, %795, %cst_566 [1, 2] : vector<1x16x1xf32> to vector<1xf32>
    %797 = vector.shape_cast %796 : vector<1xf32> to vector<1x1x1xf32>
    %798 = vector.extract %797[0, 0, 0] : f32 from vector<1x1x1xf32>
    %799 = arith.divf %794, %798 : f32
    %c0_567 = arith.constant 0 : index
    %c0_568 = arith.constant 0 : index
    %800 = memref.load %arg25[%c0_567, %c0_568] : memref<1x1xf32, #tpu.memory_space<smem>>
    memref.store %799, %arg25[%c0_567, %c0_568] : memref<1x1xf32, #tpu.memory_space<smem>>
    return
  }
}

</mosaic_0001>

<bundles_post_ra>
// kernel: squeeze.3
= control target key start
LH: loop header
LB: loop body
LE: loop exit
PB: predicated region body
PF: predicated region fallthrough
CT: control target
= control target key end

     0   :  { %s85_s0 = inlined_call_operand.vmem [shape: s32[16], index: 0, kind: input, shape index: {}]   ;;  %s86_s1 = inlined_call_operand.hbm [shape: s32[2,8], index: 1, kind: output, shape index: {}]  }
   0x1   :  { %v5_v0 = vld [vmem:[%s85_s0] sm:$0x1] }
   0x2   :  { %2 = vsyncpa [#allocation1], 0  ;;  %6 = vst [vmem:[#allocation3] sm:$0x1] %v5_v0  ;;  %vm8_vm0 = vcmask 64512   ;;  %s58_s0 = smov 120  }
   0x3   :  { %s59_s8 = smov [#allocation0]  }
   0x4   :  { %s26_s9 = sshll.u32 %s59_s8, 4  ;;  %s27_s9 = int_to_ptr.vmem [resolvable:$true] %s26_s9 }
   0x5   :  { %s34_s10 = scalar_lea.vmem %s27_s9, 32  ;;  %p39_p1 = scmp.lt.s32.totalorder %s27_s9, %s27_s9 }
   0x6   :  { %p35_p0 = scmp.ne.s32.totalorder %s27_s9, %s34_s10  ;;  %p40_p2 = scmp.lt.s32.totalorder %s34_s10, %s34_s10 }
   0x8   :  { %p41_p3 = por %p40_p2, %p39_p1 }
   0x9   :  { %v10_v1 = vld [vmem:[#allocation3] sm:$0x1]  }
   0xa   :  { %v7_v2 = vld [vmem:[#allocation3] sm:$0x1]   ;;  %11 = vrot.lane.b32.xlu0 %v10_v1, %s58_s0  ;;  %p42_p4 = pnand %p41_p3, %p35_p0 }
   0xb   :  { %9 = vst.msk [vmem:[#allocation2] sm:$0x1] %vm8_vm0, %v7_v2  }
  0x7c   :  { %v12_v3 = vpop.permute.xlu0 %11  }
  0x7d   :  { %15 = vst.msk [vmem:[#allocation2 + $0x1] sm:$0x1] %vm8_vm0, %v12_v3  }
  0x84   :  { %v19_v4 = vld [vmem:[#allocation2] sm:$0x3] }
  0x85   :  { %21 = vst [vmem:[#allocation0] sm:$0x3] %v19_v4 }
  0x86   :  { %45 = shalt.err (!%p42_p4)
}
  0x87   :  { %s46_s13 = scalar_lea.hbm %s86_s1, 32 }
  0x88   :  { %p47_p5 = scmp.ne.s32.totalorder %s86_s1, %s46_s13  ;;  %p50_p6 = scmp.lt.u32.totalorder %s46_s13, %s86_s1 }
  0x8a   :  { %p52_p7 = pnand %p50_p6, %p47_p5 }
  0x8c   :  { %55 = shalt.err (!%p52_p7)
}
  0x8d   :  { %29 = dma.vmem_to_hbm [thread:$0]  %s27_s9, 32, %s86_s1, [#allocation1]  }
  0x8e   :  { %56 = dma.done.wait [#allocation1], 32  }
  0x8f   :  { %57 = vsyncadd [#allocation1], 4294967264 }
  0x90   :  { %31 = vsyncpa [#allocation1], 1 }

// kernel: bert_punctuator_forward.1
= control target key start
LH: loop header
LB: loop body
LE: loop exit
PB: predicated region body
PF: predicated region fallthrough
CT: control target
= control target key end

     0   :  { %s11256_s0 = inlined_call_operand.vmem [shape: s32[16,1], index: 0, kind: input, shape index: {}]   ;;  %s11257_s1 = inlined_call_operand.vmem [shape: s32[16,1], index: 1, kind: input, shape index: {}]   ;;  %s11258_s2 = inlined_call_operand.vmem [shape: f32[32,64], index: 2, kind: input, shape index: {}]   ;;  %s11259_s3 = inlined_call_operand.vmem [shape: f32[16,64], index: 3, kind: input, shape index: {}]   ;;  %s11260_s4 = inlined_call_operand.vmem [shape: f32[2,64], index: 4, kind: input, shape index: {}]   ;;  %s11261_s5 = inlined_call_operand.vmem [shape: f32[1,64], index: 5, kind: input, shape index: {}]   ;;  %s11262_s6 = inlined_call_operand.vmem [shape: f32[1,64], index: 6, kind: input, shape index: {}]   ;;  %s11263_s7 = inlined_call_operand.vmem [shape: f32[2,4,64,16], index: 7, kind: input, shape index: {}]   ;;  %s11264_s8 = inlined_call_operand.vmem [shape: f32[2,4,1,16], index: 8, kind: input, shape index: {}]   ;;  %s11265_s9 = inlined_call_operand.vmem [shape: f32[2,4,64,16], index: 9, kind: input, shape index: {}]   ;;  %s11266_s10 = inlined_call_operand.vmem [shape: f32[2,4,1,16], index: 10, kind: input, shape index: {}]   ;;  %s11267_s11 = inlined_call_operand.vmem [shape: f32[2,4,64,16], index: 11, kind: input, shape index: {}]   ;;  %s11268_s12 = inlined_call_operand.vmem [shape: f32[2,4,1,16], index: 12, kind: input, shape index: {}]   ;;  %s11269_s13 = inlined_call_operand.vmem [shape: f32[2,4,16,64], index: 13, kind: input, shape index: {}]   ;;  %s11270_s14 = inlined_call_operand.vmem [shape: f32[2,1,64], index: 14, kind: input, shape index: {}]   ;;  %s11271_s15 = inlined_call_operand.vmem [shape: f32[2,1,64], index: 15, kind: input, shape index: {}]   ;;  %s11272_s16 = inlined_call_operand.vmem [shape: f32[2,1,64], index: 16, kind: input, shape index: {}]   ;;  %s11273_s17 = inlined_call_operand.vmem [shape: f32[2,64,128], index: 17, kind: input, shape index: {}]   ;;  %s11274_s18 = inlined_call_operand.vmem [shape: f32[2,1,128], index: 18, kind: input, shape index: {}]   ;;  %s11275_s19 = inlined_call_operand.vmem [shape: f32[2,128,64], index: 19, kind: input, shape index: {}]   ;;  %s11276_s20 = inlined_call_operand.vmem [shape: f32[2,1,64], index: 20, kind: input, shape index: {}]   ;;  %s11277_s21 = inlined_call_operand.vmem [shape: f32[2,1,64], index: 21, kind: input, shape index: {}]   ;;  %s11278_s22 = inlined_call_operand.vmem [shape: f32[2,1,64], index: 22, kind: input, shape index: {}]   ;;  %s11279_s23 = inlined_call_operand.vmem [shape: f32[64,8], index: 23, kind: input, shape index: {}]   ;;  %s11280_s24 = inlined_call_operand.vmem [shape: f32[1,8], index: 24, kind: input, shape index: {}]   ;;  %s11281_s25 = inlined_call_operand.hbm [shape: f32[1,1], index: 25, kind: output, shape index: {0}]   ;;  %s11282_s26 = inlined_call_operand.vmem [shape: s32[16,128], index: 26, kind: output, shape index: {1}]  }
   0x1   :  { %11292 = sst [smem:[#allocation6_spill]] %s11256_s0 }
   0x2   :  { %11293 = sst [smem:[#allocation7_spill]] %s11257_s1 }
   0x3   :  { %11294 = sst [smem:[#allocation8_spill]] %s11258_s2 }
   0x4   :  { %11295 = sst [smem:[#allocation9_spill]] %s11259_s3 }
   0x5   :  { %11296 = sst [smem:[#allocation10_spill]] %s11260_s4 }
   0x6   :  { %11297 = sst [smem:[#allocation11_spill]] %s11261_s5 }
   0x7   :  { %11298 = sst [smem:[#allocation12_spill]] %s11262_s6 }
   0x8   :  { %11299 = sst [smem:[#allocation13_spill]] %s11263_s7 }
   0x9   :  { %11300 = sst [smem:[#allocation14_spill]] %s11264_s8 }
   0xa   :  { %11301 = sst [smem:[#allocation15_spill]] %s11265_s9 }
   0xb   :  { %11302 = sst [smem:[#allocation16_spill]] %s11266_s10 }
   0xc   :  { %11303 = sst [smem:[#allocation17_spill]] %s11277_s21 }
   0xd   :  { %s11304_s7 = sld [smem:[#allocation6_spill]]  ;;  %s11305_s21 = sld [smem:[#allocation9_spill]]  ;;  %v85_v2 = vlaneseq  ;;  %v9682_v3 = vmov 0  }
   0xe   :  { %9566 = vset.pattern.permute.xlu0 %v9682_v3  ;;  %s11306_s30 = sld [smem:[#allocation8_spill]]  ;;  %9567 = vset.pattern.permute.xlu1 %v9682_v3 }
   0xf   :  { %v9837_v8 = vand.u32 127, %v85_v2  ;;  %v104_v9 = vshrl.u32 %v85_v2, 7 }
  0x13   :  { %v83_v0 = vld [vmem:[%s11304_s7] sm:$0xff]  ;;  %v137_v4 = vld [vmem:[%s11305_s21 + $0x8] sm:$0xff] }
  0x14   :  { %v136_v1 = vld [vmem:[%s11305_s21] sm:$0xff]  ;;  %v100_v6 = vld [vmem:[%s11306_s30 + $0x8] sm:$0xff]  ;;  %88 = vperm.xlu0 %9566, %v83_v0  }
  0x15   :  { %v99_v5 = vld [vmem:[%s11306_s30] sm:$0xff]  ;;  %v8997_v7 = vpack.c.bf16 %v137_v4, %v136_v1 }
  0x16   :  { %v9001_v10 = vpack.c.bf16 %v100_v6, %v99_v5 }
  0x17   :  { %32 = vsyncpa [#allocation4], 0  ;;  %v84_v11 = vld [vmem:[%s11304_s7 + $0x8] sm:$0xff]  ;;  %8998 = vmatprep.subr.bf16.mxu0 %v8997_v7  ;;  %v110_v12 = vand.u32 7, %v104_v9  ;;  %v105_v13 = vadd.s32 8, %v104_v9  ;;  %vm138_vm0 = vcmask 130048  }
  0x18   :  { %9000 = vmatpush3.bf16.msra.mxu0 %v8997_v7  ;;  %v101_v14 = vld [vmem:[%s11306_s30 + $0x10] sm:$0xff]  ;;  %v102_v15 = vld [vmem:[%s11306_s30 + $0x18] sm:$0xff]  ;;  %91 = vperm.xlu0 %9566, %v84_v11   ;;  %v9683_v17 = vmov 0.0   ;;  %vm221_vm3 = vcmask 261120   ;;  %s11307_s8 = sld [smem:[#allocation10_spill]]  ;;  %vm311_vm6 = vcmask 523264  }
  0x19   :  { %vm130_vm1 = vcmp.eq.s32.totalorder %v9837_v8, %v110_v12  ;;  %v117_v16 = vand.u32 7, %v105_v13  ;;  %9002 = vmatprep.subr.bf16.mxu0 %v9001_v10  ;;  %v9005_v19 = vpack.c.bf16 %v102_v15, %v101_v14  ;;  %s11308_s0 = sld [smem:[#allocation13_spill]]  ;;  %s11309_s10 = sld [smem:[#allocation15_spill]]  ;;  %v550_v2 = vld [vmem:[%s11267_s11] sm:$0xff]  ;;  %v551_v3 = vld [vmem:[%s11267_s11 + $0x8] sm:$0xff]  ;;  %vm9684_vm7 = vmmov 0  }
  0x1a   :  { %v7278_v18 = vsel %vm130_vm1, 1.0, %v9683_v17  ;;  %v9041_v4 = vpack.c.bf16 %v551_v3, %v550_v2  ;;  %s11310_s3 = sld [smem:[#allocation11_spill]]  ;;  %s11312_s4 = sld [smem:[#allocation14_spill]]  ;;  %vm717_vm8 = vcmask 64512   ;;  %vm7228_vm14 = vcmask 7168  }
  0x1b   :  { %8128 = vmatprep.mubr.msk.f32.mxu0 %vm138_vm0, %v7278_v18  ;;  %vm131_vm2 = vcmp.eq.s32.totalorder %v9837_v8, %v117_v16  ;;  %s11313_s30 = sld [smem:[#allocation16_spill]] }
  0x1c   :  { %v7279_v20 = vsel %vm131_vm2, 1.0, %v9683_v17 }
  0x1d   :  { %8129 = vmatmul.mubr.msk.f32.vlgmr.msra.gmra.mrb[0].mxu0 %vm138_vm0, %v7279_v20 }
  0x1e   :  { %9004 = vmatpush3.bf16.msra.mxu0 %v9001_v10  ;;  %v7284_v25 = vld [vmem:[%s11307_s8] ss:$0 sm:$0xff]  ;;  %s11311_s8 = sld [smem:[#allocation12_spill]] }
  0x1f   :  { %9006 = vmatprep.subr.bf16.mxu0 %v9005_v19  ;;  %v364_v42 = vld [vmem:[%s11308_s0] sm:$0xff]  ;;  %v365_v43 = vld [vmem:[%s11308_s0 + $0x8] sm:$0xff]  ;;  %v366_v48 = vld [vmem:[%s11308_s0 + $0x10] sm:$0xff] }
  0x20   :  { %v9009_v44 = vpack.c.bf16 %v365_v43, %v364_v42  ;;  %v460_v45 = vld [vmem:[%s11309_s10] sm:$0xff]  ;;  %v461_v46 = vld [vmem:[%s11309_s10 + $0x8] sm:$0xff]  ;;  %v367_v49 = vld [vmem:[%s11308_s0 + $0x18] sm:$0xff] }
  0x21   :  { %v9025_v47 = vpack.c.bf16 %v461_v46, %v460_v45  ;;  %v9013_v50 = vpack.c.bf16 %v367_v49, %v366_v48  ;;  %v462_v51 = vld [vmem:[%s11309_s10 + $0x10] sm:$0xff]  ;;  %v463_v52 = vld [vmem:[%s11309_s10 + $0x18] sm:$0xff]  ;;  %v368_v54 = vld [vmem:[%s11308_s0 + $0x20] sm:$0xff] }
  0x22   :  { %9008 = vmatpush3.bf16.msra.mxu0 %v9005_v19  ;;  %9010 = vmatprep.subr.bf16.mxu1 %v9009_v44  ;;  %v9029_v53 = vpack.c.bf16 %v463_v52, %v462_v51  ;;  %v369_v55 = vld [vmem:[%s11308_s0 + $0x28] sm:$0xff]  ;;  %v464_v57 = vld [vmem:[%s11309_s10 + $0x20] sm:$0xff]  ;;  %v370_v60 = vld [vmem:[%s11308_s0 + $0x30] sm:$0xff] }
  0x23   :  { %9012 = vmatpush3.bf16.msra.mxu1 %v9009_v44  ;;  %9026 = vmatprep.subr.bf16.mxu0 %v9025_v47  ;;  %v9017_v56 = vpack.c.bf16 %v369_v55, %v368_v54  ;;  %v465_v58 = vld [vmem:[%s11309_s10 + $0x28] sm:$0xff]  ;;  %v371_v61 = vld [vmem:[%s11308_s0 + $0x38] sm:$0xff]  ;;  %v466_v63 = vld [vmem:[%s11309_s10 + $0x30] sm:$0xff] }
  0x24   :  { %9014 = vmatprep.subr.bf16.mxu1 %v9013_v50  ;;  %v9033_v59 = vpack.c.bf16 %v465_v58, %v464_v57  ;;  %v9021_v62 = vpack.c.bf16 %v371_v61, %v370_v60  ;;  %v467_v0 = vld [vmem:[%s11309_s10 + $0x38] sm:$0xff]  ;;  %v7285_v13 = vld [vmem:[%s11310_s3] ss:$0 sm:$0xff]  ;;  %v804_v57 = vld [vmem:[%s11269_s13 + $0x8] sm:$0xff]  ;;  %v9685_v58 = vmov 0.0|0.0   ;;  %s11314_s3 = sld [smem:[#allocation17_spill]] }
  0x25   :  { %v9037_v1 = vpack.c.bf16 %v467_v0, %v466_v63  ;;  %v7286_v15 = vld [vmem:[%s11311_s8] ss:$0 sm:$0xff]  ;;  %s11315_s8 = sld [smem:[#allocation7_spill]] }
  0x26   :  { %v7294_v42 = vld [vmem:[%s11268_s12] ss:$0 sm:$0xff] }
  0x27   :  { %9016 = vmatpush3.bf16.msra.mxu1 %v9013_v50 }
  0x28   :  { %9018 = vmatprep.subr.bf16.mxu1 %v9017_v56 }
  0x2b   :  { %9020 = vmatpush3.bf16.msra.mxu1 %v9017_v56  ;;  %v803_v56 = vld [vmem:[%s11269_s13] sm:$0xff] }
  0x2c   :  { %9022 = vmatprep.subr.bf16.mxu1 %v9021_v62 }
  0x2f   :  { %9024 = vmatpush3.bf16.msra.mxu1 %v9021_v62 }
  0x30   :  { %9042 = vmatprep.subr.bf16.mxu1 %v9041_v4 }
  0x93   :  { %v89_v21 = vpop.permute.xlu0 %88 }
  0x94   :  { %vm93_vm4 = vcmp.eq.s32.totalorder %v9837_v8, %v89_v21  ;;  %v552_v21 = vld [vmem:[%s11267_s11 + $0x10] sm:$0xff] }
  0x95   :  { %v7276_v22 = vsel %vm93_vm4, 1.0, %v9683_v17 }
  0x96   :  { %8139 = vmatprep.mubr.msk.f32.mxu0 %vm221_vm3, %v7276_v22  ;;  %v553_v22 = vld [vmem:[%s11267_s11 + $0x18] sm:$0xff] }
  0x97   :  { %v92_v23 = vpop.permute.xlu0 %91 }
  0x98   :  { %vm94_vm5 = vcmp.eq.s32.totalorder %v9837_v8, %v92_v23 }
  0x99   :  { %v7277_v24 = vsel %vm94_vm5, 1.0, %v9683_v17 }
  0x9a   :  { %8140 = vmatmul.mubr.msk.f32.vlgmr.msra.gmra.mrb[0].mxu0 %vm221_vm3, %v7277_v24 }
  0x9b   :  { %9028 = vmatpush3.bf16.msra.mxu0 %v9025_v47 }
  0x9c   :  { %9030 = vmatprep.subr.bf16.mxu0 %v9029_v53 }
  0x9f   :  { %9032 = vmatpush3.bf16.msra.mxu0 %v9029_v53 }
  0xa0   :  { %9034 = vmatprep.subr.bf16.mxu0 %v9033_v59 }
  0xa3   :  { %9036 = vmatpush3.bf16.msra.mxu0 %v9033_v59  ;;  %v9058_v59 = vpack.c.bf16 %v804_v57, %v803_v56  ;;  %v7323_v57 = vld [vmem:[%s11309_s10 + $0x70] sm:$0xff] }
  0xa4   :  { %9038 = vmatprep.subr.bf16.mxu0 %v9037_v1 }
  0xa7   :  { %9040 = vmatpush3.bf16.msra.mxu0 %v9037_v1 }
  0xa8   :  { %8199 = vmatprep.subr.mxu0 %v9683_v17 }
 0x16d   :  { %v8141_v26 = vpop.f32.mrb[0].mxu0 }
 0x16e   :  { %v294_v27 = vpop.f32.mrb[1].mxu0  ;;  %v308_v29 = vadd.f32 %v8141_v26, %v7284_v25  ;;  %v554_v26 = vld [vmem:[%s11267_s11 + $0x20] sm:$0xff] }
 0x16f   :  { %v307_v28 = vadd.f32 %v7284_v25, %v294_v27  ;;  %v9045_v25 = vpack.c.bf16 %v553_v22, %v552_v21  ;;  %v555_v27 = vld [vmem:[%s11267_s11 + $0x28] sm:$0xff]  ;;  %v7307_v22 = vld [vmem:[%s11308_s0 + $0x50] sm:$0xff] }
 0x170   :  { %v315_v31 = vsel %vm311_vm6, %v308_v29, 0.0 }
 0x171   :  { %v312_v30 = vsel %vm311_vm6, %v307_v28, 0.0 }
 0x172   :  { %313 = vadd.xlane.f32.xlu1 %v312_v30  ;;  %v557_v30 = vld [vmem:[%s11267_s11 + $0x38] sm:$0xff] }
 0x176   :  { %316 = vadd.xlane.f32.xlu1 %v315_v31 }
 0x1ff   :  { %v314_v32 = vpop.xlane.xlu1 %313 }
 0x200   :  { %v319_v33 = vmul.f32 0.015625, %v314_v32  ;;  %v7288_v32 = vld [vmem:[%s11312_s4] ss:$0 sm:$0xff] }
 0x202   :  { %v9863_v34 = vsub.f32 %v307_v28, %v319_v33  ;;  %v9049_v28 = vpack.c.bf16 %v555_v27, %v554_v26  ;;  %v7291_v33 = vld [vmem:[%s11313_s30] ss:$0 sm:$0xff] }
 0x203   :  { %v317_v35 = vpop.xlane.xlu1 %316 }
 0x204   :  { %v320_v36 = vmul.f32 0.015625, %v317_v35  ;;  %v323_v37 = vmul.f32 %v9863_v34, %v9863_v34 }
 0x206   :  { %v9867_v38 = vsub.f32 %v308_v29, %v320_v36  ;;  %v325_v39 = vsel %vm311_vm6, %v323_v37, 0.0  ;;  %v556_v29 = vld [vmem:[%s11267_s11 + $0x30] sm:$0xff] }
 0x207   :  { %326 = vadd.xlane.f32.xlu0 %v325_v39  ;;  %v9053_v31 = vpack.c.bf16 %v557_v30, %v556_v29  ;;  %v7310_v29 = vld [vmem:[%s11308_s0 + $0x68] sm:$0xff] }
 0x208   :  { %v324_v40 = vmul.f32 %v9867_v38, %v9867_v38 }
 0x20a   :  { %v328_v41 = vsel %vm311_vm6, %v324_v40, 0.0 }
 0x20b   :  { %329 = vadd.xlane.f32.xlu1 %v328_v41 }
 0x294   :  { %v327_v5 = vpop.xlane.xlu0 %326 }
 0x295   :  { %v331_v6 = vmul.f32 0.015625, %v327_v5  ;;  %v7287_v5 = vld [vmem:[%s11270_s14] ss:$0 sm:$0xff] }
 0x296   :  { %362 = vst.msk [vmem:[#allocation2] sm:$0xff] %vm311_vm6, %v7287_v5  ;;  %363 = vst.msk [vmem:[#allocation2 + $0x8] sm:$0xff] %vm311_vm6, %v7287_v5 }
 0x297   :  { %v333_v7 = vadd.f32 1e-12, %v331_v6 }
 0x298   :  { %v330_v9 = vpop.xlane.xlu1 %329 }
 0x299   :  { %9568 = vrsqrt.f32 %v333_v7  ;;  %v332_v10 = vmul.f32 0.015625, %v330_v9 }
 0x29b   :  { %v334_v11 = vadd.f32 1e-12, %v332_v10 }
 0x29d   :  { %9570 = vrsqrt.f32 %v334_v11 }
 0x2a3   :  { %v9569_v12 = vpop.eup %9568 }
 0x2a4   :  { %v337_v14 = vmul.f32 %v9569_v12, %v9863_v34  ;;  %v7305_v12 = vld [vmem:[%s11308_s0 + $0x40] sm:$0xff] }
 0x2a6   :  { %v345_v16 = vmul.f32 %v7285_v13, %v337_v14 }
 0x2a7   :  { %v9571_v18 = vpop.eup %9570 }
 0x2a8   :  { %v9935_v19 = vadd.f32 %v7286_v15, %v345_v16  ;;  %v338_v20 = vmul.f32 %v9571_v18, %v9867_v38 }
 0x2aa   :  { %v346_v23 = vmul.f32 %v7285_v13, %v338_v20  ;;  %8158 = vmatprep.mubr.msk.f32.mxu1 %vm311_vm6, %v9935_v19  ;;  %8177 = vmatprep.mubr.msk.f32.mxu0 %vm311_vm6, %v9935_v19  ;;  %v7306_v13 = vld [vmem:[%s11308_s0 + $0x48] sm:$0xff] }
 0x2ab   :  { %v9063_v14 = vpack.c.bf16 %v7306_v13, %v7305_v12 }
 0x2ac   :  { %v9948_v24 = vadd.f32 %v7286_v15, %v346_v23  ;;  %v802_v15 = vld [vmem:[#allocation2] sm:$0xff]  ;;  %v7308_v23 = vld [vmem:[%s11308_s0 + $0x58] sm:$0xff] }
 0x2ad   :  { %v9067_v27 = vpack.c.bf16 %v7308_v23, %v7307_v22 }
 0x2ae   :  { %8159 = vmatmul.mubr.msk.f32.vlgmr.msra.gmra.mrb[0].mxu1 %vm311_vm6, %v9948_v24  ;;  %8178 = vmatmul.mubr.msk.f32.vlgmr.msra.gmra.mrb[2].mxu0 %vm311_vm6, %v9948_v24 }
 0x2af   :  { %9044 = vmatpush3.bf16.msra.mxu1 %v9041_v4  ;;  %8196 = vmatprep.mubr.msk.f32.mxu1 %vm311_vm6, %v9935_v19 }
 0x2b0   :  { %9046 = vmatprep.subr.bf16.mxu1 %v9045_v25  ;;  %8201 = vmatprep.mubr.msk.f32.mxu0 %vm9684_vm7, %v9683_v17 }
 0x2b3   :  { %9048 = vmatpush3.bf16.msra.mxu1 %v9045_v25 }
 0x2b4   :  { %9050 = vmatprep.subr.bf16.mxu1 %v9049_v28 }
 0x2b7   :  { %9052 = vmatpush3.bf16.msra.mxu1 %v9049_v28  ;;  %v7309_v28 = vld [vmem:[%s11308_s0 + $0x60] sm:$0xff] }
 0x2b8   :  { %9054 = vmatprep.subr.bf16.mxu1 %v9053_v31  ;;  %v9071_v30 = vpack.c.bf16 %v7310_v29, %v7309_v28 }
 0x2bb   :  { %9056 = vmatpush3.bf16.msra.mxu1 %v9053_v31  ;;  %v7311_v31 = vld [vmem:[%s11308_s0 + $0x70] sm:$0xff] }
 0x2bc   :  { %9057 = vmatprep.subr.bf16.mxu1 %v9685_v58 }
 0x2be   :  { %8197 = vmatmul.mubr.msk.f32.vlgmr.msra.gmra.mrb[2].mxu1 %vm311_vm6, %v9948_v24 }
 0x2bf   :  { %8213 = vmatprep.mubr.msk.f32.mxu1 %vm9684_vm7, %v9683_v17  ;;  %9059 = vmatpush3.bf16.msra.mxu1 %v9058_v59 }
 0x2c0   :  { %8221 = vmatprep.subr.mxu1 %v9683_v17 }
 0x381   :  { %v8160_v34 = vpop.f32.mrb[0].mxu1  ;;  %v8179_v35 = vpop.f32.mrb[2].mxu0 }
 0x382   :  { %v457_v36 = vadd.f32 %v8160_v34, %v7288_v32  ;;  %v547_v37 = vadd.f32 %v8179_v35, %v7291_v33  ;;  %v451_v38 = vpop.f32.mrb[1].mxu1  ;;  %v541_v39 = vpop.f32.mrb[3].mxu0  ;;  %v7329_v34 = vld [vmem:[%s11267_s11 + $0x40] sm:$0xff]  ;;  %v7330_v35 = vld [vmem:[%s11267_s11 + $0x48] sm:$0xff] }
 0x383   :  { %v542_v40 = vadd.f32 %v7291_v33, %v541_v39  ;;  %v452_v41 = vadd.f32 %v7288_v32, %v451_v38  ;;  %v7312_v32 = vld [vmem:[%s11308_s0 + $0x78] sm:$0xff] }
 0x384   :  { %v9075_v33 = vpack.c.bf16 %v7312_v32, %v7311_v31  ;;  %v7332_v38 = vld [vmem:[%s11267_s11 + $0x58] sm:$0xff] }
 0x385   :  { %8200 = vmatpush3.xpose.msk.msra.mxu0 %vm138_vm0, %v542_v40  ;;  %v7333_v40 = vld [vmem:[%s11267_s11 + $0x60] sm:$0xff]  ;;  %v7345_v31 = vld [vmem:[%s11269_s13 + $0x18] sm:$0xff] }
 0x386   :  { %8204 = vmatprep.subr.mxu0 %v9683_v17 }
 0x388   :  { %8202 = vmatmul.mubr.msk.f32.vlgmr.msra.gmra.mrb[4].mxu0 %vm138_vm0, %v452_v41  ;;  %v7334_v41 = vld [vmem:[%s11267_s11 + $0x68] sm:$0xff] }
 0x389   :  { %8206 = vmatprep.mubr.msk.f32.mxu0 %vm9684_vm7, %v9683_v17 }
 0x391   :  { %v8198_v43 = vpop.f32.mrb[2].mxu1 }
 0x392   :  { %v637_v44 = vadd.f32 %v8198_v43, %v7294_v42  ;;  %v631_v45 = vpop.f32.mrb[3].mxu1  ;;  %v7335_v43 = vld [vmem:[%s11267_s11 + $0x70] sm:$0xff] }
 0x393   :  { %v632_v46 = vadd.f32 %v7294_v42, %v631_v45  ;;  %v9103_v42 = vpack.c.bf16 %v7334_v41, %v7333_v40 }
 0x395   :  { %8205 = vmatpush3.msra.mxu0 %v632_v46  ;;  %v7317_v46 = vld [vmem:[%s11309_s10 + $0x40] sm:$0xff] }
 0x396   :  { %8216 = vmatprep.subr.mxu0 %v9683_v17 }
 0x45b   :  { %v712_v47 = vpop.f32.mrb[4].mxu0 }
 0x45c   :  { %v716_v48 = vmul.f32 0.25, %v712_v47  ;;  %v8203_v49 = vpop.f32.mrb[5].mxu0  ;;  %v7318_v47 = vld [vmem:[%s11309_s10 + $0x48] sm:$0xff] }
 0x45d   :  { %v7319_v49 = vld [vmem:[%s11309_s10 + $0x50] sm:$0xff] }
 0x45e   :  { %v718_v50 = vsel %vm717_vm8, %v716_v48, -inf }
 0x45f   :  { %719 = vmax.xlane.f32.xlu1 %v718_v50  ;;  %v7320_v50 = vld [vmem:[%s11309_s10 + $0x58] sm:$0xff] }
 0x4ec   :  { %v720_v51 = vpop.xlane.xlu1 %719 }
 0x4ed   :  { %v721_v52 = vsub.f32 %v716_v48, %v720_v51  ;;  %v9079_v48 = vpack.c.bf16 %v7318_v47, %v7317_v46  ;;  %v9083_v51 = vpack.c.bf16 %v7320_v50, %v7319_v49  ;;  %v7353_v50 = vld [vmem:[%s11308_s0 + $0x80] sm:$0xff] }
 0x4ef   :  { %v722_v53 = vmul.f32 1.442695, %v721_v52 }
 0x4f1   :  { %9572 = vpow2.f32 %v722_v53  ;;  %v7321_v53 = vld [vmem:[%s11309_s10 + $0x60] sm:$0xff] }
 0x4fb   :  { %v9573_v54 = vpop.eup %9572 }
 0x4fc   :  { %v724_v55 = vsel %vm717_vm8, %v9573_v54, 0.0 }
 0x4fd   :  { %725 = vadd.xlane.f32.xlu1 %v724_v55 }
 0x58a   :  { %v726_v60 = vpop.xlane.xlu1 %725 }
 0x58b   :  { %9574 = vrcp.f32 %v726_v60 }
 0x595   :  { %v9575_v61 = vpop.eup %9574 }
 0x596   :  { %v728_v62 = vmul.f32 %v9575_v61, %v9573_v54  ;;  %v7322_v54 = vld [vmem:[%s11309_s10 + $0x68] sm:$0xff]  ;;  %v7314_v61 = vld [vmem:[%s11312_s4 + $0x1] ss:$0 sm:$0xff] }
 0x597   :  { %v9087_v56 = vpack.c.bf16 %v7322_v54, %v7321_v53  ;;  %v7355_v54 = vld [vmem:[%s11308_s0 + $0x90] sm:$0xff] }
 0x598   :  { %8207 = vmatmul.mubr.msk.f32.vlgmr.msra.gmra.mrb[6].mxu0 %vm717_vm8, %v728_v62 }
 0x599   :  { %8217 = vmatpush3.xpose.msk.msra.mxu0 %vm138_vm0, %v547_v37  ;;  %8218 = vmatprep.mubr.msk.f32.mxu0 %vm9684_vm7, %v9683_v17  ;;  %v7331_v37 = vld [vmem:[%s11267_s11 + $0x50] sm:$0xff] }
 0x59a   :  { %9060 = vmatprep.subr.bf16.mxu0 %v9685_v58  ;;  %v9099_v39 = vpack.c.bf16 %v7332_v38, %v7331_v37 }
 0x59c   :  { %8219 = vmatmul.mubr.msk.f32.vlgmr.msra.gmra.mrb[8].mxu0 %vm138_vm0, %v457_v36  ;;  %v9095_v36 = vpack.c.bf16 %v7330_v35, %v7329_v34 }
 0x59d   :  { %9062 = vmatpush3.bf16.msra.mxu0 %v9058_v59  ;;  %8230 = vmatprep.mubr.msk.f32.mxu0 %vm9684_vm7, %v9683_v17  ;;  %v7324_v59 = vld [vmem:[%s11309_s10 + $0x78] sm:$0xff] }
 0x59e   :  { %9080 = vmatprep.subr.bf16.mxu0 %v9079_v48  ;;  %v9091_v60 = vpack.c.bf16 %v7324_v59, %v7323_v57 }
 0x66b   :  { %v798_v63 = vpop.f32.mrb[6].mxu0 }
 0x66c   :  { %v8208_v0 = vpop.f32.mrb[7].mxu0  ;;  %8214 = vmatmul.mubr.msk.f32.vlgmr.msra.gmra.mrb[4].mxu1 %vm138_vm0, %v798_v63 }
 0x66d   :  { %8222 = vmatpush3.msra.mxu1 %v637_v44  ;;  %8223 = vmatprep.mubr.msk.f32.mxu1 %vm9684_vm7, %v9683_v17  ;;  %v7336_v44 = vld [vmem:[%s11267_s11 + $0x78] sm:$0xff] }
 0x66e   :  { %9064 = vmatprep.subr.bf16.mxu1 %v9063_v14  ;;  %v9107_v45 = vpack.c.bf16 %v7336_v44, %v7335_v43 }
 0x66f   :  { %v952_v1 = vpop.f32.mrb[8].mxu0 }
 0x670   :  { %v956_v2 = vmul.f32 0.25, %v952_v1  ;;  %v8220_v3 = vpop.f32.mrb[9].mxu0  ;;  %v7338_v1 = vld [vmem:[%s11268_s12 + $0x1] ss:$0 sm:$0xff] }
 0x672   :  { %v957_v4 = vsel %vm717_vm8, %v956_v2, -inf }
 0x673   :  { %958 = vmax.xlane.f32.xlu1 %v957_v4 }
 0x700   :  { %v959_v6 = vpop.xlane.xlu1 %958 }
 0x701   :  { %v960_v7 = vsub.f32 %v956_v2, %v959_v6  ;;  %v1041_v6 = vld [vmem:[#allocation2 + $0x8] sm:$0xff] }
 0x703   :  { %v961_v9 = vmul.f32 1.442695, %v960_v7 }
 0x705   :  { %9576 = vpow2.f32 %v961_v9 }
 0x70f   :  { %v9577_v10 = vpop.eup %9576 }
 0x710   :  { %v963_v11 = vsel %vm717_vm8, %v9577_v10, 0.0 }
 0x711   :  { %964 = vadd.xlane.f32.xlu1 %v963_v11  ;;  %v7326_v11 = vld [vmem:[%s11313_s30 + $0x1] ss:$0 sm:$0xff] }
 0x73f   :  { %v874_v16 = vpop.f32.mrb[4].mxu1 }
 0x740   :  { %v878_v18 = vadd.f32 %v874_v16, %v802_v15  ;;  %v8215_v20 = vpop.f32.mrb[5].mxu1 }
 0x742   :  { %879 = vst.msk [vmem:[#allocation2] sm:$0xff] %vm311_vm6, %v878_v18 }
 0x749   :  { %v1556_v37 = vld [vmem:[#allocation2] sm:$0xff] }
 0x79e   :  { %v965_v21 = vpop.xlane.xlu1 %964 }
 0x79f   :  { %9578 = vrcp.f32 %v965_v21 }
 0x7a9   :  { %v9579_v25 = vpop.eup %9578 }
 0x7aa   :  { %v967_v26 = vmul.f32 %v9579_v25, %v9577_v10 }
 0x7ac   :  { %8224 = vmatmul.mubr.msk.f32.vlgmr.msra.gmra.mrb[6].mxu1 %vm717_vm8, %v967_v26 }
 0x7ad   :  { %9066 = vmatpush3.bf16.msra.mxu1 %v9063_v14  ;;  %8249 = vmatprep.mubr.msk.f32.mxu1 %vm311_vm6, %v9935_v19 }
 0x7ae   :  { %9068 = vmatprep.subr.bf16.mxu1 %v9067_v27 }
 0x7b1   :  { %9070 = vmatpush3.bf16.msra.mxu1 %v9067_v27 }
 0x7b2   :  { %9072 = vmatprep.subr.bf16.mxu1 %v9071_v30 }
 0x7b5   :  { %9074 = vmatpush3.bf16.msra.mxu1 %v9071_v30  ;;  %v7344_v30 = vld [vmem:[%s11269_s13 + $0x10] sm:$0xff] }
 0x7b6   :  { %9076 = vmatprep.subr.bf16.mxu1 %v9075_v33 }
 0x7b9   :  { %9078 = vmatpush3.bf16.msra.mxu1 %v9075_v33  ;;  %v9112_v33 = vpack.c.bf16 %v7345_v31, %v7344_v30  ;;  %v7372_v30 = vld [vmem:[%s11309_s10 + $0xb8] sm:$0xff] }
 0x7ba   :  { %9096 = vmatprep.subr.bf16.mxu1 %v9095_v36 }
 0x7bc   :  { %8250 = vmatmul.mubr.msk.f32.vlgmr.msra.gmra.mrb[8].mxu1 %vm311_vm6, %v9948_v24 }
 0x7bd   :  { %9098 = vmatpush3.bf16.msra.mxu1 %v9095_v36  ;;  %8287 = vmatprep.mubr.msk.f32.mxu1 %vm311_vm6, %v9935_v19 }
 0x7be   :  { %9100 = vmatprep.subr.bf16.mxu1 %v9099_v39 }
 0x7c1   :  { %9102 = vmatpush3.bf16.msra.mxu1 %v9099_v39 }
 0x7c2   :  { %9104 = vmatprep.subr.bf16.mxu1 %v9103_v42 }
 0x7c5   :  { %9106 = vmatpush3.bf16.msra.mxu1 %v9103_v42 }
 0x7c6   :  { %9108 = vmatprep.subr.bf16.mxu1 %v9107_v45 }
 0x7c9   :  { %9110 = vmatpush3.bf16.msra.mxu1 %v9107_v45 }
 0x7ca   :  { %8312 = vmatprep.subr.mxu1 %v9683_v17 }
 0x7cc   :  { %8288 = vmatmul.mubr.msk.f32.vlgmr.msra.gmra.mrb[10].mxu1 %vm311_vm6, %v9948_v24 }
 0x7cd   :  { %8314 = vmatprep.mubr.msk.f32.mxu1 %vm9684_vm7, %v9683_v17 }
 0x87f   :  { %v1037_v52 = vpop.f32.mrb[6].mxu1 }
 0x880   :  { %v8225_v55 = vpop.f32.mrb[7].mxu1  ;;  %8231 = vmatmul.mubr.msk.f32.vlgmr.msra.gmra.mrb[10].mxu0 %vm138_vm0, %v1037_v52 }
 0x881   :  { %9082 = vmatpush3.bf16.msra.mxu0 %v9079_v48  ;;  %8268 = vmatprep.mubr.msk.f32.mxu0 %vm311_vm6, %v9935_v19  ;;  %v7356_v55 = vld [vmem:[%s11308_s0 + $0x98] sm:$0xff] }
 0x882   :  { %9084 = vmatprep.subr.bf16.mxu0 %v9083_v51  ;;  %v9121_v59 = vpack.c.bf16 %v7356_v55, %v7355_v54 }
 0x885   :  { %9086 = vmatpush3.bf16.msra.mxu0 %v9083_v51  ;;  %v7354_v51 = vld [vmem:[%s11308_s0 + $0x88] sm:$0xff] }
 0x886   :  { %9088 = vmatprep.subr.bf16.mxu0 %v9087_v56  ;;  %v9117_v52 = vpack.c.bf16 %v7354_v51, %v7353_v50 }
 0x889   :  { %9090 = vmatpush3.bf16.msra.mxu0 %v9087_v56 }
 0x88a   :  { %9092 = vmatprep.subr.bf16.mxu0 %v9091_v60 }
 0x88d   :  { %9094 = vmatpush3.bf16.msra.mxu0 %v9091_v60  ;;  %v7357_v60 = vld [vmem:[%s11308_s0 + $0xa0] sm:$0xff] }
 0x88e   :  { %8290 = vmatprep.subr.mxu0 %v9683_v17 }
 0x88f   :  { %v8251_v62 = vpop.f32.mrb[8].mxu1 }
 0x890   :  { %v1208_v63 = vadd.f32 %v8251_v62, %v7314_v61  ;;  %v1202_v0 = vpop.f32.mrb[9].mxu1  ;;  %8269 = vmatmul.mubr.msk.f32.vlgmr.msra.gmra.mrb[12].mxu0 %vm311_vm6, %v9948_v24 }
 0x891   :  { %8292 = vmatprep.mubr.msk.f32.mxu0 %vm9684_vm7, %v9683_v17  ;;  %v1203_v16 = vadd.f32 %v7314_v61, %v1202_v0  ;;  %v7358_v61 = vld [vmem:[%s11308_s0 + $0xa8] sm:$0xff]  ;;  %v7360_v0 = vld [vmem:[%s11308_s0 + $0xb8] sm:$0xff] }
 0x892   :  { %v9125_v62 = vpack.c.bf16 %v7358_v61, %v7357_v60 }
 0x89f   :  { %v8289_v2 = vpop.f32.mrb[10].mxu1 }
 0x8a0   :  { %v1392_v3 = vadd.f32 %v8289_v2, %v7338_v1  ;;  %v1386_v4 = vpop.f32.mrb[11].mxu1  ;;  %v7377_v2 = vld [vmem:[%s11267_s11 + $0x80] sm:$0xff] }
 0x8a1   :  { %v1387_v5 = vadd.f32 %v7338_v1, %v1386_v4 }
 0x8a2   :  { %8313 = vmatpush3.msra.mxu1 %v1392_v3  ;;  %v7378_v3 = vld [vmem:[%s11267_s11 + $0x88] sm:$0xff] }
 0x8a3   :  { %9118 = vmatprep.subr.bf16.mxu1 %v9117_v52  ;;  %v9149_v4 = vpack.c.bf16 %v7378_v3, %v7377_v2 }
 0x953   :  { %v1113_v7 = vpop.f32.mrb[10].mxu0 }
 0x954   :  { %v1117_v9 = vadd.f32 %v1113_v7, %v1041_v6  ;;  %v8232_v10 = vpop.f32.mrb[11].mxu0  ;;  %v7380_v6 = vld [vmem:[%s11267_s11 + $0x98] sm:$0xff] }
 0x955   :  { %v7382_v10 = vld [vmem:[%s11267_s11 + $0xa8] sm:$0xff] }
 0x956   :  { %1118 = vst.msk [vmem:[#allocation2 + $0x8] sm:$0xff] %vm311_vm6, %v1117_v9  ;;  %v7381_v9 = vld [vmem:[%s11267_s11 + $0xa0] sm:$0xff] }
 0x963   :  { %v8270_v12 = vpop.f32.mrb[12].mxu0 }
 0x964   :  { %v1300_v13 = vadd.f32 %v8270_v12, %v7326_v11  ;;  %v1294_v14 = vpop.f32.mrb[13].mxu0  ;;  %v7383_v12 = vld [vmem:[%s11267_s11 + $0xb0] sm:$0xff] }
 0x965   :  { %v1295_v15 = vadd.f32 %v7326_v11, %v1294_v14  ;;  %v9157_v11 = vpack.c.bf16 %v7382_v10, %v7381_v9 }
 0x967   :  { %8291 = vmatpush3.xpose.msk.msra.mxu0 %vm138_vm0, %v1295_v15  ;;  %v7365_v15 = vld [vmem:[%s11309_s10 + $0x80] sm:$0xff] }
 0x968   :  { %8295 = vmatprep.subr.mxu0 %v9683_v17 }
 0x96a   :  { %8293 = vmatmul.mubr.msk.f32.vlgmr.msra.gmra.mrb[14].mxu0 %vm138_vm0, %v1203_v16  ;;  %v7366_v16 = vld [vmem:[%s11309_s10 + $0x88] sm:$0xff] }
 0x96b   :  { %8296 = vmatpush3.msra.mxu0 %v1387_v5  ;;  %8297 = vmatprep.mubr.msk.f32.mxu0 %vm9684_vm7, %v9683_v17  ;;  %v7379_v5 = vld [vmem:[%s11267_s11 + $0x90] sm:$0xff] }
 0x96c   :  { %9111 = vmatprep.subr.bf16.mxu0 %v9685_v58  ;;  %v9153_v7 = vpack.c.bf16 %v7380_v6, %v7379_v5 }
 0xa3d   :  { %v1467_v18 = vpop.f32.mrb[14].mxu0 }
 0xa3e   :  { %v1471_v20 = vmul.f32 0.25, %v1467_v18  ;;  %v8294_v21 = vpop.f32.mrb[15].mxu0  ;;  %v9133_v18 = vpack.c.bf16 %v7366_v16, %v7365_v15 }
 0xa3f   :  { %v7368_v21 = vld [vmem:[%s11309_s10 + $0x98] sm:$0xff] }
 0xa40   :  { %v1472_v22 = vsel %vm717_vm8, %v1471_v20, -inf }
 0xa41   :  { %1473 = vmax.xlane.f32.xlu1 %v1472_v22 }
 0xace   :  { %v1474_v23 = vpop.xlane.xlu1 %1473 }
 0xacf   :  { %v1475_v25 = vsub.f32 %v1471_v20, %v1474_v23  ;;  %v7367_v20 = vld [vmem:[%s11309_s10 + $0x90] sm:$0xff] }
 0xad0   :  { %v9137_v22 = vpack.c.bf16 %v7368_v21, %v7367_v20  ;;  %v7401_v21 = vld [vmem:[%s11308_s0 + $0xc0] sm:$0xff] }
 0xad1   :  { %v1476_v26 = vmul.f32 1.442695, %v1475_v25  ;;  %v7369_v25 = vld [vmem:[%s11309_s10 + $0xa0] sm:$0xff] }
 0xad3   :  { %9580 = vpow2.f32 %v1476_v26  ;;  %v7370_v26 = vld [vmem:[%s11309_s10 + $0xa8] sm:$0xff] }
 0xadd   :  { %v9581_v27 = vpop.eup %9580 }
 0xade   :  { %v1478_v28 = vsel %vm717_vm8, %v9581_v27, 0.0 }
 0xadf   :  { %1479 = vadd.xlane.f32.xlu1 %v1478_v28  ;;  %v9141_v28 = vpack.c.bf16 %v7370_v26, %v7369_v25  ;;  %v7403_v26 = vld [vmem:[%s11308_s0 + $0xd0] sm:$0xff] }
 0xb6c   :  { %v1480_v29 = vpop.xlane.xlu1 %1479 }
 0xb6d   :  { %9582 = vrcp.f32 %v1480_v29  ;;  %v7371_v29 = vld [vmem:[%s11309_s10 + $0xb0] sm:$0xff] }
 0xb6e   :  { %v9145_v31 = vpack.c.bf16 %v7372_v30, %v7371_v29 }
 0xb77   :  { %v9583_v32 = vpop.eup %9582 }
 0xb78   :  { %v1482_v34 = vmul.f32 %v9583_v32, %v9581_v27  ;;  %v7362_v32 = vld [vmem:[%s11312_s4 + $0x2] ss:$0 sm:$0xff] }
 0xb7a   :  { %8298 = vmatmul.mubr.msk.f32.vlgmr.msra.gmra.mrb[16].mxu0 %vm717_vm8, %v1482_v34 }
 0xb7b   :  { %9113 = vmatpush3.bf16.msra.mxu0 %v9112_v33  ;;  %8304 = vmatprep.mubr.msk.f32.mxu0 %vm9684_vm7, %v9683_v17 }
 0xb7c   :  { %8307 = vmatprep.subr.mxu0 %v9683_v17 }
 0xc4d   :  { %v1552_v35 = vpop.f32.mrb[16].mxu0 }
 0xc4e   :  { %v8299_v36 = vpop.f32.mrb[17].mxu0  ;;  %8305 = vmatmul.mubr.msk.f32.vlgmr.msra.gmra.mrb[18].mxu0 %vm138_vm0, %v1552_v35 }
 0xc4f   :  { %8308 = vmatpush3.xpose.msk.msra.mxu0 %vm138_vm0, %v1300_v13  ;;  %8309 = vmatprep.mubr.msk.f32.mxu0 %vm9684_vm7, %v9683_v17  ;;  %v7384_v13 = vld [vmem:[%s11267_s11 + $0xb8] sm:$0xff]  ;;  %v7386_v36 = vld [vmem:[%s11268_s12 + $0x2] ss:$0 sm:$0xff] }
 0xc50   :  { %9114 = vmatprep.subr.bf16.mxu0 %v9685_v58  ;;  %v9161_v14 = vpack.c.bf16 %v7384_v13, %v7383_v12 }
 0xc52   :  { %8310 = vmatmul.mubr.msk.f32.vlgmr.msra.gmra.mrb[20].mxu0 %vm138_vm0, %v1208_v63  ;;  %v7359_v63 = vld [vmem:[%s11308_s0 + $0xb0] sm:$0xff] }
 0xc53   :  { %9116 = vmatpush3.bf16.msra.mxu0 %v9112_v33  ;;  %8321 = vmatprep.mubr.msk.f32.mxu0 %vm9684_vm7, %v9683_v17  ;;  %v9129_v1 = vpack.c.bf16 %v7360_v0, %v7359_v63  ;;  %v7393_v63 = vld [vmem:[%s11269_s13 + $0x28] sm:$0xff] }
 0xc54   :  { %9134 = vmatprep.subr.bf16.mxu0 %v9133_v18 }
 0xd21   :  { %v1629_v38 = vpop.f32.mrb[18].mxu0 }
 0xd22   :  { %v1633_v39 = vadd.f32 %v1629_v38, %v1556_v37  ;;  %v8306_v40 = vpop.f32.mrb[19].mxu0 }
 0xd24   :  { %1634 = vst.msk [vmem:[#allocation2] sm:$0xff] %vm311_vm6, %v1633_v39 }
 0xd25   :  { %v1707_v41 = vpop.f32.mrb[20].mxu0 }
 0xd26   :  { %v1711_v42 = vmul.f32 0.25, %v1707_v41  ;;  %v8311_v43 = vpop.f32.mrb[21].mxu0  ;;  %v1796_v41 = vld [vmem:[#allocation2 + $0x8] sm:$0xff] }
 0xd28   :  { %v1712_v44 = vsel %vm717_vm8, %v1711_v42, -inf }
 0xd29   :  { %1713 = vmax.xlane.f32.xlu1 %v1712_v44 }
 0xd2b   :  { %v2311_v5 = vld [vmem:[#allocation2] sm:$0xff] }
 0xdb6   :  { %v1714_v45 = vpop.xlane.xlu1 %1713 }
 0xdb7   :  { %v1715_v46 = vsub.f32 %v1711_v42, %v1714_v45  ;;  %v7374_v45 = vld [vmem:[%s11313_s30 + $0x2] ss:$0 sm:$0xff] }
 0xdb9   :  { %v1716_v47 = vmul.f32 1.442695, %v1715_v46 }
 0xdbb   :  { %9584 = vpow2.f32 %v1716_v47 }
 0xdc5   :  { %v9585_v48 = vpop.eup %9584 }
 0xdc6   :  { %v1718_v49 = vsel %vm717_vm8, %v9585_v48, 0.0 }
 0xdc7   :  { %1719 = vadd.xlane.f32.xlu0 %v1718_v49 }
 0xe54   :  { %v1720_v53 = vpop.xlane.xlu0 %1719 }
 0xe55   :  { %9586 = vrcp.f32 %v1720_v53 }
 0xe5f   :  { %v9587_v56 = vpop.eup %9586 }
 0xe60   :  { %v1722_v57 = vmul.f32 %v9587_v56, %v9585_v48 }
 0xe62   :  { %8315 = vmatmul.mubr.msk.f32.vlgmr.msra.gmra.mrb[12].mxu1 %vm717_vm8, %v1722_v57 }
 0xe63   :  { %9120 = vmatpush3.bf16.msra.mxu1 %v9117_v52  ;;  %8340 = vmatprep.mubr.msk.f32.mxu1 %vm311_vm6, %v9935_v19 }
 0xe64   :  { %9122 = vmatprep.subr.bf16.mxu1 %v9121_v59 }
 0xe67   :  { %9124 = vmatpush3.bf16.msra.mxu1 %v9121_v59 }
 0xe68   :  { %9126 = vmatprep.subr.bf16.mxu1 %v9125_v62 }
 0xe6b   :  { %9128 = vmatpush3.bf16.msra.mxu1 %v9125_v62  ;;  %v7392_v62 = vld [vmem:[%s11269_s13 + $0x20] sm:$0xff] }
 0xe6c   :  { %9130 = vmatprep.subr.bf16.mxu1 %v9129_v1 }
 0xe6f   :  { %9132 = vmatpush3.bf16.msra.mxu1 %v9129_v1  ;;  %v9166_v1 = vpack.c.bf16 %v7393_v63, %v7392_v62  ;;  %v7420_v62 = vld [vmem:[%s11309_s10 + $0xf8] sm:$0xff] }
 0xe70   :  { %9150 = vmatprep.subr.bf16.mxu1 %v9149_v4 }
 0xe72   :  { %8341 = vmatmul.mubr.msk.f32.vlgmr.msra.gmra.mrb[14].mxu1 %vm311_vm6, %v9948_v24 }
 0xe73   :  { %9152 = vmatpush3.bf16.msra.mxu1 %v9149_v4  ;;  %8378 = vmatprep.mubr.msk.f32.mxu1 %vm311_vm6, %v9935_v19 }
 0xe74   :  { %9154 = vmatprep.subr.bf16.mxu1 %v9153_v7 }
 0xe77   :  { %9156 = vmatpush3.bf16.msra.mxu1 %v9153_v7 }
 0xe78   :  { %9158 = vmatprep.subr.bf16.mxu1 %v9157_v11 }
 0xe7b   :  { %9160 = vmatpush3.bf16.msra.mxu1 %v9157_v11 }
 0xe7c   :  { %9162 = vmatprep.subr.bf16.mxu1 %v9161_v14 }
 0xe7f   :  { %9164 = vmatpush3.bf16.msra.mxu1 %v9161_v14 }
 0xe80   :  { %8403 = vmatprep.subr.mxu1 %v9683_v17 }
 0xe82   :  { %8379 = vmatmul.mubr.msk.f32.vlgmr.msra.gmra.mrb[16].mxu1 %vm311_vm6, %v9948_v24 }
 0xe83   :  { %8405 = vmatprep.mubr.msk.f32.mxu1 %vm9684_vm7, %v9683_v17 }
 0xf35   :  { %v1792_v23 = vpop.f32.mrb[12].mxu1 }
 0xf36   :  { %v8316_v27 = vpop.f32.mrb[13].mxu1  ;;  %8322 = vmatmul.mubr.msk.f32.vlgmr.msra.gmra.mrb[22].mxu0 %vm138_vm0, %v1792_v23 }
 0xf37   :  { %9136 = vmatpush3.bf16.msra.mxu0 %v9133_v18  ;;  %8359 = vmatprep.mubr.msk.f32.mxu0 %vm311_vm6, %v9935_v19  ;;  %v7404_v27 = vld [vmem:[%s11308_s0 + $0xd8] sm:$0xff] }
 0xf38   :  { %9138 = vmatprep.subr.bf16.mxu0 %v9137_v22  ;;  %v9175_v30 = vpack.c.bf16 %v7404_v27, %v7403_v26 }
 0xf3b   :  { %9140 = vmatpush3.bf16.msra.mxu0 %v9137_v22  ;;  %v7402_v22 = vld [vmem:[%s11308_s0 + $0xc8] sm:$0xff] }
 0xf3c   :  { %9142 = vmatprep.subr.bf16.mxu0 %v9141_v28  ;;  %v9171_v23 = vpack.c.bf16 %v7402_v22, %v7401_v21 }
 0xf3f   :  { %9144 = vmatpush3.bf16.msra.mxu0 %v9141_v28 }
 0xf40   :  { %9146 = vmatprep.subr.bf16.mxu0 %v9145_v31 }
 0xf43   :  { %9148 = vmatpush3.bf16.msra.mxu0 %v9145_v31  ;;  %v7405_v31 = vld [vmem:[%s11308_s0 + $0xe0] sm:$0xff] }
 0xf44   :  { %8381 = vmatprep.subr.mxu0 %v9683_v17 }
 0xf45   :  { %v8342_v33 = vpop.f32.mrb[14].mxu1 }
 0xf46   :  { %v1963_v34 = vadd.f32 %v8342_v33, %v7362_v32  ;;  %v1957_v35 = vpop.f32.mrb[15].mxu1  ;;  %8360 = vmatmul.mubr.msk.f32.vlgmr.msra.gmra.mrb[24].mxu0 %vm311_vm6, %v9948_v24 }
 0xf47   :  { %8383 = vmatprep.mubr.msk.f32.mxu0 %vm9684_vm7, %v9683_v17  ;;  %v1958_v50 = vadd.f32 %v7362_v32, %v1957_v35  ;;  %v7406_v32 = vld [vmem:[%s11308_s0 + $0xe8] sm:$0xff]  ;;  %v7408_v35 = vld [vmem:[%s11308_s0 + $0xf8] sm:$0xff] }
 0xf48   :  { %v9179_v33 = vpack.c.bf16 %v7406_v32, %v7405_v31 }
 0xf55   :  { %v8380_v37 = vpop.f32.mrb[16].mxu1 }
 0xf56   :  { %v2147_v38 = vadd.f32 %v8380_v37, %v7386_v36  ;;  %v2141_v39 = vpop.f32.mrb[17].mxu1  ;;  %v7425_v37 = vld [vmem:[%s11267_s11 + $0xc0] sm:$0xff] }
 0xf57   :  { %v2142_v40 = vadd.f32 %v7386_v36, %v2141_v39 }
 0xf58   :  { %8404 = vmatpush3.msra.mxu1 %v2147_v38  ;;  %v7426_v38 = vld [vmem:[%s11267_s11 + $0xc8] sm:$0xff] }
 0xf59   :  { %9172 = vmatprep.subr.bf16.mxu1 %v9171_v23  ;;  %v9203_v39 = vpack.c.bf16 %v7426_v38, %v7425_v37 }
0x1009   :  { %v1868_v42 = vpop.f32.mrb[22].mxu0 }
0x100a   :  { %v1872_v43 = vadd.f32 %v1868_v42, %v1796_v41  ;;  %v8323_v44 = vpop.f32.mrb[23].mxu0  ;;  %v7428_v41 = vld [vmem:[%s11267_s11 + $0xd8] sm:$0xff] }
0x100b   :  { %v7430_v44 = vld [vmem:[%s11267_s11 + $0xe8] sm:$0xff] }
0x100c   :  { %1873 = vst.msk [vmem:[#allocation2 + $0x8] sm:$0xff] %vm311_vm6, %v1872_v43  ;;  %v7429_v43 = vld [vmem:[%s11267_s11 + $0xe0] sm:$0xff] }
0x1019   :  { %v8361_v46 = vpop.f32.mrb[24].mxu0 }
0x101a   :  { %v2055_v47 = vadd.f32 %v8361_v46, %v7374_v45  ;;  %v2049_v48 = vpop.f32.mrb[25].mxu0  ;;  %v7431_v46 = vld [vmem:[%s11267_s11 + $0xf0] sm:$0xff] }
0x101b   :  { %v2050_v49 = vadd.f32 %v7374_v45, %v2049_v48  ;;  %v9211_v45 = vpack.c.bf16 %v7430_v44, %v7429_v43 }
0x101d   :  { %8382 = vmatpush3.xpose.msk.msra.mxu0 %vm138_vm0, %v2050_v49  ;;  %v7413_v49 = vld [vmem:[%s11309_s10 + $0xc0] sm:$0xff] }
0x101e   :  { %8386 = vmatprep.subr.mxu0 %v9683_v17 }
0x1020   :  { %8384 = vmatmul.mubr.msk.f32.vlgmr.msra.gmra.mrb[26].mxu0 %vm138_vm0, %v1958_v50  ;;  %v7414_v50 = vld [vmem:[%s11309_s10 + $0xc8] sm:$0xff] }
0x1021   :  { %8387 = vmatpush3.msra.mxu0 %v2142_v40  ;;  %8388 = vmatprep.mubr.msk.f32.mxu0 %vm9684_vm7, %v9683_v17  ;;  %v7427_v40 = vld [vmem:[%s11267_s11 + $0xd0] sm:$0xff] }
0x1022   :  { %9165 = vmatprep.subr.bf16.mxu0 %v9685_v58  ;;  %v9207_v42 = vpack.c.bf16 %v7428_v41, %v7427_v40 }
0x10f3   :  { %v2222_v51 = vpop.f32.mrb[26].mxu0 }
0x10f4   :  { %v2226_v52 = vmul.f32 0.25, %v2222_v51  ;;  %v8385_v53 = vpop.f32.mrb[27].mxu0  ;;  %v9187_v51 = vpack.c.bf16 %v7414_v50, %v7413_v49 }
0x10f5   :  { %v7416_v53 = vld [vmem:[%s11309_s10 + $0xd8] sm:$0xff] }
0x10f6   :  { %v2227_v54 = vsel %vm717_vm8, %v2226_v52, -inf }
0x10f7   :  { %2228 = vmax.xlane.f32.xlu1 %v2227_v54 }
0x1184   :  { %v2229_v55 = vpop.xlane.xlu1 %2228 }
0x1185   :  { %v2230_v56 = vsub.f32 %v2226_v52, %v2229_v55  ;;  %v7415_v52 = vld [vmem:[%s11309_s10 + $0xd0] sm:$0xff] }
0x1186   :  { %v9191_v54 = vpack.c.bf16 %v7416_v53, %v7415_v52 }
0x1187   :  { %v2231_v57 = vmul.f32 1.442695, %v2230_v56  ;;  %v7417_v56 = vld [vmem:[%s11309_s10 + $0xe0] sm:$0xff] }
0x1189   :  { %9588 = vpow2.f32 %v2231_v57  ;;  %v7418_v57 = vld [vmem:[%s11309_s10 + $0xe8] sm:$0xff] }
0x1193   :  { %v9589_v59 = vpop.eup %9588 }
0x1194   :  { %v2233_v60 = vsel %vm717_vm8, %v9589_v59, 0.0 }
0x1195   :  { %2234 = vadd.xlane.f32.xlu0 %v2233_v60  ;;  %v9195_v60 = vpack.c.bf16 %v7418_v57, %v7417_v56 }
0x1222   :  { %v2235_v61 = vpop.xlane.xlu0 %2234 }
0x1223   :  { %9590 = vrcp.f32 %v2235_v61  ;;  %v7419_v61 = vld [vmem:[%s11309_s10 + $0xf0] sm:$0xff] }
0x1224   :  { %v9199_v63 = vpack.c.bf16 %v7420_v62, %v7419_v61 }
0x122d   :  { %v9591_v0 = vpop.eup %9590 }
0x122e   :  { %v2237_v2 = vmul.f32 %v9591_v0, %v9589_v59  ;;  %v7410_v0 = vld [vmem:[%s11312_s4 + $0x3] ss:$0 sm:$0xff] }
0x1230   :  { %8389 = vmatmul.mubr.msk.f32.vlgmr.msra.gmra.mrb[28].mxu0 %vm717_vm8, %v2237_v2 }
0x1231   :  { %9167 = vmatpush3.bf16.msra.mxu0 %v9166_v1  ;;  %8395 = vmatprep.mubr.msk.f32.mxu0 %vm9684_vm7, %v9683_v17 }
0x1232   :  { %8398 = vmatprep.subr.mxu0 %v9683_v17 }
0x1303   :  { %v2307_v3 = vpop.f32.mrb[28].mxu0 }
0x1304   :  { %v8390_v4 = vpop.f32.mrb[29].mxu0  ;;  %8396 = vmatmul.mubr.msk.f32.vlgmr.msra.gmra.mrb[30].mxu0 %vm138_vm0, %v2307_v3 }
0x1305   :  { %8399 = vmatpush3.xpose.msk.msra.mxu0 %vm138_vm0, %v2055_v47  ;;  %8400 = vmatprep.mubr.msk.f32.mxu0 %vm9684_vm7, %v9683_v17  ;;  %v7432_v47 = vld [vmem:[%s11267_s11 + $0xf8] sm:$0xff]  ;;  %v7434_v4 = vld [vmem:[%s11268_s12 + $0x3] ss:$0 sm:$0xff] }
0x1306   :  { %9168 = vmatprep.subr.bf16.mxu0 %v9685_v58  ;;  %v9215_v48 = vpack.c.bf16 %v7432_v47, %v7431_v46 }
0x1308   :  { %8401 = vmatmul.mubr.msk.f32.vlgmr.msra.gmra.mrb[32].mxu0 %vm138_vm0, %v1963_v34  ;;  %v7407_v34 = vld [vmem:[%s11308_s0 + $0xf0] sm:$0xff] }
0x1309   :  { %9170 = vmatpush3.bf16.msra.mxu0 %v9166_v1  ;;  %8412 = vmatprep.mubr.msk.f32.mxu0 %vm9684_vm7, %v9683_v17  ;;  %v9183_v36 = vpack.c.bf16 %v7408_v35, %v7407_v34  ;;  %v7441_v34 = vld [vmem:[%s11269_s13 + $0x38] sm:$0xff] }
0x130a   :  { %9188 = vmatprep.subr.bf16.mxu0 %v9187_v51 }
0x13d7   :  { %v2384_v6 = vpop.f32.mrb[30].mxu0 }
0x13d8   :  { %v2388_v7 = vadd.f32 %v2384_v6, %v2311_v5  ;;  %v8397_v9 = vpop.f32.mrb[31].mxu0 }
0x13da   :  { %2389 = vst.msk [vmem:[#allocation2] sm:$0xff] %vm311_vm6, %v2388_v7 }
0x13db   :  { %v2462_v10 = vpop.f32.mrb[32].mxu0 }
0x13dc   :  { %v2466_v11 = vmul.f32 0.25, %v2462_v10  ;;  %v8402_v12 = vpop.f32.mrb[33].mxu0  ;;  %v2551_v10 = vld [vmem:[#allocation2 + $0x8] sm:$0xff] }
0x13de   :  { %v2467_v13 = vsel %vm717_vm8, %v2466_v11, -inf }
0x13df   :  { %2468 = vmax.xlane.f32.xlu1 %v2467_v13 }
0x13e1   :  { %v3066_v40 = vld [vmem:[#allocation2] sm:$0xff] }
0x146c   :  { %v2469_v14 = vpop.xlane.xlu1 %2468 }
0x146d   :  { %v2470_v15 = vsub.f32 %v2466_v11, %v2469_v14  ;;  %v7422_v14 = vld [vmem:[%s11313_s30 + $0x3] ss:$0 sm:$0xff] }
0x146f   :  { %v2471_v16 = vmul.f32 1.442695, %v2470_v15 }
0x1471   :  { %9592 = vpow2.f32 %v2471_v16 }
0x147b   :  { %v9593_v18 = vpop.eup %9592 }
0x147c   :  { %v2473_v20 = vsel %vm717_vm8, %v9593_v18, 0.0 }
0x147d   :  { %2474 = vadd.xlane.f32.xlu0 %v2473_v20 }
0x150a   :  { %v2475_v25 = vpop.xlane.xlu0 %2474 }
0x150b   :  { %9594 = vrcp.f32 %v2475_v25 }
0x1515   :  { %v9595_v28 = vpop.eup %9594 }
0x1516   :  { %v2477_v29 = vmul.f32 %v9595_v28, %v9593_v18 }
0x1518   :  { %8406 = vmatmul.mubr.msk.f32.vlgmr.msra.gmra.mrb[18].mxu1 %vm717_vm8, %v2477_v29 }
0x1519   :  { %9174 = vmatpush3.bf16.msra.mxu1 %v9171_v23  ;;  %8431 = vmatprep.mubr.msk.f32.mxu1 %vm311_vm6, %v9935_v19 }
0x151a   :  { %9176 = vmatprep.subr.bf16.mxu1 %v9175_v30 }
0x151d   :  { %9178 = vmatpush3.bf16.msra.mxu1 %v9175_v30 }
0x151e   :  { %9180 = vmatprep.subr.bf16.mxu1 %v9179_v33 }
0x1521   :  { %9182 = vmatpush3.bf16.msra.mxu1 %v9179_v33  ;;  %v7440_v33 = vld [vmem:[%s11269_s13 + $0x30] sm:$0xff] }
0x1522   :  { %9184 = vmatprep.subr.bf16.mxu1 %v9183_v36 }
0x1525   :  { %9186 = vmatpush3.bf16.msra.mxu1 %v9183_v36  ;;  %v9220_v36 = vpack.c.bf16 %v7441_v34, %v7440_v33  ;;  %v3436_v33 = vld [vmem:[%s11273_s17 + $0x20] sm:$0xff]  ;;  %v3437_v34 = vld [vmem:[%s11273_s17 + $0x28] sm:$0xff] }
0x1526   :  { %9204 = vmatprep.subr.bf16.mxu1 %v9203_v39 }
0x1528   :  { %8432 = vmatmul.mubr.msk.f32.vlgmr.msra.gmra.mrb[20].mxu1 %vm311_vm6, %v9948_v24 }
0x1529   :  { %9206 = vmatpush3.bf16.msra.mxu1 %v9203_v39  ;;  %8469 = vmatprep.mubr.msk.f32.mxu1 %vm311_vm6, %v9935_v19 }
0x152a   :  { %9208 = vmatprep.subr.bf16.mxu1 %v9207_v42 }
0x152d   :  { %9210 = vmatpush3.bf16.msra.mxu1 %v9207_v42 }
0x152e   :  { %9212 = vmatprep.subr.bf16.mxu1 %v9211_v45 }
0x1531   :  { %9214 = vmatpush3.bf16.msra.mxu1 %v9211_v45 }
0x1532   :  { %9216 = vmatprep.subr.bf16.mxu1 %v9215_v48 }
0x1535   :  { %9218 = vmatpush3.bf16.msra.mxu1 %v9215_v48  ;;  %v7458_v48 = vld [vmem:[%s11270_s14 + $0x1] ss:$0 sm:$0xff] }
0x1536   :  { %8494 = vmatprep.subr.mxu1 %v9683_v17 }
0x1538   :  { %8470 = vmatmul.mubr.msk.f32.vlgmr.msra.gmra.mrb[22].mxu1 %vm311_vm6, %v9948_v24 }
0x1539   :  { %8496 = vmatprep.mubr.msk.f32.mxu1 %vm9684_vm7, %v9683_v17 }
0x15eb   :  { %v2547_v55 = vpop.f32.mrb[18].mxu1 }
0x15ec   :  { %v8407_v59 = vpop.f32.mrb[19].mxu1  ;;  %8413 = vmatmul.mubr.msk.f32.vlgmr.msra.gmra.mrb[34].mxu0 %vm138_vm0, %v2547_v55 }
0x15ed   :  { %9190 = vmatpush3.bf16.msra.mxu0 %v9187_v51  ;;  %8450 = vmatprep.mubr.msk.f32.mxu0 %vm311_vm6, %v9935_v19 }
0x15ee   :  { %9192 = vmatprep.subr.bf16.mxu0 %v9191_v54 }
0x15f1   :  { %9194 = vmatpush3.bf16.msra.mxu0 %v9191_v54 }
0x15f2   :  { %9196 = vmatprep.subr.bf16.mxu0 %v9195_v60 }
0x15f5   :  { %9198 = vmatpush3.bf16.msra.mxu0 %v9195_v60 }
0x15f6   :  { %9200 = vmatprep.subr.bf16.mxu0 %v9199_v63 }
0x15f9   :  { %9202 = vmatpush3.bf16.msra.mxu0 %v9199_v63 }
0x15fa   :  { %8472 = vmatprep.subr.mxu0 %v9683_v17 }
0x15fb   :  { %v8433_v1 = vpop.f32.mrb[20].mxu1 }
0x15fc   :  { %v2718_v2 = vadd.f32 %v8433_v1, %v7410_v0  ;;  %v2712_v3 = vpop.f32.mrb[21].mxu1  ;;  %8451 = vmatmul.mubr.msk.f32.vlgmr.msra.gmra.mrb[36].mxu0 %vm311_vm6, %v9948_v24 }
0x15fd   :  { %8474 = vmatprep.mubr.msk.f32.mxu0 %vm9684_vm7, %v9683_v17  ;;  %v2713_v21 = vadd.f32 %v7410_v0, %v2712_v3 }
0x160b   :  { %v8471_v5 = vpop.f32.mrb[22].mxu1 }
0x160c   :  { %v2902_v6 = vadd.f32 %v8471_v5, %v7434_v4  ;;  %v2896_v7 = vpop.f32.mrb[23].mxu1  ;;  %v7449_v5 = vld [vmem:[%s11271_s15] ss:$0 sm:$0xff] }
0x160d   :  { %v2897_v9 = vadd.f32 %v7434_v4, %v2896_v7  ;;  %v7450_v7 = vld [vmem:[%s11272_s16] ss:$0 sm:$0xff] }
0x160e   :  { %8495 = vmatpush3.msra.mxu1 %v2902_v6 }
0x16bf   :  { %v2623_v11 = vpop.f32.mrb[34].mxu0 }
0x16c0   :  { %v2627_v12 = vadd.f32 %v2623_v11, %v2551_v10  ;;  %v8414_v13 = vpop.f32.mrb[35].mxu0 }
0x16c2   :  { %2628 = vst.msk [vmem:[#allocation2 + $0x8] sm:$0xff] %vm311_vm6, %v2627_v12 }
0x16c9   :  { %v3306_v13 = vld [vmem:[#allocation2 + $0x8] sm:$0xff] }
0x16cf   :  { %v8452_v15 = vpop.f32.mrb[36].mxu0 }
0x16d0   :  { %v2810_v16 = vadd.f32 %v8452_v15, %v7422_v14  ;;  %v2804_v18 = vpop.f32.mrb[37].mxu0 }
0x16d1   :  { %v2805_v20 = vadd.f32 %v7422_v14, %v2804_v18 }
0x16d3   :  { %8473 = vmatpush3.xpose.msk.msra.mxu0 %vm138_vm0, %v2805_v20 }
0x16d4   :  { %8477 = vmatprep.subr.mxu0 %v9683_v17 }
0x16d6   :  { %8475 = vmatmul.mubr.msk.f32.vlgmr.msra.gmra.mrb[38].mxu0 %vm138_vm0, %v2713_v21 }
0x16d7   :  { %8478 = vmatpush3.msra.mxu0 %v2897_v9  ;;  %8479 = vmatprep.mubr.msk.f32.mxu0 %vm9684_vm7, %v9683_v17 }
0x16d8   :  { %9219 = vmatprep.subr.bf16.mxu0 %v9685_v58 }
0x17a9   :  { %v2977_v22 = vpop.f32.mrb[38].mxu0 }
0x17aa   :  { %v2981_v23 = vmul.f32 0.25, %v2977_v22  ;;  %v8476_v25 = vpop.f32.mrb[39].mxu0 }
0x17ac   :  { %v2982_v26 = vsel %vm717_vm8, %v2981_v23, -inf }
0x17ad   :  { %2983 = vmax.xlane.f32.xlu1 %v2982_v26 }
0x183a   :  { %v2984_v27 = vpop.xlane.xlu1 %2983 }
0x183b   :  { %v2985_v28 = vsub.f32 %v2981_v23, %v2984_v27 }
0x183d   :  { %v2986_v29 = vmul.f32 1.442695, %v2985_v28  ;;  %v3432_v28 = vld [vmem:[%s11273_s17] sm:$0xff] }
0x183f   :  { %9596 = vpow2.f32 %v2986_v29 }
0x1849   :  { %v9597_v30 = vpop.eup %9596 }
0x184a   :  { %v2988_v31 = vsel %vm717_vm8, %v9597_v30, 0.0 }
0x184b   :  { %2989 = vadd.xlane.f32.xlu0 %v2988_v31  ;;  %v3435_v31 = vld [vmem:[%s11273_s17 + $0x18] sm:$0xff] }
0x18d8   :  { %v2990_v32 = vpop.xlane.xlu0 %2989 }
0x18d9   :  { %9598 = vrcp.f32 %v2990_v32 }
0x18e3   :  { %v9599_v35 = vpop.eup %9598 }
0x18e4   :  { %v2992_v37 = vmul.f32 %v9599_v35, %v9597_v30  ;;  %v3434_v30 = vld [vmem:[%s11273_s17 + $0x10] sm:$0xff]  ;;  %v9233_v35 = vpack.c.bf16 %v3437_v34, %v3436_v33  ;;  %v7454_v33 = vld [vmem:[%s11276_s20] ss:$0 sm:$0xff] }
0x18e5   :  { %v9229_v32 = vpack.c.bf16 %v3435_v31, %v3434_v30 }
0x18e6   :  { %8480 = vmatmul.mubr.msk.f32.vlgmr.msra.gmra.mrb[40].mxu0 %vm717_vm8, %v2992_v37  ;;  %v3439_v37 = vld [vmem:[%s11273_s17 + $0x38] sm:$0xff] }
0x18e7   :  { %9221 = vmatpush3.bf16.msra.mxu0 %v9220_v36  ;;  %8486 = vmatprep.mubr.msk.f32.mxu0 %vm9684_vm7, %v9683_v17 }
0x18e8   :  { %8489 = vmatprep.subr.mxu0 %v9683_v17 }
0x19b9   :  { %v3062_v38 = vpop.f32.mrb[40].mxu0 }
0x19ba   :  { %v8481_v39 = vpop.f32.mrb[41].mxu0  ;;  %8487 = vmatmul.mubr.msk.f32.vlgmr.msra.gmra.mrb[42].mxu0 %vm138_vm0, %v3062_v38 }
0x19bb   :  { %8490 = vmatpush3.xpose.msk.msra.mxu0 %vm138_vm0, %v2810_v16  ;;  %8491 = vmatprep.mubr.msk.f32.mxu0 %vm9684_vm7, %v9683_v17  ;;  %v3546_v39 = vld [vmem:[%s11275_s19] sm:$0xff] }
0x19bc   :  { %9222 = vmatprep.subr.bf16.mxu0 %v9685_v58 }
0x19be   :  { %8492 = vmatmul.mubr.msk.f32.vlgmr.msra.gmra.mrb[44].mxu0 %vm138_vm0, %v2718_v2 }
0x19bf   :  { %9224 = vmatpush3.bf16.msra.mxu0 %v9220_v36  ;;  %8503 = vmatprep.mubr.msk.f32.mxu0 %vm9684_vm7, %v9683_v17  ;;  %v3438_v36 = vld [vmem:[%s11273_s17 + $0x30] sm:$0xff] }
0x19c0   :  { %v9237_v38 = vpack.c.bf16 %v3439_v37, %v3438_v36 }
0x1a8d   :  { %v3139_v41 = vpop.f32.mrb[42].mxu0 }
0x1a8e   :  { %v3143_v42 = vadd.f32 %v3139_v41, %v3066_v40  ;;  %v8488_v43 = vpop.f32.mrb[43].mxu0  ;;  %v3547_v40 = vld [vmem:[%s11275_s19 + $0x8] sm:$0xff] }
0x1a8f   :  { %v9241_v41 = vpack.c.bf16 %v3547_v40, %v3546_v39 }
0x1a90   :  { %3144 = vst.msk [vmem:[#allocation2] sm:$0xff] %vm311_vm6, %v3143_v42 }
0x1a91   :  { %v3217_v44 = vpop.f32.mrb[44].mxu0  ;;  %9242 = vmatprep.subr.bf16.mxu0 %v9241_v41 }
0x1a92   :  { %v3221_v45 = vmul.f32 0.25, %v3217_v44  ;;  %v8493_v46 = vpop.f32.mrb[45].mxu0 }
0x1a94   :  { %v3222_v47 = vsel %vm717_vm8, %v3221_v45, -inf }
0x1a95   :  { %3223 = vmax.xlane.f32.xlu1 %v3222_v47 }
0x1a97   :  { %v3384_v49 = vld [vmem:[#allocation2] sm:$0xff] }
0x1a98   :  { %v3386_v50 = vadd.f32 %v3384_v49, %v9935_v19  ;;  %3698 = vst.msk [vmem:[#allocation2] sm:$0xff] %vm311_vm6, %v7458_v48  ;;  %v3548_v49 = vld [vmem:[%s11275_s19 + $0x10] sm:$0xff] }
0x1a9a   :  { %v3390_v51 = vsel %vm311_vm6, %v3386_v50, 0.0 }
0x1a9b   :  { %3391 = vadd.xlane.f32.xlu1 %v3390_v51 }
0x1b22   :  { %v3224_v52 = vpop.xlane.xlu1 %3223 }
0x1b23   :  { %v3225_v53 = vsub.f32 %v3221_v45, %v3224_v52  ;;  %v3550_v52 = vld [vmem:[%s11275_s19 + $0x20] sm:$0xff] }
0x1b25   :  { %v3226_v54 = vmul.f32 1.442695, %v3225_v53  ;;  %v3551_v53 = vld [vmem:[%s11275_s19 + $0x28] sm:$0xff] }
0x1b27   :  { %9600 = vpow2.f32 %v3226_v54  ;;  %v9249_v54 = vpack.c.bf16 %v3551_v53, %v3550_v52  ;;  %v7460_v52 = vld [vmem:[%s11308_s0 + $0x108] sm:$0xff] }
0x1b28   :  { %v3392_v55 = vpop.xlane.xlu1 %3391 }
0x1b29   :  { %v3396_v56 = vmul.f32 0.015625, %v3392_v55  ;;  %v3552_v55 = vld [vmem:[%s11275_s19 + $0x30] sm:$0xff] }
0x1b2b   :  { %v3398_v57 = vsub.f32 %v3386_v50, %v3396_v56  ;;  %v3549_v50 = vld [vmem:[%s11275_s19 + $0x18] sm:$0xff] }
0x1b2c   :  { %v9245_v51 = vpack.c.bf16 %v3549_v50, %v3548_v49  ;;  %v3553_v56 = vld [vmem:[%s11275_s19 + $0x38] sm:$0xff] }
0x1b2d   :  { %v3400_v59 = vmul.f32 %v3398_v57, %v3398_v57 }
0x1b2f   :  { %v3402_v60 = vsel %vm311_vm6, %v3400_v59, 0.0  ;;  %v3554_v59 = vld [vmem:[%s11275_s19 + $0x40] sm:$0xff] }
0x1b30   :  { %3403 = vadd.xlane.f32.xlu1 %v3402_v60  ;;  %v3555_v60 = vld [vmem:[%s11275_s19 + $0x48] sm:$0xff] }
0x1b31   :  { %v9601_v61 = vpop.eup %9600 }
0x1b32   :  { %v3228_v62 = vsel %vm717_vm8, %v9601_v61, 0.0 }
0x1b33   :  { %3229 = vadd.xlane.f32.xlu0 %v3228_v62  ;;  %v3556_v62 = vld [vmem:[%s11275_s19 + $0x50] sm:$0xff] }
0x1bbd   :  { %v3404_v19 = vpop.xlane.xlu1 %3403 }
0x1bbe   :  { %v3408_v63 = vmul.f32 0.015625, %v3404_v19  ;;  %v3557_v19 = vld [vmem:[%s11275_s19 + $0x58] sm:$0xff] }
0x1bc0   :  { %v3410_v0 = vadd.f32 1e-12, %v3408_v63  ;;  %v3230_v1 = vpop.xlane.xlu0 %3229  ;;  %v9261_v63 = vpack.c.bf16 %v3557_v19, %v3556_v62  ;;  %v7486_v62 = vld [vmem:[%s11267_s11 + $0x118] sm:$0xff] }
0x1bc1   :  { %9602 = vrcp.f32 %v3230_v1  ;;  %v3559_v1 = vld [vmem:[%s11275_s19 + $0x68] sm:$0xff] }
0x1bc2   :  { %9604 = vrsqrt.f32 %v3410_v0  ;;  %v3558_v0 = vld [vmem:[%s11275_s19 + $0x60] sm:$0xff] }
0x1bcb   :  { %v9603_v2 = vpop.eup %9602 }
0x1bcc   :  { %v9605_v3 = vpop.eup %9604  ;;  %v3232_v4 = vmul.f32 %v9603_v2, %v9601_v61  ;;  %v9257_v61 = vpack.c.bf16 %v3555_v60, %v3554_v59  ;;  %v9265_v2 = vpack.c.bf16 %v3559_v1, %v3558_v0  ;;  %v7462_v59 = vld [vmem:[%s11308_s0 + $0x118] sm:$0xff]  ;;  %v7464_v0 = vld [vmem:[%s11308_s0 + $0x128] sm:$0xff] }
0x1bcd   :  { %v3414_v6 = vmul.f32 %v9605_v3, %v3398_v57  ;;  %v9253_v57 = vpack.c.bf16 %v3553_v56, %v3552_v55  ;;  %v3560_v3 = vld [vmem:[%s11275_s19 + $0x70] sm:$0xff]  ;;  %v7484_v55 = vld [vmem:[%s11267_s11 + $0x108] sm:$0xff] }
0x1bce   :  { %8497 = vmatmul.mubr.msk.f32.vlgmr.msra.gmra.mrb[24].mxu1 %vm717_vm8, %v3232_v4  ;;  %v3561_v4 = vld [vmem:[%s11275_s19 + $0x78] sm:$0xff] }
0x1bcf   :  { %v3422_v9 = vmul.f32 %v7449_v5, %v3414_v6  ;;  %v7451_v6 = vld [vmem:[%s11274_s18] ss:$0 sm:$0xff] }
0x1bd1   :  { %v10425_v10 = vadd.f32 %v7450_v7, %v3422_v9 }
0x1bd3   :  { %8522 = vmatprep.mubr.msk.f32.mxu1 %vm311_vm6, %v10425_v10 }
0x1ca1   :  { %v3302_v11 = vpop.f32.mrb[24].mxu1 }
0x1ca2   :  { %v8498_v12 = vpop.f32.mrb[25].mxu1  ;;  %8504 = vmatmul.mubr.msk.f32.vlgmr.msra.gmra.mrb[46].mxu0 %vm138_vm0, %v3302_v11 }
0x1ca3   :  { %9244 = vmatpush3.bf16.msra.mxu0 %v9241_v41 }
0x1ca4   :  { %9246 = vmatprep.subr.bf16.mxu0 %v9245_v51 }
0x1ca7   :  { %9248 = vmatpush3.bf16.msra.mxu0 %v9245_v51  ;;  %v7459_v51 = vld [vmem:[%s11308_s0 + $0x100] sm:$0xff] }
0x1ca8   :  { %9250 = vmatprep.subr.bf16.mxu0 %v9249_v54  ;;  %v9273_v53 = vpack.c.bf16 %v7460_v52, %v7459_v51  ;;  %v7480_v51 = vld [vmem:[%s11313_s30 + $0x4] ss:$0 sm:$0xff] }
0x1cab   :  { %9252 = vmatpush3.bf16.msra.mxu0 %v9249_v54  ;;  %v7483_v54 = vld [vmem:[%s11267_s11 + $0x100] sm:$0xff] }
0x1cac   :  { %9254 = vmatprep.subr.bf16.mxu0 %v9253_v57  ;;  %v9305_v56 = vpack.c.bf16 %v7484_v55, %v7483_v54 }
0x1caf   :  { %9256 = vmatpush3.bf16.msra.mxu0 %v9253_v57  ;;  %v7461_v57 = vld [vmem:[%s11308_s0 + $0x110] sm:$0xff] }
0x1cb0   :  { %9258 = vmatprep.subr.bf16.mxu0 %v9257_v61  ;;  %v9277_v60 = vpack.c.bf16 %v7462_v59, %v7461_v57 }
0x1cb3   :  { %9260 = vmatpush3.bf16.msra.mxu0 %v9257_v61  ;;  %v7485_v61 = vld [vmem:[%s11267_s11 + $0x110] sm:$0xff] }
0x1cb4   :  { %9262 = vmatprep.subr.bf16.mxu0 %v9261_v63  ;;  %v9309_v19 = vpack.c.bf16 %v7486_v62, %v7485_v61 }
0x1cb7   :  { %9264 = vmatpush3.bf16.msra.mxu0 %v9261_v63  ;;  %v7463_v63 = vld [vmem:[%s11308_s0 + $0x120] sm:$0xff] }
0x1cb8   :  { %9266 = vmatprep.subr.bf16.mxu0 %v9265_v2  ;;  %v9281_v1 = vpack.c.bf16 %v7464_v0, %v7463_v63 }
0x1cbb   :  { %9268 = vmatpush3.bf16.msra.mxu0 %v9265_v2  ;;  %v7487_v2 = vld [vmem:[%s11267_s11 + $0x120] sm:$0xff] }
0x1d75   :  { %v3378_v14 = vpop.f32.mrb[46].mxu0 }
0x1d76   :  { %v3382_v15 = vadd.f32 %v3378_v14, %v3306_v13  ;;  %v8505_v16 = vpop.f32.mrb[47].mxu0 }
0x1d78   :  { %3383 = vst.msk [vmem:[#allocation2 + $0x8] sm:$0xff] %vm311_vm6, %v3382_v15 }
0x1d7f   :  { %v3385_v18 = vld [vmem:[#allocation2 + $0x8] sm:$0xff] }
0x1d80   :  { %v3387_v20 = vadd.f32 %v3385_v18, %v9948_v24  ;;  %3699 = vst.msk [vmem:[#allocation2 + $0x8] sm:$0xff] %vm311_vm6, %v7458_v48  ;;  %v3433_v24 = vld [vmem:[%s11273_s17 + $0x8] sm:$0xff] }
0x1d81   :  { %v9225_v29 = vpack.c.bf16 %v3433_v24, %v3432_v28 }
0x1d82   :  { %v3393_v21 = vsel %vm311_vm6, %v3387_v20, 0.0 }
0x1d83   :  { %3394 = vadd.xlane.f32.xlu0 %v3393_v21  ;;  %9226 = vmatprep.subr.bf16.mxu1 %v9225_v29 }
0x1d84   :  { %9228 = vmatpush3.bf16.msra.mxu1 %v9225_v29 }
0x1d85   :  { %9230 = vmatprep.subr.bf16.mxu1 %v9229_v32 }
0x1d88   :  { %9232 = vmatpush3.bf16.msra.mxu1 %v9229_v32 }
0x1d89   :  { %9234 = vmatprep.subr.bf16.mxu1 %v9233_v35 }
0x1d8c   :  { %9236 = vmatpush3.bf16.msra.mxu1 %v9233_v35 }
0x1d8d   :  { %9238 = vmatprep.subr.bf16.mxu1 %v9237_v38 }
0x1d90   :  { %9240 = vmatpush3.bf16.msra.mxu1 %v9237_v38 }
0x1d91   :  { %9274 = vmatprep.subr.bf16.mxu1 %v9273_v53 }
0x1e10   :  { %v3395_v22 = vpop.xlane.xlu0 %3394 }
0x1e11   :  { %v3397_v23 = vmul.f32 0.015625, %v3395_v22 }
0x1e13   :  { %v3399_v25 = vsub.f32 %v3387_v20, %v3397_v23 }
0x1e15   :  { %v3401_v26 = vmul.f32 %v3399_v25, %v3399_v25 }
0x1e17   :  { %v3405_v27 = vsel %vm311_vm6, %v3401_v26, 0.0 }
0x1e18   :  { %3406 = vadd.xlane.f32.xlu0 %v3405_v27 }
0x1ea5   :  { %v3407_v42 = vpop.xlane.xlu0 %3406 }
0x1ea6   :  { %v3409_v43 = vmul.f32 0.015625, %v3407_v42 }
0x1ea8   :  { %v3411_v44 = vadd.f32 1e-12, %v3409_v43 }
0x1eaa   :  { %9606 = vrsqrt.f32 %v3411_v44 }
0x1eb4   :  { %v9607_v45 = vpop.eup %9606 }
0x1eb5   :  { %v3415_v46 = vmul.f32 %v9607_v45, %v3399_v25 }
0x1eb7   :  { %v3423_v47 = vmul.f32 %v7449_v5, %v3415_v46  ;;  %v9269_v5 = vpack.c.bf16 %v3561_v4, %v3560_v3  ;;  %v7488_v3 = vld [vmem:[%s11267_s11 + $0x128] sm:$0xff] }
0x1eb8   :  { %v9313_v4 = vpack.c.bf16 %v7488_v3, %v7487_v2  ;;  %v7498_v2 = vld [vmem:[%s11269_s13 + $0x40] sm:$0xff]  ;;  %v7499_v3 = vld [vmem:[%s11269_s13 + $0x48] sm:$0xff] }
0x1eb9   :  { %v10465_v48 = vadd.f32 %v7450_v7, %v3423_v47  ;;  %9270 = vmatprep.subr.bf16.mxu0 %v9269_v5 }
0x1eba   :  { %9272 = vmatpush3.bf16.msra.mxu0 %v9269_v5  ;;  %v7465_v5 = vld [vmem:[%s11308_s0 + $0x130] sm:$0xff] }
0x1ebb   :  { %8523 = vmatmul.mubr.msk.f32.vlgmr.msra.gmra.mrb[26].mxu1 %vm311_vm6, %v10465_v48  ;;  %9306 = vmatprep.subr.bf16.mxu0 %v9305_v56 }
0x1ebc   :  { %9276 = vmatpush3.bf16.msra.mxu1 %v9273_v53 }
0x1ebd   :  { %9278 = vmatprep.subr.bf16.mxu1 %v9277_v60 }
0x1ec0   :  { %9280 = vmatpush3.bf16.msra.mxu1 %v9277_v60 }
0x1ec1   :  { %9282 = vmatprep.subr.bf16.mxu1 %v9281_v1 }
0x1ec4   :  { %9284 = vmatpush3.bf16.msra.mxu1 %v9281_v1 }
0x1f8e   :  { %v8524_v7 = vpop.f32.mrb[26].mxu1 }
0x1f8f   :  { %v3525_v9 = vadd.f32 %v8524_v7, %v7451_v6  ;;  %v3519_v11 = vpop.f32.mrb[27].mxu1 }
0x1f90   :  { %v3520_v12 = vadd.f32 %v7451_v6, %v3519_v11  ;;  %v7466_v6 = vld [vmem:[%s11308_s0 + $0x138] sm:$0xff] }
0x1f91   :  { %v3531_v13 = vmul.f32 0.044715, %v3525_v9  ;;  %v3529_v30 = vmul.f32 0.5, %v3525_v9  ;;  %v9285_v7 = vpack.c.bf16 %v7466_v6, %v7465_v5  ;;  %v7490_v11 = vld [vmem:[%s11267_s11 + $0x138] sm:$0xff] }
0x1f92   :  { %v3530_v14 = vmul.f32 0.044715, %v3520_v12  ;;  %v3528_v24 = vmul.f32 0.5, %v3520_v12 }
0x1f93   :  { %v3533_v15 = vmul.f32 %v3531_v13, %v3525_v9  ;;  %9286 = vmatprep.subr.bf16.mxu1 %v9285_v7  ;;  %v7471_v13 = vld [vmem:[%s11309_s10 + $0x100] sm:$0xff] }
0x1f94   :  { %v3532_v16 = vmul.f32 %v3530_v14, %v3520_v12  ;;  %9288 = vmatpush3.bf16.msra.mxu1 %v9285_v7  ;;  %v7472_v14 = vld [vmem:[%s11309_s10 + $0x108] sm:$0xff] }
0x1f95   :  { %v3535_v18 = vmul.f32 %v3533_v15, %v3525_v9  ;;  %v9289_v15 = vpack.c.bf16 %v7472_v14, %v7471_v13 }
0x1f96   :  { %v3534_v20 = vmul.f32 %v3532_v16, %v3520_v12 }
0x1f97   :  { %v3537_v21 = vadd.f32 %v3535_v18, %v3525_v9  ;;  %v7489_v9 = vld [vmem:[%s11267_s11 + $0x130] sm:$0xff]  ;;  %9290 = vmatprep.subr.bf16.mxu1 %v9289_v15 }
0x1f98   :  { %v3536_v22 = vadd.f32 %v3534_v20, %v3520_v12  ;;  %v9317_v12 = vpack.c.bf16 %v7490_v11, %v7489_v9 }
0x1f99   :  { %v3539_v23 = vmul.f32 0.7978846, %v3537_v21 }
0x1f9a   :  { %v3538_v25 = vmul.f32 0.7978846, %v3536_v22 }
0x1f9b   :  { %9608 = vtanh.f32 %v3539_v23 }
0x1f9c   :  { %9610 = vtanh.f32 %v3538_v25 }
0x1fa5   :  { %v9609_v26 = vpop.eup %9608 }
0x1fa6   :  { %v9611_v27 = vpop.eup %9610  ;;  %v3543_v28 = vadd.f32 1.0, %v9609_v26  ;;  %v7455_v26 = vld [vmem:[%s11314_s3] ss:$0 sm:$0xff] }
0x1fa7   :  { %v3542_v29 = vadd.f32 1.0, %v9611_v27 }
0x1fa8   :  { %v3545_v32 = vmul.f32 %v3543_v28, %v3529_v30 }
0x1fa9   :  { %v3544_v31 = vmul.f32 %v3542_v29, %v3528_v24  ;;  %v7456_v29 = vld [vmem:[%s11278_s22] ss:$0 sm:$0xff] }
0x1fab   :  { %8557 = vmatprep.mubr.f32.mxu0 %v3544_v31 }
0x1fac   :  { %8558 = vmatmul.mubr.f32.vlgmr.msra.gmra.mrb[48].mxu0 %v3545_v32  ;;  %v7473_v32 = vld [vmem:[%s11309_s10 + $0x110] sm:$0xff] }
0x1fad   :  { %9308 = vmatpush3.bf16.msra.mxu0 %v9305_v56 }
0x1fae   :  { %9310 = vmatprep.subr.bf16.mxu0 %v9309_v19 }
0x1fb1   :  { %9312 = vmatpush3.bf16.msra.mxu0 %v9309_v19 }
0x1fb2   :  { %9314 = vmatprep.subr.bf16.mxu0 %v9313_v4 }
0x1fb5   :  { %9316 = vmatpush3.bf16.msra.mxu0 %v9313_v4  ;;  %v9322_v4 = vpack.c.bf16 %v7499_v3, %v7498_v2  ;;  %v7525_v2 = vld [vmem:[%s11309_s10 + $0x170] sm:$0xff]  ;;  %v7526_v3 = vld [vmem:[%s11309_s10 + $0x178] sm:$0xff] }
0x1fb6   :  { %9318 = vmatprep.subr.bf16.mxu0 %v9317_v12 }
0x1fb9   :  { %9320 = vmatpush3.bf16.msra.mxu0 %v9317_v12 }
0x1fba   :  { %8622 = vmatprep.subr.mxu0 %v9683_v17 }
0x207f   :  { %v8559_v34 = vpop.f32.mrb[48].mxu0 }
0x2080   :  { %v3641_v35 = vadd.f32 %v8559_v34, %v7454_v33  ;;  %v3635_v36 = vpop.f32.mrb[49].mxu0 }
0x2081   :  { %v3636_v37 = vadd.f32 %v7454_v33, %v3635_v36  ;;  %v7474_v33 = vld [vmem:[%s11309_s10 + $0x118] sm:$0xff] }
0x2082   :  { %v3645_v38 = vadd.f32 %v3641_v35, %v10465_v48  ;;  %v9293_v36 = vpack.c.bf16 %v7474_v33, %v7473_v32  ;;  %v7510_v32 = vld [vmem:[%s11308_s0 + $0x158] sm:$0xff] }
0x2083   :  { %v3644_v39 = vadd.f32 %v3636_v37, %v10425_v10  ;;  %v7475_v37 = vld [vmem:[%s11309_s10 + $0x120] sm:$0xff] }
0x2084   :  { %v3651_v40 = vsel %vm311_vm6, %v3645_v38, 0.0 }
0x2085   :  { %3652 = vadd.xlane.f32.xlu0 %v3651_v40  ;;  %v3648_v41 = vsel %vm311_vm6, %v3644_v39, 0.0  ;;  %v7477_v40 = vld [vmem:[%s11309_s10 + $0x130] sm:$0xff] }
0x2086   :  { %3649 = vadd.xlane.f32.xlu1 %v3648_v41  ;;  %v7478_v41 = vld [vmem:[%s11309_s10 + $0x138] sm:$0xff] }
0x2112   :  { %v3653_v42 = vpop.xlane.xlu0 %3652 }
0x2113   :  { %v3655_v43 = vmul.f32 0.015625, %v3653_v42  ;;  %v3650_v44 = vpop.xlane.xlu1 %3649  ;;  %v9301_v42 = vpack.c.bf16 %v7478_v41, %v7477_v40  ;;  %v7513_v41 = vld [vmem:[%s11308_s0 + $0x170] sm:$0xff] }
0x2114   :  { %v3654_v45 = vmul.f32 0.015625, %v3650_v44  ;;  %v7492_v44 = vld [vmem:[%s11268_s12 + $0x4] ss:$0 sm:$0xff] }
0x2115   :  { %v10521_v46 = vsub.f32 %v3645_v38, %v3655_v43  ;;  %v7476_v38 = vld [vmem:[%s11309_s10 + $0x128] sm:$0xff]  ;;  %v7468_v43 = vld [vmem:[%s11312_s4 + $0x4] ss:$0 sm:$0xff] }
0x2116   :  { %v10523_v47 = vsub.f32 %v3644_v39, %v3654_v45  ;;  %v9297_v39 = vpack.c.bf16 %v7476_v38, %v7475_v37  ;;  %v7511_v38 = vld [vmem:[%s11308_s0 + $0x160] sm:$0xff] }
0x2117   :  { %v3659_v49 = vmul.f32 %v10521_v46, %v10521_v46 }
0x2118   :  { %v3658_v10 = vmul.f32 %v10523_v47, %v10523_v47 }
0x2119   :  { %v3663_v48 = vsel %vm311_vm6, %v3659_v49, 0.0 }
0x211a   :  { %3664 = vadd.xlane.f32.xlu0 %v3663_v48  ;;  %v3660_v50 = vsel %vm311_vm6, %v3658_v10, 0.0 }
0x211b   :  { %3661 = vadd.xlane.f32.xlu1 %v3660_v50 }
0x21a7   :  { %v3665_v16 = vpop.xlane.xlu0 %3664 }
0x21a8   :  { %v3667_v18 = vmul.f32 0.015625, %v3665_v16  ;;  %v3662_v20 = vpop.xlane.xlu1 %3661 }
0x21a9   :  { %v3666_v21 = vmul.f32 0.015625, %v3662_v20 }
0x21aa   :  { %v3669_v22 = vadd.f32 1e-12, %v3667_v18 }
0x21ab   :  { %v3668_v23 = vadd.f32 1e-12, %v3666_v21 }
0x21ac   :  { %9612 = vrsqrt.f32 %v3669_v22 }
0x21ad   :  { %9614 = vrsqrt.f32 %v3668_v23  ;;  %v7507_v23 = vld [vmem:[%s11308_s0 + $0x140] sm:$0xff] }
0x21b6   :  { %v9613_v25 = vpop.eup %9612 }
0x21b7   :  { %v9615_v27 = vpop.eup %9614  ;;  %v3673_v28 = vmul.f32 %v9613_v25, %v10521_v46  ;;  %v7508_v25 = vld [vmem:[%s11308_s0 + $0x148] sm:$0xff] }
0x21b8   :  { %v3672_v24 = vmul.f32 %v9615_v27, %v10523_v47  ;;  %v4143_v27 = vld [vmem:[#allocation2] sm:$0xff] }
0x21b9   :  { %v3681_v30 = vmul.f32 %v7455_v26, %v3673_v28 }
0x21ba   :  { %v3680_v31 = vmul.f32 %v7455_v26, %v3672_v24  ;;  %v9327_v26 = vpack.c.bf16 %v7508_v25, %v7507_v23 }
0x21bb   :  { %v10602_v35 = vadd.f32 %v7456_v29, %v3681_v30 }
0x21bc   :  { %v10600_v34 = vadd.f32 %v7456_v29, %v3680_v31  ;;  %v7509_v31 = vld [vmem:[%s11308_s0 + $0x150] sm:$0xff] }
0x21bd   :  { %v9331_v37 = vpack.c.bf16 %v7510_v32, %v7509_v31 }
0x21be   :  { %8576 = vmatprep.mubr.msk.f32.mxu1 %vm311_vm6, %v10600_v34  ;;  %8614 = vmatprep.mubr.msk.f32.mxu0 %vm311_vm6, %v10600_v34 }
0x21bf   :  { %8577 = vmatmul.mubr.msk.f32.vlgmr.msra.gmra.mrb[28].mxu1 %vm311_vm6, %v10602_v35  ;;  %8615 = vmatmul.mubr.msk.f32.vlgmr.msra.gmra.mrb[50].mxu0 %vm311_vm6, %v10602_v35 }
0x21c0   :  { %9292 = vmatpush3.bf16.msra.mxu1 %v9289_v15  ;;  %8595 = vmatprep.mubr.msk.f32.mxu1 %vm311_vm6, %v10600_v34 }
0x21c1   :  { %9294 = vmatprep.subr.bf16.mxu1 %v9293_v36  ;;  %8624 = vmatprep.mubr.msk.f32.mxu0 %vm9684_vm7, %v9683_v17 }
0x21c4   :  { %9296 = vmatpush3.bf16.msra.mxu1 %v9293_v36 }
0x21c5   :  { %9298 = vmatprep.subr.bf16.mxu1 %v9297_v39 }
0x21c8   :  { %9300 = vmatpush3.bf16.msra.mxu1 %v9297_v39  ;;  %v7512_v39 = vld [vmem:[%s11308_s0 + $0x168] sm:$0xff] }
0x21c9   :  { %9302 = vmatprep.subr.bf16.mxu1 %v9301_v42  ;;  %v9335_v40 = vpack.c.bf16 %v7512_v39, %v7511_v38 }
0x21cc   :  { %9304 = vmatpush3.bf16.msra.mxu1 %v9301_v42  ;;  %v7514_v42 = vld [vmem:[%s11308_s0 + $0x178] sm:$0xff] }
0x21cd   :  { %8617 = vmatprep.subr.mxu1 %v9683_v17 }
0x21cf   :  { %8596 = vmatmul.mubr.msk.f32.vlgmr.msra.gmra.mrb[30].mxu1 %vm311_vm6, %v10602_v35 }
0x21d0   :  { %8619 = vmatprep.mubr.msk.f32.mxu1 %vm9684_vm7, %v9683_v17 }
0x2292   :  { %v8578_v45 = vpop.f32.mrb[28].mxu1  ;;  %v8616_v46 = vpop.f32.mrb[50].mxu0 }
0x2293   :  { %v3795_v47 = vadd.f32 %v8578_v45, %v7468_v43  ;;  %v3979_v49 = vadd.f32 %v8616_v46, %v7492_v44  ;;  %v3789_v10 = vpop.f32.mrb[29].mxu1  ;;  %v3973_v48 = vpop.f32.mrb[51].mxu0  ;;  %v7532_v45 = vld [vmem:[%s11267_s11 + $0x148] sm:$0xff] }
0x2294   :  { %v3974_v50 = vadd.f32 %v7492_v44, %v3973_v48  ;;  %v3790_v56 = vadd.f32 %v7468_v43, %v3789_v10  ;;  %v9339_v43 = vpack.c.bf16 %v7514_v42, %v7513_v41  ;;  %v7531_v44 = vld [vmem:[%s11267_s11 + $0x140] sm:$0xff]  ;;  %v7547_v41 = vld [vmem:[%s11269_s13 + $0x58] sm:$0xff] }
0x2295   :  { %v9359_v46 = vpack.c.bf16 %v7532_v45, %v7531_v44  ;;  %v7535_v48 = vld [vmem:[%s11267_s11 + $0x160] sm:$0xff] }
0x2296   :  { %8623 = vmatpush3.msra.mxu0 %v3974_v50  ;;  %v7536_v50 = vld [vmem:[%s11267_s11 + $0x168] sm:$0xff] }
0x2297   :  { %8634 = vmatprep.subr.mxu0 %v9683_v17 }
0x22a2   :  { %v8597_v52 = vpop.f32.mrb[30].mxu1 }
0x22a3   :  { %v3887_v53 = vadd.f32 %v8597_v52, %v7480_v51  ;;  %v3881_v54 = vpop.f32.mrb[31].mxu1  ;;  %v7537_v52 = vld [vmem:[%s11267_s11 + $0x170] sm:$0xff] }
0x22a4   :  { %v3882_v55 = vadd.f32 %v7480_v51, %v3881_v54  ;;  %v9367_v51 = vpack.c.bf16 %v7536_v50, %v7535_v48 }
0x22a6   :  { %8618 = vmatpush3.xpose.msk.msra.mxu1 %vm138_vm0, %v3882_v55  ;;  %v7519_v55 = vld [vmem:[%s11309_s10 + $0x140] sm:$0xff] }
0x22a7   :  { %9321 = vmatprep.subr.bf16.mxu1 %v9685_v58 }
0x22a9   :  { %8620 = vmatmul.mubr.msk.f32.vlgmr.msra.gmra.mrb[32].mxu1 %vm138_vm0, %v3790_v56  ;;  %v7520_v56 = vld [vmem:[%s11309_s10 + $0x148] sm:$0xff] }
0x22aa   :  { %8631 = vmatprep.mubr.msk.f32.mxu1 %vm9684_vm7, %v9683_v17  ;;  %9323 = vmatpush3.bf16.msra.mxu1 %v9322_v4 }
0x22ab   :  { %8639 = vmatprep.subr.mxu1 %v9683_v17 }
0x237c   :  { %v4054_v57 = vpop.f32.mrb[32].mxu1 }
0x237d   :  { %v4058_v59 = vmul.f32 0.25, %v4054_v57  ;;  %v8621_v60 = vpop.f32.mrb[33].mxu1  ;;  %v9343_v57 = vpack.c.bf16 %v7520_v56, %v7519_v55 }
0x237e   :  { %v7522_v60 = vld [vmem:[%s11309_s10 + $0x158] sm:$0xff] }
0x237f   :  { %v4059_v61 = vsel %vm717_vm8, %v4058_v59, -inf }
0x2380   :  { %4060 = vmax.xlane.f32.xlu1 %v4059_v61 }
0x240d   :  { %v4061_v62 = vpop.xlane.xlu1 %4060 }
0x240e   :  { %v4062_v19 = vsub.f32 %v4058_v59, %v4061_v62  ;;  %v7521_v59 = vld [vmem:[%s11309_s10 + $0x150] sm:$0xff] }
0x240f   :  { %v9347_v61 = vpack.c.bf16 %v7522_v60, %v7521_v59  ;;  %v7555_v60 = vld [vmem:[%s11308_s0 + $0x180] sm:$0xff] }
0x2410   :  { %v4063_v63 = vmul.f32 1.442695, %v4062_v19  ;;  %v7523_v19 = vld [vmem:[%s11309_s10 + $0x160] sm:$0xff] }
0x2412   :  { %9616 = vpow2.f32 %v4063_v63  ;;  %v7524_v63 = vld [vmem:[%s11309_s10 + $0x168] sm:$0xff] }
0x241c   :  { %v9617_v0 = vpop.eup %9616 }
0x241d   :  { %v4065_v1 = vsel %vm717_vm8, %v9617_v0, 0.0 }
0x241e   :  { %4066 = vadd.xlane.f32.xlu0 %v4065_v1  ;;  %v9351_v1 = vpack.c.bf16 %v7524_v63, %v7523_v19  ;;  %v7557_v63 = vld [vmem:[%s11308_s0 + $0x190] sm:$0xff] }
0x24ab   :  { %v4067_v5 = vpop.xlane.xlu0 %4066 }
0x24ac   :  { %9618 = vrcp.f32 %v4067_v5  ;;  %v7516_v5 = vld [vmem:[%s11312_s4 + $0x5] ss:$0 sm:$0xff] }
0x24b6   :  { %v9619_v6 = vpop.eup %9618 }
0x24b7   :  { %v4069_v7 = vmul.f32 %v9619_v6, %v9617_v0 }
0x24b9   :  { %8625 = vmatmul.mubr.msk.f32.vlgmr.msra.gmra.mrb[52].mxu0 %vm717_vm8, %v4069_v7 }
0x24ba   :  { %8635 = vmatpush3.xpose.msk.msra.mxu0 %vm138_vm0, %v3887_v53  ;;  %8636 = vmatprep.mubr.msk.f32.mxu0 %vm9684_vm7, %v9683_v17  ;;  %v7538_v53 = vld [vmem:[%s11267_s11 + $0x178] sm:$0xff] }
0x24bb   :  { %9324 = vmatprep.subr.bf16.mxu0 %v9685_v58  ;;  %v9371_v54 = vpack.c.bf16 %v7538_v53, %v7537_v52 }
0x24bd   :  { %8637 = vmatmul.mubr.msk.f32.vlgmr.msra.gmra.mrb[54].mxu0 %vm138_vm0, %v3795_v47  ;;  %v7533_v47 = vld [vmem:[%s11267_s11 + $0x150] sm:$0xff] }
0x24be   :  { %9326 = vmatpush3.bf16.msra.mxu0 %v9322_v4  ;;  %8648 = vmatprep.mubr.msk.f32.mxu0 %vm9684_vm7, %v9683_v17  ;;  %v9355_v4 = vpack.c.bf16 %v7526_v3, %v7525_v2 }
0x24bf   :  { %9344 = vmatprep.subr.bf16.mxu0 %v9343_v57 }
0x258c   :  { %v4139_v9 = vpop.f32.mrb[52].mxu0 }
0x258d   :  { %v8626_v11 = vpop.f32.mrb[53].mxu0  ;;  %8632 = vmatmul.mubr.msk.f32.vlgmr.msra.gmra.mrb[34].mxu1 %vm138_vm0, %v4139_v9 }
0x258e   :  { %8640 = vmatpush3.msra.mxu1 %v3979_v49  ;;  %8641 = vmatprep.mubr.msk.f32.mxu1 %vm9684_vm7, %v9683_v17  ;;  %v7534_v49 = vld [vmem:[%s11267_s11 + $0x158] sm:$0xff]  ;;  %v7540_v11 = vld [vmem:[%s11268_s12 + $0x5] ss:$0 sm:$0xff] }
0x258f   :  { %9328 = vmatprep.subr.bf16.mxu1 %v9327_v26  ;;  %v9363_v10 = vpack.c.bf16 %v7534_v49, %v7533_v47 }
0x2590   :  { %v4294_v12 = vpop.f32.mrb[54].mxu0 }
0x2591   :  { %v4298_v13 = vmul.f32 0.25, %v4294_v12  ;;  %v8638_v14 = vpop.f32.mrb[55].mxu0 }
0x2593   :  { %v4299_v15 = vsel %vm717_vm8, %v4298_v13, -inf }
0x2594   :  { %4300 = vmax.xlane.f32.xlu1 %v4299_v15 }
0x2621   :  { %v4301_v16 = vpop.xlane.xlu1 %4300 }
0x2622   :  { %v4302_v18 = vsub.f32 %v4298_v13, %v4301_v16  ;;  %v4383_v16 = vld [vmem:[#allocation2 + $0x8] sm:$0xff] }
0x2624   :  { %v4303_v20 = vmul.f32 1.442695, %v4302_v18 }
0x2626   :  { %9620 = vpow2.f32 %v4303_v20 }
0x2630   :  { %v9621_v21 = vpop.eup %9620 }
0x2631   :  { %v4305_v22 = vsel %vm717_vm8, %v9621_v21, 0.0 }
0x2632   :  { %4306 = vadd.xlane.f32.xlu0 %v4305_v22  ;;  %v7528_v22 = vld [vmem:[%s11313_s30 + $0x5] ss:$0 sm:$0xff] }
0x2660   :  { %v4216_v28 = vpop.f32.mrb[34].mxu1 }
0x2661   :  { %v4220_v24 = vadd.f32 %v4216_v28, %v4143_v27  ;;  %v8633_v29 = vpop.f32.mrb[35].mxu1 }
0x2663   :  { %4221 = vst.msk [vmem:[#allocation2] sm:$0xff] %vm311_vm6, %v4220_v24 }
0x266a   :  { %v4898_v47 = vld [vmem:[#allocation2] sm:$0xff] }
0x26bf   :  { %v4307_v30 = vpop.xlane.xlu0 %4306 }
0x26c0   :  { %9622 = vrcp.f32 %v4307_v30 }
0x26ca   :  { %v9623_v33 = vpop.eup %9622 }
0x26cb   :  { %v4309_v36 = vmul.f32 %v9623_v33, %v9621_v21 }
0x26cd   :  { %8642 = vmatmul.mubr.msk.f32.vlgmr.msra.gmra.mrb[36].mxu1 %vm717_vm8, %v4309_v36 }
0x26ce   :  { %9330 = vmatpush3.bf16.msra.mxu1 %v9327_v26  ;;  %8667 = vmatprep.mubr.msk.f32.mxu1 %vm311_vm6, %v10600_v34 }
0x26cf   :  { %9332 = vmatprep.subr.bf16.mxu1 %v9331_v37 }
0x26d2   :  { %9334 = vmatpush3.bf16.msra.mxu1 %v9331_v37 }
0x26d3   :  { %9336 = vmatprep.subr.bf16.mxu1 %v9335_v40 }
0x26d6   :  { %9338 = vmatpush3.bf16.msra.mxu1 %v9335_v40  ;;  %v7546_v40 = vld [vmem:[%s11269_s13 + $0x50] sm:$0xff] }
0x26d7   :  { %9340 = vmatprep.subr.bf16.mxu1 %v9339_v43 }
0x26da   :  { %9342 = vmatpush3.bf16.msra.mxu1 %v9339_v43  ;;  %v9376_v43 = vpack.c.bf16 %v7547_v41, %v7546_v40  ;;  %v7574_v40 = vld [vmem:[%s11309_s10 + $0x1b8] sm:$0xff] }
0x26db   :  { %9360 = vmatprep.subr.bf16.mxu1 %v9359_v46 }
0x26dd   :  { %8668 = vmatmul.mubr.msk.f32.vlgmr.msra.gmra.mrb[38].mxu1 %vm311_vm6, %v10602_v35 }
0x26de   :  { %9362 = vmatpush3.bf16.msra.mxu1 %v9359_v46  ;;  %8705 = vmatprep.mubr.msk.f32.mxu1 %vm311_vm6, %v10600_v34 }
0x26df   :  { %9364 = vmatprep.subr.bf16.mxu1 %v9363_v10 }
0x26e2   :  { %9366 = vmatpush3.bf16.msra.mxu1 %v9363_v10 }
0x26e3   :  { %9368 = vmatprep.subr.bf16.mxu1 %v9367_v51 }
0x26e6   :  { %9370 = vmatpush3.bf16.msra.mxu1 %v9367_v51 }
0x26e7   :  { %9372 = vmatprep.subr.bf16.mxu1 %v9371_v54 }
0x26ea   :  { %9374 = vmatpush3.bf16.msra.mxu1 %v9371_v54 }
0x26eb   :  { %8730 = vmatprep.subr.mxu1 %v9683_v17 }
0x26ed   :  { %8706 = vmatmul.mubr.msk.f32.vlgmr.msra.gmra.mrb[40].mxu1 %vm311_vm6, %v10602_v35 }
0x26ee   :  { %8732 = vmatprep.mubr.msk.f32.mxu1 %vm9684_vm7, %v9683_v17 }
0x27a0   :  { %v4379_v62 = vpop.f32.mrb[36].mxu1 }
0x27a1   :  { %v8643_v0 = vpop.f32.mrb[37].mxu1  ;;  %8649 = vmatmul.mubr.msk.f32.vlgmr.msra.gmra.mrb[56].mxu0 %vm138_vm0, %v4379_v62 }
0x27a2   :  { %9346 = vmatpush3.bf16.msra.mxu0 %v9343_v57  ;;  %8686 = vmatprep.mubr.msk.f32.mxu0 %vm311_vm6, %v10600_v34  ;;  %v7558_v0 = vld [vmem:[%s11308_s0 + $0x198] sm:$0xff] }
0x27a3   :  { %9348 = vmatprep.subr.bf16.mxu0 %v9347_v61  ;;  %v9385_v3 = vpack.c.bf16 %v7558_v0, %v7557_v63 }
0x27a6   :  { %9350 = vmatpush3.bf16.msra.mxu0 %v9347_v61  ;;  %v7556_v61 = vld [vmem:[%s11308_s0 + $0x188] sm:$0xff] }
0x27a7   :  { %9352 = vmatprep.subr.bf16.mxu0 %v9351_v1  ;;  %v9381_v62 = vpack.c.bf16 %v7556_v61, %v7555_v60 }
0x27aa   :  { %9354 = vmatpush3.bf16.msra.mxu0 %v9351_v1 }
0x27ab   :  { %9356 = vmatprep.subr.bf16.mxu0 %v9355_v4 }
0x27ae   :  { %9358 = vmatpush3.bf16.msra.mxu0 %v9355_v4  ;;  %v7559_v4 = vld [vmem:[%s11308_s0 + $0x1a0] sm:$0xff] }
0x27af   :  { %8708 = vmatprep.subr.mxu0 %v9683_v17 }
0x27b0   :  { %v8669_v6 = vpop.f32.mrb[38].mxu1 }
0x27b1   :  { %v4550_v7 = vadd.f32 %v8669_v6, %v7516_v5  ;;  %v4544_v9 = vpop.f32.mrb[39].mxu1  ;;  %8687 = vmatmul.mubr.msk.f32.vlgmr.msra.gmra.mrb[58].mxu0 %vm311_vm6, %v10602_v35 }
0x27b2   :  { %8710 = vmatprep.mubr.msk.f32.mxu0 %vm9684_vm7, %v9683_v17  ;;  %v4545_v28 = vadd.f32 %v7516_v5, %v4544_v9  ;;  %v7560_v5 = vld [vmem:[%s11308_s0 + $0x1a8] sm:$0xff]  ;;  %v7562_v9 = vld [vmem:[%s11308_s0 + $0x1b8] sm:$0xff] }
0x27b3   :  { %v9389_v6 = vpack.c.bf16 %v7560_v5, %v7559_v4 }
0x27c0   :  { %v8707_v12 = vpop.f32.mrb[40].mxu1 }
0x27c1   :  { %v4734_v13 = vadd.f32 %v8707_v12, %v7540_v11  ;;  %v4728_v14 = vpop.f32.mrb[41].mxu1  ;;  %v7579_v12 = vld [vmem:[%s11267_s11 + $0x180] sm:$0xff] }
0x27c2   :  { %v4729_v15 = vadd.f32 %v7540_v11, %v4728_v14 }
0x27c3   :  { %8731 = vmatpush3.msra.mxu1 %v4734_v13  ;;  %v7580_v13 = vld [vmem:[%s11267_s11 + $0x188] sm:$0xff] }
0x27c4   :  { %9382 = vmatprep.subr.bf16.mxu1 %v9381_v62  ;;  %v9413_v14 = vpack.c.bf16 %v7580_v13, %v7579_v12 }
0x2874   :  { %v4455_v18 = vpop.f32.mrb[56].mxu0 }
0x2875   :  { %v4459_v20 = vadd.f32 %v4455_v18, %v4383_v16  ;;  %v8650_v21 = vpop.f32.mrb[57].mxu0  ;;  %v7582_v16 = vld [vmem:[%s11267_s11 + $0x198] sm:$0xff] }
0x2876   :  { %v7584_v21 = vld [vmem:[%s11267_s11 + $0x1a8] sm:$0xff] }
0x2877   :  { %4460 = vst.msk [vmem:[#allocation2 + $0x8] sm:$0xff] %vm311_vm6, %v4459_v20  ;;  %v7583_v20 = vld [vmem:[%s11267_s11 + $0x1a0] sm:$0xff] }
0x2884   :  { %v8688_v23 = vpop.f32.mrb[58].mxu0 }
0x2885   :  { %v4642_v25 = vadd.f32 %v8688_v23, %v7528_v22  ;;  %v4636_v26 = vpop.f32.mrb[59].mxu0  ;;  %v7585_v23 = vld [vmem:[%s11267_s11 + $0x1b0] sm:$0xff] }
0x2886   :  { %v4637_v27 = vadd.f32 %v7528_v22, %v4636_v26  ;;  %v9421_v22 = vpack.c.bf16 %v7584_v21, %v7583_v20 }
0x2888   :  { %8709 = vmatpush3.xpose.msk.msra.mxu0 %vm138_vm0, %v4637_v27  ;;  %v7567_v27 = vld [vmem:[%s11309_s10 + $0x180] sm:$0xff] }
0x2889   :  { %8713 = vmatprep.subr.mxu0 %v9683_v17 }
0x288b   :  { %8711 = vmatmul.mubr.msk.f32.vlgmr.msra.gmra.mrb[60].mxu0 %vm138_vm0, %v4545_v28  ;;  %v7568_v28 = vld [vmem:[%s11309_s10 + $0x188] sm:$0xff] }
0x288c   :  { %8714 = vmatpush3.msra.mxu0 %v4729_v15  ;;  %8715 = vmatprep.mubr.msk.f32.mxu0 %vm9684_vm7, %v9683_v17  ;;  %v7581_v15 = vld [vmem:[%s11267_s11 + $0x190] sm:$0xff] }
0x288d   :  { %9375 = vmatprep.subr.bf16.mxu0 %v9685_v58  ;;  %v9417_v18 = vpack.c.bf16 %v7582_v16, %v7581_v15 }
0x295e   :  { %v4809_v24 = vpop.f32.mrb[60].mxu0 }
0x295f   :  { %v4813_v29 = vmul.f32 0.25, %v4809_v24  ;;  %v8712_v30 = vpop.f32.mrb[61].mxu0  ;;  %v9397_v24 = vpack.c.bf16 %v7568_v28, %v7567_v27 }
0x2960   :  { %v7570_v30 = vld [vmem:[%s11309_s10 + $0x198] sm:$0xff] }
0x2961   :  { %v4814_v31 = vsel %vm717_vm8, %v4813_v29, -inf }
0x2962   :  { %4815 = vmax.xlane.f32.xlu1 %v4814_v31 }
0x29ef   :  { %v4816_v32 = vpop.xlane.xlu1 %4815 }
0x29f0   :  { %v4817_v33 = vsub.f32 %v4813_v29, %v4816_v32  ;;  %v7569_v29 = vld [vmem:[%s11309_s10 + $0x190] sm:$0xff] }
0x29f1   :  { %v9401_v31 = vpack.c.bf16 %v7570_v30, %v7569_v29  ;;  %v7603_v30 = vld [vmem:[%s11308_s0 + $0x1c0] sm:$0xff] }
0x29f2   :  { %v4818_v36 = vmul.f32 1.442695, %v4817_v33  ;;  %v7571_v33 = vld [vmem:[%s11309_s10 + $0x1a0] sm:$0xff] }
0x29f4   :  { %9624 = vpow2.f32 %v4818_v36  ;;  %v7572_v36 = vld [vmem:[%s11309_s10 + $0x1a8] sm:$0xff] }
0x29fe   :  { %v9625_v37 = vpop.eup %9624 }
0x29ff   :  { %v4820_v38 = vsel %vm717_vm8, %v9625_v37, 0.0 }
0x2a00   :  { %4821 = vadd.xlane.f32.xlu0 %v4820_v38  ;;  %v9405_v38 = vpack.c.bf16 %v7572_v36, %v7571_v33  ;;  %v7605_v36 = vld [vmem:[%s11308_s0 + $0x1d0] sm:$0xff] }
0x2a8d   :  { %v4822_v39 = vpop.xlane.xlu0 %4821 }
0x2a8e   :  { %9626 = vrcp.f32 %v4822_v39  ;;  %v7573_v39 = vld [vmem:[%s11309_s10 + $0x1b0] sm:$0xff] }
0x2a8f   :  { %v9409_v41 = vpack.c.bf16 %v7574_v40, %v7573_v39 }
0x2a98   :  { %v9627_v42 = vpop.eup %9626 }
0x2a99   :  { %v4824_v44 = vmul.f32 %v9627_v42, %v9625_v37  ;;  %v7564_v42 = vld [vmem:[%s11312_s4 + $0x6] ss:$0 sm:$0xff] }
0x2a9b   :  { %8716 = vmatmul.mubr.msk.f32.vlgmr.msra.gmra.mrb[62].mxu0 %vm717_vm8, %v4824_v44 }
0x2a9c   :  { %9377 = vmatpush3.bf16.msra.mxu0 %v9376_v43  ;;  %8722 = vmatprep.mubr.msk.f32.mxu0 %vm9684_vm7, %v9683_v17 }
0x2a9d   :  { %8725 = vmatprep.subr.mxu0 %v9683_v17 }
0x2b6e   :  { %v4894_v45 = vpop.f32.mrb[62].mxu0 }
0x2b6f   :  { %v8717_v46 = vpop.f32.mrb[63].mxu0  ;;  %8723 = vmatmul.mubr.msk.f32.vlgmr.msra.gmra.mrb[64].mxu0 %vm138_vm0, %v4894_v45 }
0x2b70   :  { %8726 = vmatpush3.xpose.msk.msra.mxu0 %vm138_vm0, %v4642_v25  ;;  %8727 = vmatprep.mubr.msk.f32.mxu0 %vm9684_vm7, %v9683_v17  ;;  %v7586_v25 = vld [vmem:[%s11267_s11 + $0x1b8] sm:$0xff]  ;;  %v7588_v46 = vld [vmem:[%s11268_s12 + $0x6] ss:$0 sm:$0xff] }
0x2b71   :  { %9378 = vmatprep.subr.bf16.mxu0 %v9685_v58  ;;  %v9425_v26 = vpack.c.bf16 %v7586_v25, %v7585_v23 }
0x2b73   :  { %8728 = vmatmul.mubr.msk.f32.vlgmr.msra.gmra.mrb[66].mxu0 %vm138_vm0, %v4550_v7  ;;  %v7561_v7 = vld [vmem:[%s11308_s0 + $0x1b0] sm:$0xff] }
0x2b74   :  { %9380 = vmatpush3.bf16.msra.mxu0 %v9376_v43  ;;  %8739 = vmatprep.mubr.msk.f32.mxu0 %vm9684_vm7, %v9683_v17  ;;  %v9393_v11 = vpack.c.bf16 %v7562_v9, %v7561_v7  ;;  %v7595_v7 = vld [vmem:[%s11269_s13 + $0x68] sm:$0xff] }
0x2b75   :  { %9398 = vmatprep.subr.bf16.mxu0 %v9397_v24 }
0x2c42   :  { %v4971_v49 = vpop.f32.mrb[64].mxu0 }
0x2c43   :  { %v4975_v10 = vadd.f32 %v4971_v49, %v4898_v47  ;;  %v8724_v48 = vpop.f32.mrb[65].mxu0 }
0x2c45   :  { %4976 = vst.msk [vmem:[#allocation2] sm:$0xff] %vm311_vm6, %v4975_v10 }
0x2c46   :  { %v5049_v50 = vpop.f32.mrb[66].mxu0 }
0x2c47   :  { %v5053_v51 = vmul.f32 0.25, %v5049_v50  ;;  %v8729_v52 = vpop.f32.mrb[67].mxu0  ;;  %v5138_v50 = vld [vmem:[#allocation2 + $0x8] sm:$0xff] }
0x2c49   :  { %v5054_v53 = vsel %vm717_vm8, %v5053_v51, -inf }
0x2c4a   :  { %5055 = vmax.xlane.f32.xlu1 %v5054_v53 }
0x2c4c   :  { %v5653_v15 = vld [vmem:[#allocation2] sm:$0xff] }
0x2cd7   :  { %v5056_v54 = vpop.xlane.xlu1 %5055 }
0x2cd8   :  { %v5057_v55 = vsub.f32 %v5053_v51, %v5056_v54  ;;  %v7576_v54 = vld [vmem:[%s11313_s30 + $0x6] ss:$0 sm:$0xff] }
0x2cda   :  { %v5058_v56 = vmul.f32 1.442695, %v5057_v55 }
0x2cdc   :  { %9628 = vpow2.f32 %v5058_v56 }
0x2ce6   :  { %v9629_v57 = vpop.eup %9628 }
0x2ce7   :  { %v5060_v59 = vsel %vm717_vm8, %v9629_v57, 0.0 }
0x2ce8   :  { %5061 = vadd.xlane.f32.xlu0 %v5060_v59 }
0x2d75   :  { %v5062_v19 = vpop.xlane.xlu0 %5061 }
0x2d76   :  { %9630 = vrcp.f32 %v5062_v19 }
0x2d80   :  { %v9631_v1 = vpop.eup %9630 }
0x2d81   :  { %v5064_v2 = vmul.f32 %v9631_v1, %v9629_v57 }
0x2d83   :  { %8733 = vmatmul.mubr.msk.f32.vlgmr.msra.gmra.mrb[42].mxu1 %vm717_vm8, %v5064_v2 }
0x2d84   :  { %9384 = vmatpush3.bf16.msra.mxu1 %v9381_v62  ;;  %8758 = vmatprep.mubr.msk.f32.mxu1 %vm311_vm6, %v10600_v34 }
0x2d85   :  { %9386 = vmatprep.subr.bf16.mxu1 %v9385_v3 }
0x2d88   :  { %9388 = vmatpush3.bf16.msra.mxu1 %v9385_v3 }
0x2d89   :  { %9390 = vmatprep.subr.bf16.mxu1 %v9389_v6 }
0x2d8c   :  { %9392 = vmatpush3.bf16.msra.mxu1 %v9389_v6  ;;  %v7594_v6 = vld [vmem:[%s11269_s13 + $0x60] sm:$0xff] }
0x2d8d   :  { %9394 = vmatprep.subr.bf16.mxu1 %v9393_v11 }
0x2d90   :  { %9396 = vmatpush3.bf16.msra.mxu1 %v9393_v11  ;;  %v9430_v11 = vpack.c.bf16 %v7595_v7, %v7594_v6  ;;  %v7622_v6 = vld [vmem:[%s11309_s10 + $0x1f8] sm:$0xff] }
0x2d91   :  { %9414 = vmatprep.subr.bf16.mxu1 %v9413_v14 }
0x2d93   :  { %8759 = vmatmul.mubr.msk.f32.vlgmr.msra.gmra.mrb[44].mxu1 %vm311_vm6, %v10602_v35 }
0x2d94   :  { %9416 = vmatpush3.bf16.msra.mxu1 %v9413_v14  ;;  %8796 = vmatprep.mubr.msk.f32.mxu1 %vm311_vm6, %v10600_v34 }
0x2d95   :  { %9418 = vmatprep.subr.bf16.mxu1 %v9417_v18 }
0x2d98   :  { %9420 = vmatpush3.bf16.msra.mxu1 %v9417_v18 }
0x2d99   :  { %9422 = vmatprep.subr.bf16.mxu1 %v9421_v22 }
0x2d9c   :  { %9424 = vmatpush3.bf16.msra.mxu1 %v9421_v22 }
0x2d9d   :  { %9426 = vmatprep.subr.bf16.mxu1 %v9425_v26 }
0x2da0   :  { %9428 = vmatpush3.bf16.msra.mxu1 %v9425_v26 }
0x2da1   :  { %8821 = vmatprep.subr.mxu1 %v9683_v17 }
0x2da3   :  { %8797 = vmatmul.mubr.msk.f32.vlgmr.msra.gmra.mrb[46].mxu1 %vm311_vm6, %v10602_v35 }
0x2da4   :  { %8823 = vmatprep.mubr.msk.f32.mxu1 %vm9684_vm7, %v9683_v17 }
0x2e56   :  { %v5134_v32 = vpop.f32.mrb[42].mxu1 }
0x2e57   :  { %v8734_v37 = vpop.f32.mrb[43].mxu1  ;;  %8740 = vmatmul.mubr.msk.f32.vlgmr.msra.gmra.mrb[68].mxu0 %vm138_vm0, %v5134_v32 }
0x2e58   :  { %9400 = vmatpush3.bf16.msra.mxu0 %v9397_v24  ;;  %8777 = vmatprep.mubr.msk.f32.mxu0 %vm311_vm6, %v10600_v34  ;;  %v7606_v37 = vld [vmem:[%s11308_s0 + $0x1d8] sm:$0xff] }
0x2e59   :  { %9402 = vmatprep.subr.bf16.mxu0 %v9401_v31  ;;  %v9439_v40 = vpack.c.bf16 %v7606_v37, %v7605_v36 }
0x2e5c   :  { %9404 = vmatpush3.bf16.msra.mxu0 %v9401_v31  ;;  %v7604_v31 = vld [vmem:[%s11308_s0 + $0x1c8] sm:$0xff] }
0x2e5d   :  { %9406 = vmatprep.subr.bf16.mxu0 %v9405_v38  ;;  %v9435_v32 = vpack.c.bf16 %v7604_v31, %v7603_v30 }
0x2e60   :  { %9408 = vmatpush3.bf16.msra.mxu0 %v9405_v38 }
0x2e61   :  { %9410 = vmatprep.subr.bf16.mxu0 %v9409_v41 }
0x2e64   :  { %9412 = vmatpush3.bf16.msra.mxu0 %v9409_v41  ;;  %v7607_v41 = vld [vmem:[%s11308_s0 + $0x1e0] sm:$0xff] }
0x2e65   :  { %8799 = vmatprep.subr.mxu0 %v9683_v17 }
0x2e66   :  { %v8760_v43 = vpop.f32.mrb[44].mxu1 }
0x2e67   :  { %v5305_v44 = vadd.f32 %v8760_v43, %v7564_v42  ;;  %v5299_v45 = vpop.f32.mrb[45].mxu1  ;;  %8778 = vmatmul.mubr.msk.f32.vlgmr.msra.gmra.mrb[70].mxu0 %vm311_vm6, %v10602_v35 }
0x2e68   :  { %8801 = vmatprep.mubr.msk.f32.mxu0 %vm9684_vm7, %v9683_v17  ;;  %v5300_v60 = vadd.f32 %v7564_v42, %v5299_v45  ;;  %v7608_v42 = vld [vmem:[%s11308_s0 + $0x1e8] sm:$0xff]  ;;  %v7610_v45 = vld [vmem:[%s11308_s0 + $0x1f8] sm:$0xff] }
0x2e69   :  { %v9443_v43 = vpack.c.bf16 %v7608_v42, %v7607_v41 }
0x2e76   :  { %v8798_v47 = vpop.f32.mrb[46].mxu1 }
0x2e77   :  { %v5489_v49 = vadd.f32 %v8798_v47, %v7588_v46  ;;  %v5483_v10 = vpop.f32.mrb[47].mxu1  ;;  %v7627_v47 = vld [vmem:[%s11267_s11 + $0x1c0] sm:$0xff] }
0x2e78   :  { %v5484_v48 = vadd.f32 %v7588_v46, %v5483_v10 }
0x2e79   :  { %8822 = vmatpush3.msra.mxu1 %v5489_v49  ;;  %v7628_v49 = vld [vmem:[%s11267_s11 + $0x1c8] sm:$0xff] }
0x2e7a   :  { %9436 = vmatprep.subr.bf16.mxu1 %v9435_v32  ;;  %v9467_v10 = vpack.c.bf16 %v7628_v49, %v7627_v47 }
0x2f2a   :  { %v5210_v51 = vpop.f32.mrb[68].mxu0 }
0x2f2b   :  { %v5214_v52 = vadd.f32 %v5210_v51, %v5138_v50  ;;  %v8741_v53 = vpop.f32.mrb[69].mxu0  ;;  %v7630_v50 = vld [vmem:[%s11267_s11 + $0x1d8] sm:$0xff] }
0x2f2c   :  { %v7632_v53 = vld [vmem:[%s11267_s11 + $0x1e8] sm:$0xff] }
0x2f2d   :  { %5215 = vst.msk [vmem:[#allocation2 + $0x8] sm:$0xff] %vm311_vm6, %v5214_v52  ;;  %v7631_v52 = vld [vmem:[%s11267_s11 + $0x1e0] sm:$0xff] }
0x2f3a   :  { %v8779_v55 = vpop.f32.mrb[70].mxu0 }
0x2f3b   :  { %v5397_v56 = vadd.f32 %v8779_v55, %v7576_v54  ;;  %v5391_v57 = vpop.f32.mrb[71].mxu0  ;;  %v7633_v55 = vld [vmem:[%s11267_s11 + $0x1f0] sm:$0xff] }
0x2f3c   :  { %v5392_v59 = vadd.f32 %v7576_v54, %v5391_v57  ;;  %v9475_v54 = vpack.c.bf16 %v7632_v53, %v7631_v52 }
0x2f3e   :  { %8800 = vmatpush3.xpose.msk.msra.mxu0 %vm138_vm0, %v5392_v59  ;;  %v7615_v59 = vld [vmem:[%s11309_s10 + $0x1c0] sm:$0xff] }
0x2f3f   :  { %8804 = vmatprep.subr.mxu0 %v9683_v17 }
0x2f41   :  { %8802 = vmatmul.mubr.msk.f32.vlgmr.msra.gmra.mrb[72].mxu0 %vm138_vm0, %v5300_v60  ;;  %v7616_v60 = vld [vmem:[%s11309_s10 + $0x1c8] sm:$0xff] }
0x2f42   :  { %8805 = vmatpush3.msra.mxu0 %v5484_v48  ;;  %8806 = vmatprep.mubr.msk.f32.mxu0 %vm9684_vm7, %v9683_v17  ;;  %v7629_v48 = vld [vmem:[%s11267_s11 + $0x1d0] sm:$0xff] }
0x2f43   :  { %9429 = vmatprep.subr.bf16.mxu0 %v9685_v58  ;;  %v9471_v51 = vpack.c.bf16 %v7630_v50, %v7629_v48 }
0x3014   :  { %v5564_v61 = vpop.f32.mrb[72].mxu0 }
0x3015   :  { %v5568_v62 = vmul.f32 0.25, %v5564_v61  ;;  %v8803_v19 = vpop.f32.mrb[73].mxu0  ;;  %v9451_v61 = vpack.c.bf16 %v7616_v60, %v7615_v59 }
0x3016   :  { %v7618_v19 = vld [vmem:[%s11309_s10 + $0x1d8] sm:$0xff] }
0x3017   :  { %v5569_v63 = vsel %vm717_vm8, %v5568_v62, -inf }
0x3018   :  { %5570 = vmax.xlane.f32.xlu1 %v5569_v63 }
0x30a5   :  { %v5571_v0 = vpop.xlane.xlu1 %5570 }
0x30a6   :  { %v5572_v1 = vsub.f32 %v5568_v62, %v5571_v0  ;;  %v7617_v62 = vld [vmem:[%s11309_s10 + $0x1d0] sm:$0xff] }
0x30a7   :  { %v9455_v63 = vpack.c.bf16 %v7618_v19, %v7617_v62 }
0x30a8   :  { %v5573_v2 = vmul.f32 1.442695, %v5572_v1  ;;  %v7619_v1 = vld [vmem:[%s11309_s10 + $0x1e0] sm:$0xff] }
0x30aa   :  { %9632 = vpow2.f32 %v5573_v2  ;;  %v7620_v2 = vld [vmem:[%s11309_s10 + $0x1e8] sm:$0xff] }
0x30b4   :  { %v9633_v3 = vpop.eup %9632 }
0x30b5   :  { %v5575_v4 = vsel %vm717_vm8, %v9633_v3, 0.0 }
0x30b6   :  { %5576 = vadd.xlane.f32.xlu0 %v5575_v4  ;;  %v9459_v4 = vpack.c.bf16 %v7620_v2, %v7619_v1 }
0x3143   :  { %v5577_v5 = vpop.xlane.xlu0 %5576 }
0x3144   :  { %9634 = vrcp.f32 %v5577_v5  ;;  %v7621_v5 = vld [vmem:[%s11309_s10 + $0x1f0] sm:$0xff] }
0x3145   :  { %v9463_v7 = vpack.c.bf16 %v7622_v6, %v7621_v5 }
0x314e   :  { %v9635_v9 = vpop.eup %9634 }
0x314f   :  { %v5579_v12 = vmul.f32 %v9635_v9, %v9633_v3  ;;  %v7612_v9 = vld [vmem:[%s11312_s4 + $0x7] ss:$0 sm:$0xff]  ;;  %s9670_s4 = scalar_lea.hbm %s11281_s25, 16 }
0x3150   :  { %p9671_p0 = scmp.ne.s32.totalorder %s11281_s25, %s9670_s4  ;;  %p9674_p1 = scmp.lt.u32.totalorder %s9670_s4, %s11281_s25 }
0x3151   :  { %8807 = vmatmul.mubr.msk.f32.vlgmr.msra.gmra.mrb[74].mxu0 %vm717_vm8, %v5579_v12 }
0x3152   :  { %9431 = vmatpush3.bf16.msra.mxu0 %v9430_v11  ;;  %8813 = vmatprep.mubr.msk.f32.mxu0 %vm9684_vm7, %v9683_v17  ;;  %p9676_p2 = pnand %p9674_p1, %p9671_p0 }
0x3153   :  { %8816 = vmatprep.subr.mxu0 %v9683_v17 }
0x3224   :  { %v5649_v13 = vpop.f32.mrb[74].mxu0 }
0x3225   :  { %v8808_v14 = vpop.f32.mrb[75].mxu0  ;;  %8814 = vmatmul.mubr.msk.f32.vlgmr.msra.gmra.mrb[76].mxu0 %vm138_vm0, %v5649_v13 }
0x3226   :  { %8817 = vmatpush3.xpose.msk.msra.mxu0 %vm138_vm0, %v5397_v56  ;;  %8818 = vmatprep.mubr.msk.f32.mxu0 %vm9684_vm7, %v9683_v17  ;;  %v7634_v56 = vld [vmem:[%s11267_s11 + $0x1f8] sm:$0xff]  ;;  %v7636_v14 = vld [vmem:[%s11268_s12 + $0x7] ss:$0 sm:$0xff] }
0x3227   :  { %9432 = vmatprep.subr.bf16.mxu0 %v9685_v58  ;;  %v9479_v57 = vpack.c.bf16 %v7634_v56, %v7633_v55 }
0x3229   :  { %8819 = vmatmul.mubr.msk.f32.vlgmr.msra.gmra.mrb[78].mxu0 %vm138_vm0, %v5305_v44  ;;  %v7609_v44 = vld [vmem:[%s11308_s0 + $0x1f0] sm:$0xff] }
0x322a   :  { %9434 = vmatpush3.bf16.msra.mxu0 %v9430_v11  ;;  %8830 = vmatprep.mubr.msk.f32.mxu0 %vm9684_vm7, %v9683_v17  ;;  %v9447_v46 = vpack.c.bf16 %v7610_v45, %v7609_v44  ;;  %v7643_v44 = vld [vmem:[%s11269_s13 + $0x78] sm:$0xff] }
0x322b   :  { %9452 = vmatprep.subr.bf16.mxu0 %v9451_v61 }
0x32f8   :  { %v5726_v16 = vpop.f32.mrb[76].mxu0 }
0x32f9   :  { %v5730_v18 = vadd.f32 %v5726_v16, %v5653_v15  ;;  %v8815_v20 = vpop.f32.mrb[77].mxu0 }
0x32fb   :  { %5731 = vst.msk [vmem:[#allocation2] sm:$0xff] %vm311_vm6, %v5730_v18 }
0x32fc   :  { %v5804_v21 = vpop.f32.mrb[78].mxu0 }
0x32fd   :  { %v5808_v22 = vmul.f32 0.25, %v5804_v21  ;;  %v8820_v23 = vpop.f32.mrb[79].mxu0  ;;  %v5893_v21 = vld [vmem:[#allocation2 + $0x8] sm:$0xff] }
0x32ff   :  { %v5809_v25 = vsel %vm717_vm8, %v5808_v22, -inf }
0x3300   :  { %5810 = vmax.xlane.f32.xlu1 %v5809_v25 }
0x3302   :  { %v6408_v48 = vld [vmem:[#allocation2] sm:$0xff] }
0x338d   :  { %v5811_v26 = vpop.xlane.xlu1 %5810 }
0x338e   :  { %v5812_v27 = vsub.f32 %v5808_v22, %v5811_v26  ;;  %v7624_v26 = vld [vmem:[%s11313_s30 + $0x7] ss:$0 sm:$0xff] }
0x3390   :  { %v5813_v28 = vmul.f32 1.442695, %v5812_v27 }
0x3392   :  { %9636 = vpow2.f32 %v5813_v28 }
0x339c   :  { %v9637_v24 = vpop.eup %9636 }
0x339d   :  { %v5815_v29 = vsel %vm717_vm8, %v9637_v24, 0.0 }
0x339e   :  { %5816 = vadd.xlane.f32.xlu0 %v5815_v29 }
0x342b   :  { %v5817_v33 = vpop.xlane.xlu0 %5816 }
0x342c   :  { %9638 = vrcp.f32 %v5817_v33 }
0x3436   :  { %v9639_v38 = vpop.eup %9638 }
0x3437   :  { %v5819_v39 = vmul.f32 %v9639_v38, %v9637_v24 }
0x3439   :  { %8824 = vmatmul.mubr.msk.f32.vlgmr.msra.gmra.mrb[48].mxu1 %vm717_vm8, %v5819_v39 }
0x343a   :  { %9438 = vmatpush3.bf16.msra.mxu1 %v9435_v32  ;;  %8849 = vmatprep.mubr.msk.f32.mxu1 %vm311_vm6, %v10600_v34 }
0x343b   :  { %9440 = vmatprep.subr.bf16.mxu1 %v9439_v40 }
0x343e   :  { %9442 = vmatpush3.bf16.msra.mxu1 %v9439_v40 }
0x343f   :  { %9444 = vmatprep.subr.bf16.mxu1 %v9443_v43 }
0x3442   :  { %9446 = vmatpush3.bf16.msra.mxu1 %v9443_v43  ;;  %v7642_v43 = vld [vmem:[%s11269_s13 + $0x70] sm:$0xff] }
0x3443   :  { %9448 = vmatprep.subr.bf16.mxu1 %v9447_v46 }
0x3446   :  { %9450 = vmatpush3.bf16.msra.mxu1 %v9447_v46  ;;  %v9484_v46 = vpack.c.bf16 %v7643_v44, %v7642_v43  ;;  %v7661_v44 = vld [vmem:[%s11273_s17 + $0x70] sm:$0xff] }
0x3447   :  { %9468 = vmatprep.subr.bf16.mxu1 %v9467_v10 }
0x3449   :  { %8850 = vmatmul.mubr.msk.f32.vlgmr.msra.gmra.mrb[50].mxu1 %vm311_vm6, %v10602_v35 }
0x344a   :  { %9470 = vmatpush3.bf16.msra.mxu1 %v9467_v10  ;;  %8887 = vmatprep.mubr.msk.f32.mxu1 %vm311_vm6, %v10600_v34 }
0x344b   :  { %9472 = vmatprep.subr.bf16.mxu1 %v9471_v51 }
0x344e   :  { %9474 = vmatpush3.bf16.msra.mxu1 %v9471_v51 }
0x344f   :  { %9476 = vmatprep.subr.bf16.mxu1 %v9475_v54 }
0x3452   :  { %9478 = vmatpush3.bf16.msra.mxu1 %v9475_v54 }
0x3453   :  { %9480 = vmatprep.subr.bf16.mxu1 %v9479_v57 }
0x3456   :  { %9482 = vmatpush3.bf16.msra.mxu1 %v9479_v57 }
0x3457   :  { %8912 = vmatprep.subr.mxu1 %v9683_v17 }
0x3459   :  { %8888 = vmatmul.mubr.msk.f32.vlgmr.msra.gmra.mrb[52].mxu1 %vm311_vm6, %v10602_v35 }
0x345a   :  { %8914 = vmatprep.mubr.msk.f32.mxu1 %vm9684_vm7, %v9683_v17 }
0x350c   :  { %v5889_v0 = vpop.f32.mrb[48].mxu1 }
0x350d   :  { %v8825_v3 = vpop.f32.mrb[49].mxu1  ;;  %8831 = vmatmul.mubr.msk.f32.vlgmr.msra.gmra.mrb[80].mxu0 %vm138_vm0, %v5889_v0 }
0x350e   :  { %9454 = vmatpush3.bf16.msra.mxu0 %v9451_v61  ;;  %8868 = vmatprep.mubr.msk.f32.mxu0 %vm311_vm6, %v10600_v34 }
0x350f   :  { %9456 = vmatprep.subr.bf16.mxu0 %v9455_v63 }
0x3512   :  { %9458 = vmatpush3.bf16.msra.mxu0 %v9455_v63 }
0x3513   :  { %9460 = vmatprep.subr.bf16.mxu0 %v9459_v4 }
0x3516   :  { %9462 = vmatpush3.bf16.msra.mxu0 %v9459_v4 }
0x3517   :  { %9464 = vmatprep.subr.bf16.mxu0 %v9463_v7 }
0x351a   :  { %9466 = vmatpush3.bf16.msra.mxu0 %v9463_v7 }
0x351b   :  { %8890 = vmatprep.subr.mxu0 %v9683_v17 }
0x351c   :  { %v8851_v11 = vpop.f32.mrb[50].mxu1 }
0x351d   :  { %v6060_v12 = vadd.f32 %v8851_v11, %v7612_v9  ;;  %v6054_v13 = vpop.f32.mrb[51].mxu1  ;;  %8869 = vmatmul.mubr.msk.f32.vlgmr.msra.gmra.mrb[82].mxu0 %vm311_vm6, %v10602_v35 }
0x351e   :  { %8892 = vmatprep.mubr.msk.f32.mxu0 %vm9684_vm7, %v9683_v17  ;;  %v6055_v30 = vadd.f32 %v7612_v9, %v6054_v13  ;;  %v7653_v13 = vld [vmem:[%s11271_s15 + $0x1] ss:$0 sm:$0xff] }
0x352c   :  { %v8889_v15 = vpop.f32.mrb[52].mxu1 }
0x352d   :  { %v6244_v16 = vadd.f32 %v8889_v15, %v7636_v14  ;;  %v6238_v18 = vpop.f32.mrb[53].mxu1  ;;  %v7654_v15 = vld [vmem:[%s11272_s16 + $0x1] ss:$0 sm:$0xff] }
0x352e   :  { %v6239_v20 = vadd.f32 %v7636_v14, %v6238_v18 }
0x352f   :  { %8913 = vmatpush3.msra.mxu1 %v6244_v16 }
0x35e0   :  { %v5965_v22 = vpop.f32.mrb[80].mxu0 }
0x35e1   :  { %v5969_v23 = vadd.f32 %v5965_v22, %v5893_v21  ;;  %v8832_v25 = vpop.f32.mrb[81].mxu0 }
0x35e3   :  { %5970 = vst.msk [vmem:[#allocation2 + $0x8] sm:$0xff] %vm311_vm6, %v5969_v23 }
0x35ea   :  { %v6648_v22 = vld [vmem:[#allocation2 + $0x8] sm:$0xff] }
0x35f0   :  { %v8870_v27 = vpop.f32.mrb[82].mxu0 }
0x35f1   :  { %v6152_v28 = vadd.f32 %v8870_v27, %v7624_v26  ;;  %v6146_v24 = vpop.f32.mrb[83].mxu0 }
0x35f2   :  { %v6147_v29 = vadd.f32 %v7624_v26, %v6146_v24 }
0x35f4   :  { %8891 = vmatpush3.xpose.msk.msra.mxu0 %vm138_vm0, %v6147_v29 }
0x35f5   :  { %8895 = vmatprep.subr.mxu0 %v9683_v17 }
0x35f7   :  { %8893 = vmatmul.mubr.msk.f32.vlgmr.msra.gmra.mrb[84].mxu0 %vm138_vm0, %v6055_v30 }
0x35f8   :  { %8896 = vmatpush3.msra.mxu0 %v6239_v20  ;;  %8897 = vmatprep.mubr.msk.f32.mxu0 %vm9684_vm7, %v9683_v17 }
0x35f9   :  { %9483 = vmatprep.subr.bf16.mxu0 %v9685_v58 }
0x36ca   :  { %v6319_v31 = vpop.f32.mrb[84].mxu0 }
0x36cb   :  { %v6323_v32 = vmul.f32 0.25, %v6319_v31  ;;  %v8894_v33 = vpop.f32.mrb[85].mxu0 }
0x36cd   :  { %v6324_v36 = vsel %vm717_vm8, %v6323_v32, -inf }
0x36ce   :  { %6325 = vmax.xlane.f32.xlu1 %v6324_v36  ;;  %v7655_v36 = vld [vmem:[%s11273_s17 + $0x40] sm:$0xff] }
0x375b   :  { %v6326_v37 = vpop.xlane.xlu1 %6325 }
0x375c   :  { %v6327_v38 = vsub.f32 %v6323_v32, %v6326_v37  ;;  %v7656_v37 = vld [vmem:[%s11273_s17 + $0x48] sm:$0xff] }
0x375e   :  { %v6328_v39 = vmul.f32 1.442695, %v6327_v38  ;;  %v9489_v38 = vpack.c.bf16 %v7656_v37, %v7655_v36 }
0x3760   :  { %9640 = vpow2.f32 %v6328_v39  ;;  %9490 = vmatprep.subr.bf16.mxu1 %v9489_v38  ;;  %v7658_v39 = vld [vmem:[%s11273_s17 + $0x58] sm:$0xff] }
0x376a   :  { %v9641_v40 = vpop.eup %9640 }
0x376b   :  { %v6330_v41 = vsel %vm717_vm8, %v9641_v40, 0.0 }
0x376c   :  { %6331 = vadd.xlane.f32.xlu0 %v6330_v41  ;;  %v7659_v41 = vld [vmem:[%s11273_s17 + $0x60] sm:$0xff] }
0x37f9   :  { %v6332_v42 = vpop.xlane.xlu0 %6331 }
0x37fa   :  { %9642 = vrcp.f32 %v6332_v42  ;;  %v7660_v42 = vld [vmem:[%s11273_s17 + $0x68] sm:$0xff] }
0x37fb   :  { %v9497_v43 = vpack.c.bf16 %v7660_v42, %v7659_v41 }
0x3804   :  { %v9643_v45 = vpop.eup %9642 }
0x3805   :  { %v6334_v47 = vmul.f32 %v9643_v45, %v9641_v40  ;;  %v7662_v45 = vld [vmem:[%s11273_s17 + $0x78] sm:$0xff] }
0x3807   :  { %8898 = vmatmul.mubr.msk.f32.vlgmr.msra.gmra.mrb[86].mxu0 %vm717_vm8, %v6334_v47  ;;  %v7667_v47 = vld [vmem:[%s11275_s19 + $0x80] sm:$0xff] }
0x3808   :  { %9485 = vmatpush3.bf16.msra.mxu0 %v9484_v46  ;;  %8904 = vmatprep.mubr.msk.f32.mxu0 %vm9684_vm7, %v9683_v17 }
0x3809   :  { %8907 = vmatprep.subr.mxu0 %v9683_v17 }
0x38da   :  { %v6404_v49 = vpop.f32.mrb[86].mxu0 }
0x38db   :  { %v8899_v10 = vpop.f32.mrb[87].mxu0  ;;  %8905 = vmatmul.mubr.msk.f32.vlgmr.msra.gmra.mrb[88].mxu0 %vm138_vm0, %v6404_v49  ;;  %v7668_v49 = vld [vmem:[%s11275_s19 + $0x88] sm:$0xff] }
0x38dc   :  { %8908 = vmatpush3.xpose.msk.msra.mxu0 %vm138_vm0, %v6152_v28  ;;  %8909 = vmatprep.mubr.msk.f32.mxu0 %vm9684_vm7, %v9683_v17  ;;  %v9505_v10 = vpack.c.bf16 %v7668_v49, %v7667_v47 }
0x38dd   :  { %9486 = vmatprep.subr.bf16.mxu0 %v9685_v58 }
0x38df   :  { %8910 = vmatmul.mubr.msk.f32.vlgmr.msra.gmra.mrb[90].mxu0 %vm138_vm0, %v6060_v12 }
0x38e0   :  { %9488 = vmatpush3.bf16.msra.mxu0 %v9484_v46  ;;  %8921 = vmatprep.mubr.msk.f32.mxu0 %vm9684_vm7, %v9683_v17  ;;  %v9501_v46 = vpack.c.bf16 %v7662_v45, %v7661_v44 }
0x38e1   :  { %9506 = vmatprep.subr.bf16.mxu0 %v9505_v10 }
0x39ae   :  { %v6481_v50 = vpop.f32.mrb[88].mxu0 }
0x39af   :  { %v6485_v51 = vadd.f32 %v6481_v50, %v6408_v48  ;;  %v8906_v52 = vpop.f32.mrb[89].mxu0 }
0x39b1   :  { %6486 = vst.msk [vmem:[#allocation2] sm:$0xff] %vm311_vm6, %v6485_v51 }
0x39b2   :  { %v6559_v53 = vpop.f32.mrb[90].mxu0 }
0x39b3   :  { %v6563_v54 = vmul.f32 0.25, %v6559_v53  ;;  %v8911_v55 = vpop.f32.mrb[91].mxu0 }
0x39b5   :  { %v6564_v56 = vsel %vm717_vm8, %v6563_v54, -inf }
0x39b6   :  { %6565 = vmax.xlane.f32.xlu1 %v6564_v56  ;;  %v7669_v56 = vld [vmem:[%s11275_s19 + $0x90] sm:$0xff] }
0x39b8   :  { %v6726_v57 = vld [vmem:[#allocation2] sm:$0xff] }
0x39b9   :  { %v6728_v58 = vadd.f32 %v6726_v57, %v10600_v34  ;;  %v7670_v57 = vld [vmem:[%s11275_s19 + $0x98] sm:$0xff] }
0x39bb   :  { %v6734_v59 = vsel %vm311_vm6, %v6728_v58, 0.0 }
0x39bc   :  { %6735 = vadd.xlane.f32.xlu1 %v6734_v59  ;;  %v7671_v59 = vld [vmem:[%s11275_s19 + $0xa0] sm:$0xff] }
0x3a43   :  { %v6566_v60 = vpop.xlane.xlu1 %6565 }
0x3a44   :  { %v6567_v61 = vsub.f32 %v6563_v54, %v6566_v60  ;;  %v7672_v60 = vld [vmem:[%s11275_s19 + $0xa8] sm:$0xff] }
0x3a46   :  { %v6568_v62 = vmul.f32 1.442695, %v6567_v61  ;;  %v9513_v61 = vpack.c.bf16 %v7672_v60, %v7671_v59  ;;  %v7042_v60 = vld [vmem:[%s11279_s23 + $0x10] sm:$0xff] }
0x3a48   :  { %9644 = vpow2.f32 %v6568_v62  ;;  %v7673_v62 = vld [vmem:[%s11275_s19 + $0xb0] sm:$0xff] }
0x3a49   :  { %v6736_v19 = vpop.xlane.xlu1 %6735 }
0x3a4a   :  { %v6740_v63 = vmul.f32 0.015625, %v6736_v19  ;;  %v7674_v19 = vld [vmem:[%s11275_s19 + $0xb8] sm:$0xff] }
0x3a4c   :  { %v6742_v0 = vsub.f32 %v6728_v58, %v6740_v63  ;;  %v9509_v58 = vpack.c.bf16 %v7670_v57, %v7669_v56  ;;  %v9517_v63 = vpack.c.bf16 %v7674_v19, %v7673_v62  ;;  %v7044_v19 = vld [vmem:[%s11279_s23 + $0x20] sm:$0xff] }
0x3a4e   :  { %v6744_v1 = vmul.f32 %v6742_v0, %v6742_v0 }
0x3a50   :  { %v6746_v2 = vsel %vm311_vm6, %v6744_v1, 0.0  ;;  %v7676_v1 = vld [vmem:[%s11275_s19 + $0xc8] sm:$0xff] }
0x3a51   :  { %6747 = vadd.xlane.f32.xlu1 %v6746_v2 }
0x3a52   :  { %v9645_v3 = vpop.eup %9644 }
0x3a53   :  { %v6570_v4 = vsel %vm717_vm8, %v9645_v3, 0.0 }
0x3a54   :  { %6571 = vadd.xlane.f32.xlu0 %v6570_v4  ;;  %v7678_v4 = vld [vmem:[%s11275_s19 + $0xd8] sm:$0xff] }
0x3ade   :  { %v6748_v5 = vpop.xlane.xlu1 %6747 }
0x3adf   :  { %v6752_v34 = vmul.f32 0.015625, %v6748_v5 }
0x3ae1   :  { %v6754_v6 = vadd.f32 1e-12, %v6752_v34  ;;  %v6572_v7 = vpop.xlane.xlu0 %6571  ;;  %v7679_v34 = vld [vmem:[%s11275_s19 + $0xe0] sm:$0xff] }
0x3ae2   :  { %9646 = vrcp.f32 %v6572_v7 }
0x3ae3   :  { %9648 = vrsqrt.f32 %v6754_v6  ;;  %v7680_v6 = vld [vmem:[%s11275_s19 + $0xe8] sm:$0xff] }
0x3ae4   :  { %v9529_v7 = vpack.c.bf16 %v7680_v6, %v7679_v34 }
0x3aec   :  { %v9647_v9 = vpop.eup %9646 }
0x3aed   :  { %v9649_v11 = vpop.eup %9648  ;;  %v6574_v12 = vmul.f32 %v9647_v9, %v9645_v3  ;;  %v7677_v3 = vld [vmem:[%s11275_s19 + $0xd0] sm:$0xff] }
0x3aee   :  { %v6758_v14 = vmul.f32 %v9649_v11, %v6742_v0  ;;  %v7675_v0 = vld [vmem:[%s11275_s19 + $0xc0] sm:$0xff]  ;;  %v9525_v5 = vpack.c.bf16 %v7678_v4, %v7677_v3  ;;  %v7681_v9 = vld [vmem:[%s11275_s19 + $0xf0] sm:$0xff]  ;;  %v7682_v11 = vld [vmem:[%s11275_s19 + $0xf8] sm:$0xff] }
0x3aef   :  { %8915 = vmatmul.mubr.msk.f32.vlgmr.msra.gmra.mrb[54].mxu1 %vm717_vm8, %v6574_v12  ;;  %v9521_v2 = vpack.c.bf16 %v7676_v1, %v7675_v0  ;;  %v9533_v12 = vpack.c.bf16 %v7682_v11, %v7681_v9  ;;  %v7046_v1 = vld [vmem:[%s11279_s23 + $0x30] sm:$0xff] }
0x3af0   :  { %v6766_v16 = vmul.f32 %v7653_v13, %v6758_v14  ;;  %9492 = vmatpush3.bf16.msra.mxu1 %v9489_v38 }
0x3af2   :  { %v11074_v18 = vadd.f32 %v7654_v15, %v6766_v16 }
0x3af4   :  { %8940 = vmatprep.mubr.msk.f32.mxu1 %vm311_vm6, %v11074_v18 }
0x3bc2   :  { %v6644_v20 = vpop.f32.mrb[54].mxu1 }
0x3bc3   :  { %v8916_v21 = vpop.f32.mrb[55].mxu1  ;;  %8922 = vmatmul.mubr.msk.f32.vlgmr.msra.gmra.mrb[92].mxu0 %vm138_vm0, %v6644_v20 }
0x3bc4   :  { %9508 = vmatpush3.bf16.msra.mxu0 %v9505_v10 }
0x3bc5   :  { %9510 = vmatprep.subr.bf16.mxu0 %v9509_v58 }
0x3bc8   :  { %9512 = vmatpush3.bf16.msra.mxu0 %v9509_v58  ;;  %v7041_v58 = vld [vmem:[%s11279_s23 + $0x8] sm:$0xff] }
0x3bc9   :  { %9514 = vmatprep.subr.bf16.mxu0 %v9513_v61 }
0x3bcc   :  { %9516 = vmatpush3.bf16.msra.mxu0 %v9513_v61  ;;  %v7043_v61 = vld [vmem:[%s11279_s23 + $0x18] sm:$0xff] }
0x3bcd   :  { %9518 = vmatprep.subr.bf16.mxu0 %v9517_v63  ;;  %v9541_v62 = vpack.c.bf16 %v7043_v61, %v7042_v60 }
0x3bd0   :  { %9520 = vmatpush3.bf16.msra.mxu0 %v9517_v63  ;;  %v7045_v63 = vld [vmem:[%s11279_s23 + $0x28] sm:$0xff] }
0x3bd1   :  { %9522 = vmatprep.subr.bf16.mxu0 %v9521_v2  ;;  %v9545_v0 = vpack.c.bf16 %v7045_v63, %v7044_v19 }
0x3bd4   :  { %9524 = vmatpush3.bf16.msra.mxu0 %v9521_v2  ;;  %v7047_v2 = vld [vmem:[%s11279_s23 + $0x38] sm:$0xff] }
0x3bd5   :  { %9526 = vmatprep.subr.bf16.mxu0 %v9525_v5  ;;  %v9549_v3 = vpack.c.bf16 %v7047_v2, %v7046_v1 }
0x3bd8   :  { %9528 = vmatpush3.bf16.msra.mxu0 %v9525_v5 }
0x3bd9   :  { %9530 = vmatprep.subr.bf16.mxu0 %v9529_v7 }
0x3bdc   :  { %9532 = vmatpush3.bf16.msra.mxu0 %v9529_v7 }
0x3bdd   :  { %9534 = vmatprep.subr.bf16.mxu0 %v9533_v12 }
0x3be0   :  { %9536 = vmatpush3.bf16.msra.mxu0 %v9533_v12  ;;  %v7687_v12 = vld [vmem:[%s11314_s3 + $0x1] ss:$0 sm:$0xff] }
0x3c96   :  { %v6720_v23 = vpop.f32.mrb[92].mxu0 }
0x3c97   :  { %v6724_v25 = vadd.f32 %v6720_v23, %v6648_v22  ;;  %v8923_v26 = vpop.f32.mrb[93].mxu0 }
0x3c99   :  { %6725 = vst.msk [vmem:[#allocation2 + $0x8] sm:$0xff] %vm311_vm6, %v6724_v25 }
0x3ca0   :  { %v6727_v27 = vld [vmem:[#allocation2 + $0x8] sm:$0xff] }
0x3ca1   :  { %v6729_v28 = vadd.f32 %v6727_v27, %v10602_v35  ;;  %v7657_v35 = vld [vmem:[%s11273_s17 + $0x50] sm:$0xff] }
0x3ca2   :  { %v9493_v40 = vpack.c.bf16 %v7658_v39, %v7657_v35 }
0x3ca3   :  { %v6737_v24 = vsel %vm311_vm6, %v6729_v28, 0.0 }
0x3ca4   :  { %6738 = vadd.xlane.f32.xlu0 %v6737_v24  ;;  %9494 = vmatprep.subr.bf16.mxu1 %v9493_v40 }
0x3ca5   :  { %9496 = vmatpush3.bf16.msra.mxu1 %v9493_v40  ;;  %v7684_v40 = vld [vmem:[%s11276_s20 + $0x1] ss:$0 sm:$0xff] }
0x3ca6   :  { %9498 = vmatprep.subr.bf16.mxu1 %v9497_v43 }
0x3ca9   :  { %9500 = vmatpush3.bf16.msra.mxu1 %v9497_v43 }
0x3caa   :  { %9502 = vmatprep.subr.bf16.mxu1 %v9501_v46 }
0x3cad   :  { %9504 = vmatpush3.bf16.msra.mxu1 %v9501_v46 }
0x3d31   :  { %v6739_v29 = vpop.xlane.xlu0 %6738 }
0x3d32   :  { %v6741_v30 = vmul.f32 0.015625, %v6739_v29 }
0x3d34   :  { %v6743_v31 = vsub.f32 %v6729_v28, %v6741_v30 }
0x3d36   :  { %v6745_v32 = vmul.f32 %v6743_v31, %v6743_v31 }
0x3d38   :  { %v6749_v33 = vsel %vm311_vm6, %v6745_v32, 0.0 }
0x3d39   :  { %6750 = vadd.xlane.f32.xlu0 %v6749_v33 }
0x3dc6   :  { %v6751_v48 = vpop.xlane.xlu0 %6750 }
0x3dc7   :  { %v6753_v50 = vmul.f32 0.015625, %v6751_v48 }
0x3dc9   :  { %v6755_v51 = vadd.f32 1e-12, %v6753_v50 }
0x3dcb   :  { %9650 = vrsqrt.f32 %v6755_v51 }
0x3dd5   :  { %v9651_v52 = vpop.eup %9650 }
0x3dd6   :  { %v6759_v53 = vmul.f32 %v9651_v52, %v6743_v31 }
0x3dd8   :  { %v6767_v54 = vmul.f32 %v7653_v13, %v6759_v53  ;;  %v7664_v13 = vld [vmem:[%s11274_s18 + $0x1] ss:$0 sm:$0xff] }
0x3dda   :  { %v11113_v55 = vadd.f32 %v7654_v15, %v6767_v54 }
0x3ddc   :  { %8941 = vmatmul.mubr.msk.f32.vlgmr.msra.gmra.mrb[56].mxu1 %vm311_vm6, %v11113_v55 }
0x3eaf   :  { %v8942_v14 = vpop.f32.mrb[56].mxu1 }
0x3eb0   :  { %v6871_v15 = vadd.f32 %v8942_v14, %v7664_v13  ;;  %v6865_v16 = vpop.f32.mrb[57].mxu1 }
0x3eb1   :  { %v6866_v20 = vadd.f32 %v7664_v13, %v6865_v16  ;;  %v7688_v16 = vld [vmem:[%s11278_s22 + $0x1] ss:$0 sm:$0xff] }
0x3eb2   :  { %v6877_v21 = vmul.f32 0.044715, %v6871_v15  ;;  %v6875_v38 = vmul.f32 0.5, %v6871_v15 }
0x3eb3   :  { %v6876_v22 = vmul.f32 0.044715, %v6866_v20  ;;  %v6874_v36 = vmul.f32 0.5, %v6866_v20 }
0x3eb4   :  { %v6879_v23 = vmul.f32 %v6877_v21, %v6871_v15 }
0x3eb5   :  { %v6878_v25 = vmul.f32 %v6876_v22, %v6866_v20 }
0x3eb6   :  { %v6881_v26 = vmul.f32 %v6879_v23, %v6871_v15 }
0x3eb7   :  { %v6880_v27 = vmul.f32 %v6878_v25, %v6866_v20  ;;  %v7689_v25 = vld [vmem:[%s11280_s24] ss:$0 sm:$0xff] }
0x3eb8   :  { %v6883_v28 = vadd.f32 %v6881_v26, %v6871_v15 }
0x3eb9   :  { %v6882_v24 = vadd.f32 %v6880_v27, %v6866_v20 }
0x3eba   :  { %v6885_v29 = vmul.f32 0.7978846, %v6883_v28 }
0x3ebb   :  { %v6884_v30 = vmul.f32 0.7978846, %v6882_v24 }
0x3ebc   :  { %9652 = vtanh.f32 %v6885_v29 }
0x3ebd   :  { %9654 = vtanh.f32 %v6884_v30 }
0x3ec6   :  { %v9653_v31 = vpop.eup %9652 }
0x3ec7   :  { %v9655_v32 = vpop.eup %9654  ;;  %v6889_v33 = vadd.f32 1.0, %v9653_v31  ;;  %v7136_v31 = vld [vmem:[%s11315_s8] sm:$0xff] }
0x3ec8   :  { %v6888_v37 = vadd.f32 1.0, %v9655_v32  ;;  %v7137_v32 = vld [vmem:[%s11315_s8 + $0x8] sm:$0xff]  ;;  %vm7220_vm11 = vcmp.ne.s32.totalorder %v7136_v31, 0 }
0x3ec9   :  { %v6891_v39 = vmul.f32 %v6889_v33, %v6875_v38  ;;  %vm7221_vm12 = vcmp.ne.s32.totalorder %v7137_v32, 0 }
0x3eca   :  { %v6890_v35 = vmul.f32 %v6888_v37, %v6874_v36 }
0x3ecc   :  { %8975 = vmatprep.mubr.f32.mxu0 %v6890_v35 }
0x3ecd   :  { %8976 = vmatmul.mubr.f32.vlgmr.msra.gmra.mrb[94].mxu0 %v6891_v39 }
0x3fa0   :  { %v8977_v41 = vpop.f32.mrb[94].mxu0 }
0x3fa1   :  { %v6989_v42 = vadd.f32 %v8977_v41, %v7684_v40  ;;  %v6983_v43 = vpop.f32.mrb[95].mxu0 }
0x3fa2   :  { %v6984_v44 = vadd.f32 %v7684_v40, %v6983_v43 }
0x3fa3   :  { %v6993_v45 = vadd.f32 %v6989_v42, %v11113_v55 }
0x3fa4   :  { %v6992_v46 = vadd.f32 %v6984_v44, %v11074_v18  ;;  %v7040_v18 = vld [vmem:[%s11279_s23] sm:$0xff] }
0x3fa5   :  { %v7001_v47 = vsel %vm311_vm6, %v6993_v45, 0.0  ;;  %v9537_v59 = vpack.c.bf16 %v7041_v58, %v7040_v18 }
0x3fa6   :  { %7002 = vadd.xlane.f32.xlu0 %v7001_v47  ;;  %v6998_v49 = vsel %vm311_vm6, %v6992_v46, 0.0 }
0x3fa7   :  { %6999 = vadd.xlane.f32.xlu1 %v6998_v49  ;;  %9538 = vmatprep.subr.bf16.mxu1 %v9537_v59 }
0x3fa8   :  { %9540 = vmatpush3.bf16.msra.mxu1 %v9537_v59 }
0x3fa9   :  { %9542 = vmatprep.subr.bf16.mxu1 %v9541_v62 }
0x3fac   :  { %9544 = vmatpush3.bf16.msra.mxu1 %v9541_v62 }
0x3fad   :  { %9546 = vmatprep.subr.bf16.mxu1 %v9545_v0 }
0x3fb0   :  { %9548 = vmatpush3.bf16.msra.mxu1 %v9545_v0 }
0x3fb1   :  { %9550 = vmatprep.subr.bf16.mxu1 %v9549_v3 }
0x3fb4   :  { %9552 = vmatpush3.bf16.msra.mxu1 %v9549_v3 }
0x4033   :  { %v7003_v10 = vpop.xlane.xlu0 %7002 }
0x4034   :  { %v7005_v48 = vmul.f32 0.015625, %v7003_v10  ;;  %v7000_v50 = vpop.xlane.xlu1 %6999 }
0x4035   :  { %v7004_v51 = vmul.f32 0.015625, %v7000_v50 }
0x4036   :  { %v7007_v52 = vsub.f32 %v6993_v45, %v7005_v48  ;;  %v7694_v45 = vsel %vm7220_vm11, 1.0, %v9683_v17 }
0x4037   :  { %v7006_v53 = vsub.f32 %v6992_v46, %v7004_v51  ;;  %v7695_v46 = vsel %vm7221_vm12, 1.0, %v9683_v17 }
0x4038   :  { %v7009_v54 = vmul.f32 %v7007_v52, %v7007_v52 }
0x4039   :  { %v7008_v56 = vmul.f32 %v7006_v53, %v7006_v53 }
0x403a   :  { %v7013_v57 = vsel %vm311_vm6, %v7009_v54, 0.0 }
0x403b   :  { %7014 = vadd.xlane.f32.xlu0 %v7013_v57  ;;  %v7010_v55 = vsel %vm311_vm6, %v7008_v56, 0.0 }
0x403c   :  { %7011 = vadd.xlane.f32.xlu1 %v7010_v55 }
0x40c8   :  { %v7015_v4 = vpop.xlane.xlu0 %7014 }
0x40c9   :  { %v7017_v5 = vmul.f32 0.015625, %v7015_v4  ;;  %v7012_v34 = vpop.xlane.xlu1 %7011 }
0x40ca   :  { %v7016_v6 = vmul.f32 0.015625, %v7012_v34 }
0x40cb   :  { %v7019_v7 = vadd.f32 1e-12, %v7017_v5 }
0x40cc   :  { %v7018_v9 = vadd.f32 1e-12, %v7016_v6 }
0x40cd   :  { %9656 = vrsqrt.f32 %v7019_v7 }
0x40ce   :  { %9658 = vrsqrt.f32 %v7018_v9 }
0x40d7   :  { %v9657_v11 = vpop.eup %9656 }
0x40d8   :  { %v9659_v13 = vpop.eup %9658  ;;  %v7023_v14 = vmul.f32 %v9657_v11, %v7007_v52  ;;  %v7241_v52 = vsel %vm7228_vm14, %v7694_v45, 0.0 }
0x40d9   :  { %v7022_v15 = vmul.f32 %v9659_v13, %v7006_v53  ;;  %v7242_v53 = vsel %vm7228_vm14, %v7695_v46, 0.0 }
0x40da   :  { %v7031_v20 = vmul.f32 %v7687_v12, %v7023_v14  ;;  %v7243_v57 = vadd.f32 %v7242_v53, %v7241_v52 }
0x40db   :  { %v7030_v21 = vmul.f32 %v7687_v12, %v7022_v15 }
0x40dc   :  { %v7039_v23 = vadd.f32 %v7688_v16, %v7031_v20 }
0x40dd   :  { %v7038_v22 = vadd.f32 %v7688_v16, %v7030_v21 }
0x40df   :  { %8994 = vmatprep.mubr.msk.f32.mxu1 %vm311_vm6, %v7038_v22 }
0x40e0   :  { %8995 = vmatmul.mubr.msk.f32.vlgmr.msra.gmra.mrb[58].mxu1 %vm311_vm6, %v7039_v23 }
0x41b3   :  { %v8996_v26 = vpop.f32.mrb[58].mxu1 }
0x41b4   :  { %v7133_v27 = vadd.f32 %v8996_v26, %v7689_v25  ;;  %v7127_v28 = vpop.f32.mrb[59].mxu1 }
0x41b5   :  { %v11206_v24 = vadd.f32 %v7689_v25, %v7127_v28 }
0x41b6   :  { %v7141_v29 = vsel %vm717_vm8, %v7133_v27, -inf }
0x41b7   :  { %7142 = vmax.xlane.f32.xlu0 %v7141_v29  ;;  %v7138_v30 = vsel %vm717_vm8, %v11206_v24, -inf }
0x41b8   :  { %7139 = vmax.xlane.f32.xlu1 %v7138_v30 }
0x41c9   :  { %7199 = vperm.xlu1 %9567, %v7136_v31  }
0x41cd   :  { %7202 = vperm.xlu0 %9566, %v7137_v32  }
0x4244   :  { %v7143_v33 = vpop.xlane.xlu0 %7142 }
0x4245   :  { %v7181_v36 = vsub.f32 %v7133_v27, %v7143_v33  ;;  %v7140_v37 = vpop.xlane.xlu1 %7139  ;;  %vm7145_vm13 = vcmp.eq.f32.partialorder %v7133_v27, %v7143_v33 }
0x4246   :  { %v7180_v38 = vsub.f32 %v11206_v24, %v7140_v37  ;;  %v7147_v51 = vsel %vm7145_vm13, %v9837_v8, 8  ;;  %vm7144_vm15 = vcmp.eq.f32.partialorder %v11206_v24, %v7140_v37 }
0x4247   :  { %v7184_v35 = vmul.f32 1.442695, %v7181_v36  ;;  %v7146_v9 = vsel %vm7144_vm15, %v9837_v8, 8 }
0x4248   :  { %v7182_v39 = vmul.f32 1.442695, %v7180_v38  ;;  %v7148_v14 = vsel %vm717_vm8, %v7146_v9, 2147483647 }
0x4249   :  { %9660 = vpow2.f32 %v7184_v35  ;;  %v7200_v40 = vpop.permute.xlu1 %7199  ;;  %v7150_v21 = vshra.s32 %v7148_v14, 16  ;;  %v7149_v31 = vand.u32 65535, %v7148_v14 }
0x424a   :  { %9662 = vpow2.f32 %v7182_v39  ;;  %vm7204_vm10 = vcmp.eq.s32.totalorder %v9837_v8, %v7200_v40 }
0x424b   :  { %v7692_v43 = vsel %vm7204_vm10, 1.0, %v9683_v17  ;;  %v7152_v22 = vcvt.s32.f32 %v7150_v21 }
0x424c   :  { %v7203_v41 = vpop.permute.xlu0 %7202  ;;  %v7210_v50 = vmul.f32 %v7692_v43, %v11206_v24 }
0x424d   :  { %vm7205_vm9 = vcmp.eq.s32.totalorder %v9837_v8, %v7203_v41 }
0x424e   :  { %v7693_v42 = vsel %vm7205_vm9, 1.0, %v9683_v17  ;;  %v7163_v17 = vsel %vm717_vm8, %v7147_v51, 2147483647  ;;  %v7212_v56 = vsel %vm717_vm8, %v7210_v50, 0.0 }
0x424f   :  { %v7211_v10 = vmul.f32 %v7693_v42, %v7133_v27  ;;  %v7165_v55 = vshra.s32 %v7163_v17, 16  ;;  %v7164_v62 = vand.u32 65535, %v7163_v17 }
0x4251   :  { %v7215_v54 = vsel %vm717_vm8, %v7211_v10, 0.0  ;;  %v7167_v18 = vcvt.s32.f32 %v7165_v55  ;;  %v7166_v2 = vcvt.s32.f32 %v7164_v62 }
0x4253   :  { %v9661_v44 = vpop.eup %9660 }
0x4254   :  { %v9663_v47 = vpop.eup %9662  ;;  %v7189_v49 = vsel %vm717_vm8, %v9661_v44, 0.0 }
0x4255   :  { %7190 = vadd.xlane.f32.xlu0 %v7189_v49  ;;  %v7186_v48 = vsel %vm717_vm8, %v9663_v47, 0.0 }
0x4256   :  { %7187 = vadd.xlane.f32.xlu1 %v7186_v48 }
0x4259   :  { %7216 = vadd.xlane.f32.xlu0 %v7215_v54 }
0x425a   :  { %7213 = vadd.xlane.f32.xlu1 %v7212_v56 }
0x425d   :  { %7244 = vadd.xlane.f32.xlu0 %v7243_v57 }
0x4261   :  { %7168 = vmin.xlane.f32.xlu0 %v7167_v18 }
0x42e2   :  { %v7191_v58 = vpop.xlane.xlu0 %7190 }
0x42e3   :  { %9664 = vlog2.f32 %v7191_v58  ;;  %v7188_v59 = vpop.xlane.xlu1 %7187 }
0x42e4   :  { %9666 = vlog2.f32 %v7188_v59 }
0x42e6   :  { %v7217_v60 = vpop.xlane.xlu0 %7216 }
0x42e7   :  { %v7214_v7 = vpop.xlane.xlu1 %7213 }
0x42ea   :  { %v7245_v61 = vpop.xlane.xlu0 %7244 }
0x42eb   :  { %v7246_v26 = vrot.slane %v7245_v61, 4 }
0x42ed   :  { %v9665_v19 = vpop.eup %9664  ;;  %v7247_v24 = vadd.f32 %v7246_v26, %v7245_v61 }
0x42ee   :  { %v9667_v63 = vpop.eup %9666  ;;  %v7195_v0 = vmul.f32 0.6931472, %v9665_v19  ;;  %v7169_v1 = vpop.xlane.xlu0 %7168 }
0x42ef   :  { %v7193_v3 = vmul.f32 0.6931472, %v9667_v63  ;;  %vm7170_vm0 = vcmp.eq.f32.partialorder %v7167_v18, %v7169_v1  ;;  %v7175_v23 = vcvt.f32.s32 %v7169_v1  ;;  %v7248_v29 = vrot.slane %v7247_v24, 2 }
0x42f0   :  { %v7197_v4 = vadd.f32 %v7195_v0, %v7143_v33  ;;  %v7171_v5 = vsel %vm7170_vm0, %v7166_v2, inf }
0x42f1   :  { %v7196_v34 = vadd.f32 %v7193_v3, %v7140_v37  ;;  %7172 = vmin.xlane.f32.xlu0 %v7171_v5  ;;  %v7176_v27 = vshll.u32 %v7175_v23, 16  ;;  %v7151_v37 = vcvt.s32.f32 %v7149_v31  ;;  %v7249_v38 = vadd.f32 %v7248_v29, %v7247_v24 }
0x42f2   :  { %v7219_v6 = vsub.f32 %v7197_v4, %v7217_v60 }
0x42f3   :  { %v7218_v11 = vsub.f32 %v7196_v34, %v7214_v7  ;;  %v7250_v41 = vrot.slane %v7249_v38, 1 }
0x42f4   :  { %v7227_v12 = vmul.f32 %v7695_v46, %v7219_v6 }
0x42f5   :  { %v7226_v13 = vmul.f32 %v7694_v45, %v7218_v11  ;;  %v7251_v44 = vadd.f32 %v7250_v41, %v7249_v38 }
0x42f6   :  { %v7230_v15 = vsel %vm7228_vm14, %v7227_v12, 0.0 }
0x42f7   :  { %v7229_v16 = vsel %vm7228_vm14, %v7226_v13, 0.0 }
0x42f8   :  { %v7231_v20 = vadd.f32 %v7230_v15, %v7229_v16 }
0x42fa   :  { %7232 = vadd.xlane.f32.xlu1 %v7231_v20 }
0x42fe   :  { %7153 = vmin.xlane.f32.xlu1 %v7152_v22 }
0x437e   :  { %v7173_v25 = vpop.xlane.xlu0 %7172 }
0x437f   :  { %v7174_v28 = vcvt.f32.s32 %v7173_v25 }
0x4381   :  { %v7177_v8 = vadd.s32 %v7176_v27, %v7174_v28 }
0x4383   :  { %7179 = vst [vmem:[%s11282_s26 + $0x8] sm:$0xff] %v7177_v8 }
0x4387   :  { %v7233_v30 = vpop.xlane.xlu1 %7232 }
0x4388   :  { %v7234_v32 = vrot.slane %v7233_v30, 4 }
0x438a   :  { %v7235_v33 = vadd.f32 %v7234_v32, %v7233_v30 }
0x438b   :  { %v7154_v36 = vpop.xlane.xlu1 %7153 }
0x438c   :  { %v7236_v35 = vrot.slane %v7235_v33, 2  ;;  %vm7155_vm1 = vcmp.eq.f32.partialorder %v7152_v22, %v7154_v36 }
0x438d   :  { %v7156_v39 = vsel %vm7155_vm1, %v7151_v37, inf }
0x438e   :  { %7157 = vmin.xlane.f32.xlu1 %v7156_v39  ;;  %v7237_v40 = vadd.f32 %v7236_v35, %v7235_v33 }
0x4390   :  { %v7238_v42 = vrot.slane %v7237_v40, 1 }
0x4392   :  { %v7239_v43 = vadd.f32 %v7238_v42, %v7237_v40 }
0x4394   :  { %9555 = vpush %v7239_v43 }
0x4395   :  { %9557 = vpush %v7251_v44 }
0x43c5   :  { %s9556_s20 = spop %9555 }
0x43c6   :  { %s9558_s9 = spop %9557 }
0x43c7   :  { %v7253_v45 = vstv %s9558_s9 }
0x43c8   :  { %9668 = vrcp.f32 %v7253_v45 }
0x43d2   :  { %v9669_v46 = vpop.eup %9668 }
0x43d3   :  { %9559 = vpush %v9669_v46 }
0x4404   :  { %s9560_s2 = spop %9559 }
0x4405   :  { %s7256_s11 = smul.f32 %s9560_s2, %s9556_s20 }
0x4407   :  { %7258 = sst [smem:[#allocation3]] %s7256_s11 }
0x4408   :  { %9679 = shalt.err (!%p9676_p2)
}
0x4409   :  { %s9686_s21 = smov [#allocation3]   ;;  %v7160_v47 = vcvt.f32.s32 %v7154_v36 }
0x440a   :  { %7266 = dma.smem_to_hbm %s9686_s21, 16, %s11281_s25, [#allocation4]  }
0x440b   :  { %v7161_v10 = vshll.u32 %v7160_v47, 16 }
0x441b   :  { %v7158_v49 = vpop.xlane.xlu1 %7157 }
0x441c   :  { %v7159_v48 = vcvt.f32.s32 %v7158_v49 }
0x441e   :  { %v7162_v50 = vadd.s32 %v7161_v10, %v7159_v48 }
0x4420   :  { %7178 = vst [vmem:[%s11282_s26] sm:$0xff] %v7162_v50 }
0x4421   :  { %9680 = dma.done.wait [#allocation4], 16  }
0x4422   :  { %9681 = vsyncadd [#allocation4], 4294967280 }
0x4423   :  { %7274 = sfence }
0x4424   :  { %7275 = vsyncpa [#allocation4], 1 }

</bundles_post_ra>
